<compile_context>
chip_gen: v5e
topology: v5e:2x2
jax: 0.10.0
libtpu: 0.0.40
codegen_flags: <defaults>
</compile_context>

<pallas_src>
import functools

import jax
import jax.numpy as jnp
from jax.experimental import pallas as pl
from jax.experimental.pallas import tpu as pltpu


def _layer_norm(x, eps=1e-5):
    # torch.layer_norm semantics: biased variance over the last dim, f32 math.
    mu = jnp.mean(x, axis=-1, keepdims=True)
    var = jnp.mean(jnp.square(x - mu), axis=-1, keepdims=True)
    return (x - mu) * jax.lax.rsqrt(var + eps)


# ---------------------------------------------------------------------------
# Kernel 1: Q/K/V projections, tiled over tokens.  Q is pre-scaled by
# 1/hidden_size; outputs are written heads-major (H, N, hs) in bf16.
# ---------------------------------------------------------------------------
def qkv_proj_kernel(num_heads, hidden_size, scale, src_ref,
                    wq_ref, bq_ref, wk_ref, bk_ref, wv_ref, bv_ref,
                    q_ref, k_ref, v_ref):
    H, hs = num_heads, hidden_size
    tm = src_ref.shape[0]
    x = src_ref[...].astype(jnp.bfloat16)           # bf16 MXU operand

    def proj(w_ref, b_ref):
        return jnp.dot(x, w_ref[...],
                       preferred_element_type=jnp.float32) + b_ref[...]

    def to_heads(t):                                 # (tm, D) f32 -> (H, tm, hs)
        return t.reshape(tm, H, hs).transpose(1, 0, 2)

    q_ref[...] = to_heads(proj(wq_ref, bq_ref) * scale).astype(q_ref.dtype)
    k_ref[...] = to_heads(proj(wk_ref, bk_ref)).astype(k_ref.dtype)
    v_ref[...] = to_heads(proj(wv_ref, bv_ref)).astype(v_ref.dtype)


# ---------------------------------------------------------------------------
# Kernel 2: flash-style attention over all B*S tokens + fc + layer_norm +
# FeedForward + LayerNorm, tiled (query tiles x KV tiles).
# ---------------------------------------------------------------------------
def attn_ffn_kernel(num_heads, hidden_size,
                    src_ref, q_ref, k_ref, v_ref,
                    wfc_ref, bfc_ref, w1_ref, b1_ref, w2_ref, b2_ref,
                    g2_ref, beta2_ref,
                    out_ref,
                    m_scr, l_scr, acc_scr):
    H, hs = num_heads, hidden_size
    tm = q_ref.shape[1]
    j = pl.program_id(1)

    @pl.when(j == 0)
    def _():
        m_scr[...] = jnp.full_like(m_scr, -jnp.inf)
        l_scr[...] = jnp.zeros_like(l_scr)
        acc_scr[...] = jnp.zeros_like(acc_scr)

    # Heads-batched score / value matmuls (bf16 MXU operands, f32 accumulate).
    q = q_ref[...]                         # (H, tm, hs) bf16, already * 1/hidden_size
    k = k_ref[...]                         # (H, tk, hs) bf16
    v = v_ref[...]                         # (H, tk, hs) bf16
    s = jnp.einsum('hqd,hkd->hqk', q, k,
                   preferred_element_type=jnp.float32)     # (H, tm, tk) f32

    # Online softmax update (elementwise math kept in f32).
    m_prev = m_scr[...]
    m_new = jnp.maximum(m_prev, s.max(axis=-1, keepdims=True))
    alpha = jnp.exp(m_prev - m_new)
    p = jnp.exp(s - m_new)
    l_scr[...] = alpha * l_scr[...] + p.sum(axis=-1, keepdims=True)
    acc_scr[...] = alpha * acc_scr[...] + jnp.einsum(
        'hqk,hkd->hqd', p.astype(jnp.bfloat16), v,
        preferred_element_type=jnp.float32)
    m_scr[...] = m_new

    # Finalize once per query tile: normalize, attention fc + residual + LN,
    # feed-forward + residual + affine LN.
    @pl.when(j == pl.num_programs(1) - 1)
    def _():
        inv_l = pl.reciprocal(l_scr[...], approx=True)          # EUP slot
        # Single head-concat relayout per query tile; full-K (D) fc matmul.
        attn = (acc_scr[...] * inv_l).transpose(1, 0, 2).reshape(tm, H * hs)

        x = src_ref[...]                                        # f32 residual
        fc = jnp.dot(attn.astype(jnp.bfloat16), wfc_ref[...],
                     preferred_element_type=jnp.float32) + bfc_ref[...]
        a = _layer_norm(fc + x)                   # torch.layer_norm, no affine

        h1 = jnp.maximum(
            jnp.dot(a.astype(jnp.bfloat16), w1_ref[...],
                    preferred_element_type=jnp.float32) + b1_ref[...], 0.0)
        h2 = jnp.dot(h1.astype(jnp.bfloat16), w2_ref[...],
                     preferred_element_type=jnp.float32) + b2_ref[...]
        y = _layer_norm(a + h2) * g2_ref[...] + beta2_ref[...]   # nn.LayerNorm
        out_ref[...] = y.astype(out_ref.dtype)


def bert_forward(src, params, num_heads, hidden_size, *,
                 block_q=None, block_kv=None, block_proj=None,
                 vmem_limit_bytes=48 * 1024 * 1024):
    B, S, D = src.shape
    N = B * S
    H, hs = num_heads, hidden_size
    assert D == H * hs
    dff = params['w1'].shape[1]

    # Token-tile sizes.  Rough VMEM budget for kernel 2: resident bf16 weights
    # (+ their pipeline copy) + double-buffered (block_q, D) src/out tiles +
    # (H, block, hs) q/k/v tiles + f32 (H, block_q, block_kv) score tile +
    # (block_q, dff) FF intermediate.  Must fit 64 MiB on v7x (block_q ~256
    # for BERT-base), 128 MiB on v5e/v6e.
    if block_q is None:
        block_q = min(256, N)
    if block_kv is None:
        block_kv = min(512, N)
    if block_proj is None:
        block_proj = min(512, N)          # projection kernel is cheap on VMEM
    assert N % block_q == 0 and N % block_kv == 0 and N % block_proj == 0, \
        "token count must tile evenly"
    assert block_q % 8 == 0 and block_kv % 8 == 0 and block_proj % 8 == 0

    x = src.reshape(N, D).astype(jnp.float32)
    const = lambda *_: (0, 0)      # weights / biases stay VMEM-resident

    # ---- kernel 1: Q/K/V projection (Q pre-scaled by 1/hidden_size) ----
    qkv_out_spec = pl.BlockSpec((H, block_proj, hs), lambda i: (0, i, 0))
    q, k, v = pl.pallas_call(
        functools.partial(qkv_proj_kernel, H, hs, 1.0 / hidden_size),
        grid=(N // block_proj,),
        in_specs=[
            pl.BlockSpec((block_proj, D), lambda i: (i, 0)),             # src
            pl.BlockSpec((D, D), const), pl.BlockSpec((1, D), const),    # wq, bq
            pl.BlockSpec((D, D), const), pl.BlockSpec((1, D), const),    # wk, bk
            pl.BlockSpec((D, D), const), pl.BlockSpec((1, D), const),    # wv, bv
        ],
        out_specs=(qkv_out_spec, qkv_out_spec, qkv_out_spec),
        out_shape=(jax.ShapeDtypeStruct((H, N, hs), jnp.bfloat16),) * 3,
        compiler_params=pltpu.CompilerParams(
            dimension_semantics=("parallel",),
            vmem_limit_bytes=vmem_limit_bytes),
    )(x, params['wq'], params['bq'], params['wk'], params['bk'],
      params['wv'], params['bv'])

    # ---- kernel 2: flash attention + fc + LN + FeedForward + LN ----
    out = pl.pallas_call(
        functools.partial(attn_ffn_kernel, H, hs),
        grid=(N // block_q, N // block_kv),
        in_specs=[
            pl.BlockSpec((block_q, D), lambda i, j: (i, 0)),         # src residual
            pl.BlockSpec((H, block_q, hs), lambda i, j: (0, i, 0)),  # q
            pl.BlockSpec((H, block_kv, hs), lambda i, j: (0, j, 0)), # k
            pl.BlockSpec((H, block_kv, hs), lambda i, j: (0, j, 0)), # v
            pl.BlockSpec((D, D), const), pl.BlockSpec((1, D), const),      # wfc, bfc
            pl.BlockSpec((D, dff), const), pl.BlockSpec((1, dff), const),  # w1, b1
            pl.BlockSpec((dff, D), const), pl.BlockSpec((1, D), const),    # w2, b2
            pl.BlockSpec((1, D), const), pl.BlockSpec((1, D), const),      # g2, beta2
        ],
        out_specs=pl.BlockSpec((block_q, D), lambda i, j: (i, 0)),
        out_shape=jax.ShapeDtypeStruct((N, D), jnp.float32),
        scratch_shapes=[
            pltpu.VMEM((H, block_q, 1), jnp.float32),     # running max
            pltpu.VMEM((H, block_q, 1), jnp.float32),     # running denominator
            pltpu.VMEM((H, block_q, hs), jnp.float32),    # output accumulator
        ],
        compiler_params=pltpu.CompilerParams(
            dimension_semantics=("parallel", "arbitrary"),
            vmem_limit_bytes=vmem_limit_bytes),
    )(x, q, k, v,
      params['wfc'], params['bfc'], params['w1'], params['b1'],
      params['w2'], params['b2'], params['g2'], params['beta2'])

    return out.reshape(B, S, D)


def init_params(key, d_model, dim_feedforward):
    ks = jax.random.split(key, 12)

    def lin(kw, kb, din, dout, scale):
        # Weights stored pre-transposed (in, out) in bf16 (MXU operand dtype);
        # biases in f32 (added to the f32 accumulator).
        w = (scale * jax.random.normal(kw, (din, dout), dtype=jnp.float32)
             ).astype(jnp.bfloat16)
        b = 0.1 * jax.random.normal(kb, (1, dout), dtype=jnp.float32)
        return w, b

    wq, bq = lin(ks[0], ks[1], d_model, d_model, 0.2)
    wk, bk = lin(ks[2], ks[3], d_model, d_model, 0.2)
    wv, bv = lin(ks[4], ks[5], d_model, d_model, 0.2)
    wfc, bfc = lin(ks[6], ks[7], d_model, d_model, 0.1)
    w1, b1 = lin(ks[8], ks[9], d_model, dim_feedforward, 0.1)
    w2, b2 = lin(ks[10], ks[11], dim_feedforward, d_model, 0.1)
    g2 = jnp.ones((1, d_model), jnp.float32)       # nn.LayerNorm weight (init 1)
    beta2 = jnp.zeros((1, d_model), jnp.float32)   # nn.LayerNorm bias (init 0)
    return dict(wq=wq, bq=bq, wk=wk, bk=bk, wv=wv, bv=bv,
                wfc=wfc, bfc=bfc, w1=w1, b1=b1, w2=w2, b2=b2,
                g2=g2, beta2=beta2)


def bert_reference(src, params, num_heads, hidden_size):
    """Pure-JAX reference with the same bf16-matmul / f32-accumulate recipe."""
    B, S, D = src.shape
    N = B * S
    H, hs = num_heads, hidden_size
    bf16 = jnp.bfloat16

    def mm(a, w, b):
        return jnp.dot(a.astype(bf16), w, preferred_element_type=jnp.float32) + b

    x = src.reshape(N, D).astype(jnp.float32)
    q = mm(x, params['wq'], params['bq']) * (1.0 / hidden_size)
    k = mm(x, params['wk'], params['bk'])
    v = mm(x, params['wv'], params['bv'])
    heads = lambda t: t.reshape(N, H, hs).transpose(1, 0, 2).astype(bf16)
    qh, kh, vh = heads(q), heads(k), heads(v)
    s = jnp.einsum('hqd,hkd->hqk', qh, kh, preferred_element_type=jnp.float32)
    p = jax.nn.softmax(s, axis=-1)
    attn = jnp.einsum('hqk,hkd->hqd', p.astype(bf16), vh,
                      preferred_element_type=jnp.float32)
    attn = attn.transpose(1, 0, 2).reshape(N, D)
    fc = mm(attn, params['wfc'], params['bfc'])
    a = _layer_norm(fc + x)
    h1 = jnp.maximum(mm(a, params['w1'], params['b1']), 0.0)
    h2 = mm(h1, params['w2'], params['b2'])
    y = _layer_norm(a + h2) * params['g2'] + params['beta2']
    return y.reshape(B, S, D)


if __name__ == "__main__":
    batch_size = 2
    max_seq_length = 64
    num_heads = 4
    hidden_size = 32
    d_model = num_heads * hidden_size          # 128 -> lane-aligned blocks
    dim_feedforward = 256

    key = jax.random.PRNGKey(0)
    k_src, k_par = jax.random.split(key)
    src = jax.random.normal(k_src, (batch_size, max_seq_length, d_model),
                            dtype=jnp.float32)
    params = init_params(k_par, d_model, dim_feedforward)

    # block_q = block_kv = 64 -> grids (1,) and (2, 2): exercises the pipelined
    # query tiles and the multi-step online-softmax accumulation.
    out = bert_forward(src, params, num_heads, hidden_size,
                       block_q=64, block_kv=64)
    out = jax.block_until_ready(out)
    assert out.shape == (batch_size, max_seq_length, d_model)

    ref = bert_reference(src, params, num_heads, hidden_size)
    err = float(jnp.max(jnp.abs(out - ref)))
    assert err < 1e-1, f"kernel/reference mismatch: max abs err = {err}"
    print("KERNEL_OK")
</pallas_src>

<mosaic_0001>
module attributes {stable_mosaic.version = 11 : i64} {
  func.func @qkv_proj_kernel(%arg0: i32, %arg1: memref<128x128xf32, #tpu.memory_space<vmem>>, %arg2: memref<128x128xbf16, #tpu.memory_space<vmem>>, %arg3: memref<1x128xf32, #tpu.memory_space<vmem>>, %arg4: memref<128x128xbf16, #tpu.memory_space<vmem>>, %arg5: memref<1x128xf32, #tpu.memory_space<vmem>>, %arg6: memref<128x128xbf16, #tpu.memory_space<vmem>>, %arg7: memref<1x128xf32, #tpu.memory_space<vmem>>, %arg8: memref<4x128x32xbf16, #tpu.memory_space<vmem>>, %arg9: memref<4x128x32xbf16, #tpu.memory_space<vmem>>, %arg10: memref<4x128x32xbf16, #tpu.memory_space<vmem>>) attributes {dimension_semantics = [#tpu.dimension_semantics<parallel>], iteration_bounds = array<i64: 1>, scalar_prefetch = 0 : i64, scratch_operands = 0 : i64, tpu.core_type = #tpu.core_type<tc>, window_params = [{transform_indices = @transform_0, window_bounds = array<i64: 128, 128>}, {pipeline_mode = #tpu.pipeline_mode<synchronous>, transform_indices = @transform_1, window_bounds = array<i64: 128, 128>}, {pipeline_mode = #tpu.pipeline_mode<synchronous>, transform_indices = @transform_2, window_bounds = array<i64: 1, 128>}, {pipeline_mode = #tpu.pipeline_mode<synchronous>, transform_indices = @transform_3, window_bounds = array<i64: 128, 128>}, {pipeline_mode = #tpu.pipeline_mode<synchronous>, transform_indices = @transform_4, window_bounds = array<i64: 1, 128>}, {pipeline_mode = #tpu.pipeline_mode<synchronous>, transform_indices = @transform_5, window_bounds = array<i64: 128, 128>}, {pipeline_mode = #tpu.pipeline_mode<synchronous>, transform_indices = @transform_6, window_bounds = array<i64: 1, 128>}, {transform_indices = @transform_7, window_bounds = array<i64: 4, 128, 32>}, {transform_indices = @transform_8, window_bounds = array<i64: 4, 128, 32>}, {transform_indices = @transform_9, window_bounds = array<i64: 4, 128, 32>}]} {
    %c0 = arith.constant 0 : index
    %c0_0 = arith.constant 0 : index
    %0 = vector.load %arg1[%c0, %c0_0] : memref<128x128xf32, #tpu.memory_space<vmem>>, vector<128x128xf32>
    %1 = arith.truncf %0 : vector<128x128xf32> to vector<128x128xbf16>
    %c0_1 = arith.constant 0 : index
    %c0_2 = arith.constant 0 : index
    %2 = vector.load %arg2[%c0_1, %c0_2] : memref<128x128xbf16, #tpu.memory_space<vmem>>, vector<128x128xbf16>
    %cst = arith.constant dense<0.000000e+00> : vector<128x128xf32>
    %3 = tpu.matmul %1, %2, %cst {dimension_numbers = #tpu.dot_dimension_numbers<[1], [0], [0], [1], [0, 0, 1, 1], [], []>} : vector<128x128xbf16>, vector<128x128xbf16>, vector<128x128xf32> -> vector<128x128xf32>
    %c0_3 = arith.constant 0 : index
    %c0_4 = arith.constant 0 : index
    %4 = vector.load %arg3[%c0_3, %c0_4] : memref<1x128xf32, #tpu.memory_space<vmem>>, vector<1x128xf32>
    %5 = vector.broadcast %4 : vector<1x128xf32> to vector<128x128xf32>
    %6 = arith.addf %3, %5 : vector<128x128xf32>
    %cst_5 = arith.constant 3.125000e-02 : f32
    %7 = vector.broadcast %cst_5 : f32 to vector<128x128xf32>
    %8 = arith.mulf %6, %7 : vector<128x128xf32>
    %9 = vector.shape_cast %8 : vector<128x128xf32> to vector<128x4x32xf32>
    %10 = tpu.transpose %9, [1, 0, 2] : vector<128x4x32xf32> -> vector<4x128x32xf32>
    %11 = arith.truncf %10 : vector<4x128x32xf32> to vector<4x128x32xbf16>
    %c0_6 = arith.constant 0 : index
    %c0_7 = arith.constant 0 : index
    %c0_8 = arith.constant 0 : index
    %12 = vector.load %arg8[%c0_6, %c0_7, %c0_8] : memref<4x128x32xbf16, #tpu.memory_space<vmem>>, vector<4x128x32xbf16>
    tpu.vector_store %arg8[%c0_6, %c0_7, %c0_8], %11 {strides = array<i32>} : memref<4x128x32xbf16, #tpu.memory_space<vmem>>, vector<4x128x32xbf16>,
    %c0_9 = arith.constant 0 : index
    %c0_10 = arith.constant 0 : index
    %13 = vector.load %arg4[%c0_9, %c0_10] : memref<128x128xbf16, #tpu.memory_space<vmem>>, vector<128x128xbf16>
    %cst_11 = arith.constant dense<0.000000e+00> : vector<128x128xf32>
    %14 = tpu.matmul %1, %13, %cst_11 {dimension_numbers = #tpu.dot_dimension_numbers<[1], [0], [0], [1], [0, 0, 1, 1], [], []>} : vector<128x128xbf16>, vector<128x128xbf16>, vector<128x128xf32> -> vector<128x128xf32>
    %c0_12 = arith.constant 0 : index
    %c0_13 = arith.constant 0 : index
    %15 = vector.load %arg5[%c0_12, %c0_13] : memref<1x128xf32, #tpu.memory_space<vmem>>, vector<1x128xf32>
    %16 = vector.broadcast %15 : vector<1x128xf32> to vector<128x128xf32>
    %17 = arith.addf %14, %16 : vector<128x128xf32>
    %18 = vector.shape_cast %17 : vector<128x128xf32> to vector<128x4x32xf32>
    %19 = tpu.transpose %18, [1, 0, 2] : vector<128x4x32xf32> -> vector<4x128x32xf32>
    %20 = arith.truncf %19 : vector<4x128x32xf32> to vector<4x128x32xbf16>
    %c0_14 = arith.constant 0 : index
    %c0_15 = arith.constant 0 : index
    %c0_16 = arith.constant 0 : index
    %21 = vector.load %arg9[%c0_14, %c0_15, %c0_16] : memref<4x128x32xbf16, #tpu.memory_space<vmem>>, vector<4x128x32xbf16>
    tpu.vector_store %arg9[%c0_14, %c0_15, %c0_16], %20 {strides = array<i32>} : memref<4x128x32xbf16, #tpu.memory_space<vmem>>, vector<4x128x32xbf16>,
    %c0_17 = arith.constant 0 : index
    %c0_18 = arith.constant 0 : index
    %22 = vector.load %arg6[%c0_17, %c0_18] : memref<128x128xbf16, #tpu.memory_space<vmem>>, vector<128x128xbf16>
    %cst_19 = arith.constant dense<0.000000e+00> : vector<128x128xf32>
    %23 = tpu.matmul %1, %22, %cst_19 {dimension_numbers = #tpu.dot_dimension_numbers<[1], [0], [0], [1], [0, 0, 1, 1], [], []>} : vector<128x128xbf16>, vector<128x128xbf16>, vector<128x128xf32> -> vector<128x128xf32>
    %c0_20 = arith.constant 0 : index
    %c0_21 = arith.constant 0 : index
    %24 = vector.load %arg7[%c0_20, %c0_21] : memref<1x128xf32, #tpu.memory_space<vmem>>, vector<1x128xf32>
    %25 = vector.broadcast %24 : vector<1x128xf32> to vector<128x128xf32>
    %26 = arith.addf %23, %25 : vector<128x128xf32>
    %27 = vector.shape_cast %26 : vector<128x128xf32> to vector<128x4x32xf32>
    %28 = tpu.transpose %27, [1, 0, 2] : vector<128x4x32xf32> -> vector<4x128x32xf32>
    %29 = arith.truncf %28 : vector<4x128x32xf32> to vector<4x128x32xbf16>
    %c0_22 = arith.constant 0 : index
    %c0_23 = arith.constant 0 : index
    %c0_24 = arith.constant 0 : index
    %30 = vector.load %arg10[%c0_22, %c0_23, %c0_24] : memref<4x128x32xbf16, #tpu.memory_space<vmem>>, vector<4x128x32xbf16>
    tpu.vector_store %arg10[%c0_22, %c0_23, %c0_24], %29 {strides = array<i32>} : memref<4x128x32xbf16, #tpu.memory_space<vmem>>, vector<4x128x32xbf16>,
    return
  }
  func.func @transform_0(%arg0: i32) -> (i32, i32) {
    %c0_i32 = arith.constant 0 : i32
    %c0_i32_0 = arith.constant 0 : i32
    return %arg0, %c0_i32 : i32, i32
  }
  func.func @transform_1(%arg0: i32) -> (i32, i32) {
    %c0_i32 = arith.constant 0 : i32
    %c0_i32_0 = arith.constant 0 : i32
    %c0_i32_1 = arith.constant 0 : i32
    return %c0_i32, %c0_i32_0 : i32, i32
  }
  func.func @transform_2(%arg0: i32) -> (i32, i32) {
    %c0_i32 = arith.constant 0 : i32
    %c0_i32_0 = arith.constant 0 : i32
    %c0_i32_1 = arith.constant 0 : i32
    return %c0_i32, %c0_i32_0 : i32, i32
  }
  func.func @transform_3(%arg0: i32) -> (i32, i32) {
    %c0_i32 = arith.constant 0 : i32
    %c0_i32_0 = arith.constant 0 : i32
    %c0_i32_1 = arith.constant 0 : i32
    return %c0_i32, %c0_i32_0 : i32, i32
  }
  func.func @transform_4(%arg0: i32) -> (i32, i32) {
    %c0_i32 = arith.constant 0 : i32
    %c0_i32_0 = arith.constant 0 : i32
    %c0_i32_1 = arith.constant 0 : i32
    return %c0_i32, %c0_i32_0 : i32, i32
  }
  func.func @transform_5(%arg0: i32) -> (i32, i32) {
    %c0_i32 = arith.constant 0 : i32
    %c0_i32_0 = arith.constant 0 : i32
    %c0_i32_1 = arith.constant 0 : i32
    return %c0_i32, %c0_i32_0 : i32, i32
  }
  func.func @transform_6(%arg0: i32) -> (i32, i32) {
    %c0_i32 = arith.constant 0 : i32
    %c0_i32_0 = arith.constant 0 : i32
    %c0_i32_1 = arith.constant 0 : i32
    return %c0_i32, %c0_i32_0 : i32, i32
  }
  func.func @transform_7(%arg0: i32) -> (i32, i32, i32) {
    %c0_i32 = arith.constant 0 : i32
    %c0_i32_0 = arith.constant 0 : i32
    %c0_i32_1 = arith.constant 0 : i32
    return %c0_i32, %arg0, %c0_i32_0 : i32, i32, i32
  }
  func.func @transform_8(%arg0: i32) -> (i32, i32, i32) {
    %c0_i32 = arith.constant 0 : i32
    %c0_i32_0 = arith.constant 0 : i32
    %c0_i32_1 = arith.constant 0 : i32
    return %c0_i32, %arg0, %c0_i32_0 : i32, i32, i32
  }
  func.func @transform_9(%arg0: i32) -> (i32, i32, i32) {
    %c0_i32 = arith.constant 0 : i32
    %c0_i32_0 = arith.constant 0 : i32
    %c0_i32_1 = arith.constant 0 : i32
    return %c0_i32, %arg0, %c0_i32_0 : i32, i32, i32
  }
}

</mosaic_0001>

<bundles_post_ra>
// kernel: tpu_custom_call.1
= control target key start
LH: loop header
LB: loop body
LE: loop exit
PB: predicated region body
PF: predicated region fallthrough
CT: control target
= control target key end

     0   :  { %15 = vsyncpa [#allocation3], 0  ;;  %s11434_s0 = inlined_call_operand.hbm [shape: f32[128,128], index: 0, kind: input, shape index: {}]   ;;  %s11435_s1 = inlined_call_operand.hbm [shape: bf16[128,128], index: 1, kind: input, shape index: {}]   ;;  %s11436_s2 = inlined_call_operand.vmem [shape: f32[1,128], index: 2, kind: input, shape index: {}]   ;;  %s11437_s3 = inlined_call_operand.hbm [shape: bf16[128,128], index: 3, kind: input, shape index: {}]   ;;  %s11438_s4 = inlined_call_operand.vmem [shape: f32[1,128], index: 4, kind: input, shape index: {}]   ;;  %s11439_s5 = inlined_call_operand.hbm [shape: bf16[128,128], index: 5, kind: input, shape index: {}]   ;;  %s11440_s6 = inlined_call_operand.vmem [shape: f32[1,128], index: 6, kind: input, shape index: {}]   ;;  %s11441_s7 = inlined_call_operand.vmem [shape: bf16[4,128,32], index: 7, kind: output, shape index: {0}]   ;;  %s11442_s8 = inlined_call_operand.vmem [shape: bf16[4,128,32], index: 8, kind: output, shape index: {1}]   ;;  %s11443_s9 = inlined_call_operand.vmem [shape: bf16[4,128,32], index: 9, kind: output, shape index: {2}]  }
   0x1   :  { %16 = vsyncpa [#allocation5], 0  ;;  %s35_s11 = sshll.u32 %s11435_s1, 4  ;;  %s36_s11 = int_to_ptr.hbm [resolvable:$true] %s35_s11 }
   0x2   :  { %17 = vsyncpa [#allocation8], 0  ;;  %s7269_s12 = smov [#allocation4]   ;;  %s22_s16 = sshll.u32 %s11434_s0, 4  ;;  %s23_s16 = int_to_ptr.hbm [resolvable:$true] %s22_s16 }
   0x3   :  { %s37_s13 = sshll.u32 %s7269_s12, 4  ;;  %s7270_s17 = smov 64   ;;  %s38_s13 = int_to_ptr.vmem [resolvable:$true] %s37_s13 }
   0x4   :  { %s7271_s18 = smov 4   ;;  %s7272_s19 = smov [#allocation2]  }
   0x5   :  { %43 = dma.hbm_to_vmem [thread:$0]  %s36_s11, 1024, %s38_s13, [#allocation5], %s7270_s17, %s7270_s17, %s7271_s18  }
   0x6   :  { %s24_s20 = sshll.u32 %s7272_s19, 4  ;;  %s7273_s21 = smov 128   ;;  %s25_s20 = int_to_ptr.vmem [resolvable:$true] %s24_s20 }
   0x7   :  { %s7274_s1 = smov 8   ;;  %s50_s24 = sshll.u32 %s11437_s3, 4  ;;  %s51_s24 = int_to_ptr.hbm [resolvable:$true] %s50_s24 }
   0x8   :  { %30 = dma.hbm_to_vmem [thread:$0]  %s23_s16, 2048, %s25_s20, [#allocation3], %s7273_s21, %s7273_s21, %s7274_s1  }
   0x9   :  { %s7275_s25 = smov [#allocation6]   ;;  %s65_s28 = sshll.u32 %s11439_s5, 4  ;;  %s66_s28 = int_to_ptr.hbm [resolvable:$true] %s65_s28 }
   0xa   :  { %s52_s26 = sshll.u32 %s7275_s25, 4  ;;  %s7276_s29 = smov [#allocation7]   ;;  %s53_s26 = int_to_ptr.vmem [resolvable:$true] %s52_s26 }
   0xb   :  { %58 = dma.hbm_to_vmem [thread:$0]  %s51_s24, 1024, %s53_s26, [#allocation5], %s7270_s17, %s7270_s17, %s7271_s18  }
   0xc   :  { %s67_s30 = sshll.u32 %s7276_s29, 4  ;;  %s68_s30 = int_to_ptr.vmem [resolvable:$true] %s67_s30 }
   0xd   :  { %73 = dma.hbm_to_vmem [thread:$0]  %s66_s28, 1024, %s68_s30, [#allocation8], %s7270_s17, %s7270_s17, %s7271_s18  }
   0xe   :  { %7263 = dma.done.wait [#allocation3], 2048  }
   0xf   :  { %7264 = vsyncadd [#allocation3], 4294965248 }
  0x10   :  { %7265 = dma.done.wait [#allocation5], 2048  }
  0x11   :  { %7266 = vsyncadd [#allocation5], 4294965248 }
  0x12   :  { %7267 = dma.done.wait [#allocation8], 1024  }
  0x13   :  { %7268 = vsyncadd [#allocation8], 4294966272  ;;  %v6747_v0 = vld [vmem:[#allocation4 + $0x38] sm:$0xff]  ;;  %v6746_v3 = vld [vmem:[#allocation4 + $0x30] sm:$0xff]  ;;  %s7277_s12 = smov 32   ;;  %s7278_s13 = smov 96  }
  0x14   :  { %v6755_v1 = vld [vmem:[#allocation6 + $0x38] sm:$0xff]  ;;  %184 = vmatpush.bf16.msra.mxu0 %v6747_v0  ;;  %v6754_v4 = vld [vmem:[#allocation6 + $0x30] sm:$0xff]  ;;  %6764 = vmatpush.bf16.msra.mxu3 %v6747_v0  ;;  %v6745_v6 = vld [vmem:[#allocation4 + $0x28] sm:$0xff]  ;;  %vm410_vm0 = vcmask 1047556   ;;  %vm2234_vm1 = vcmask 257024  }
  0x15   :  { %v7349_v2 = vld [vmem:[#allocation7 + $0x38] sm:$0xff]  ;;  %2367 = vmatpush.bf16.msra.mxu1 %v6755_v1  ;;  %v7352_v5 = vld [vmem:[#allocation7 + $0x30] sm:$0xff]  ;;  %v6753_v7 = vld [vmem:[#allocation6 + $0x28] sm:$0xff] }
  0x16   :  { %4532 = vmatpush.bf16.msra.mxu2 %v7349_v2  ;;  %v7355_v8 = vld [vmem:[#allocation7 + $0x28] sm:$0xff]  ;;  %v6744_v9 = vld [vmem:[#allocation4 + $0x20] sm:$0xff]  ;;  %v6743_v12 = vld [vmem:[#allocation4 + $0x18] sm:$0xff] }
  0x17   :  { %v6752_v10 = vld [vmem:[#allocation6 + $0x20] sm:$0xff]  ;;  %v6751_v13 = vld [vmem:[#allocation6 + $0x18] sm:$0xff]  ;;  %v6742_v15 = vld [vmem:[#allocation4 + $0x10] sm:$0xff] }
  0x18   :  { %185 = vmatpush.bf16.msra.mxu0 %v6746_v3  ;;  %6765 = vmatpush.bf16.msra.mxu3 %v6746_v3  ;;  %v7358_v11 = vld [vmem:[#allocation7 + $0x20] sm:$0xff]  ;;  %v7361_v14 = vld [vmem:[#allocation7 + $0x18] sm:$0xff]  ;;  %v6750_v16 = vld [vmem:[#allocation6 + $0x10] sm:$0xff] }
  0x19   :  { %2368 = vmatpush.bf16.msra.mxu1 %v6754_v4  ;;  %v7364_v17 = vld [vmem:[#allocation7 + $0x10] sm:$0xff]  ;;  %v6741_v18 = vld [vmem:[#allocation4 + $0x8] sm:$0xff]  ;;  %v6740_v21 = vld [vmem:[#allocation4] sm:$0xff] }
  0x1a   :  { %4533 = vmatpush.bf16.msra.mxu2 %v7352_v5  ;;  %v6749_v19 = vld [vmem:[#allocation6 + $0x8] sm:$0xff]  ;;  %v6748_v22 = vld [vmem:[#allocation6] sm:$0xff]  ;;  %v94_v30 = vld [vmem:[#allocation2 + $0x10] sm:$0xff] }
  0x1b   :  { %v6757_v20 = vld [vmem:[#allocation7 + $0x8] sm:$0xff]  ;;  %v92_v23 = vld [vmem:[#allocation2] sm:$0xff]  ;;  %v95_v31 = vld [vmem:[#allocation2 + $0x18] sm:$0xff] }
  0x1c   :  { %186 = vmatpush.bf16.msra.mxu0 %v6745_v6  ;;  %6766 = vmatpush.bf16.msra.mxu3 %v6745_v6  ;;  %v93_v24 = vld [vmem:[#allocation2 + $0x8] sm:$0xff]  ;;  %v6756_v25 = vld [vmem:[#allocation7] sm:$0xff]  ;;  %v106_v32 = vld [vmem:[#allocation2 + $0x70] sm:$0xff]  ;;  %v109_v34 = vpack.c.bf16 %v95_v31, %v94_v30 }
  0x1d   :  { %2369 = vmatpush.bf16.msra.mxu1 %v6753_v7  ;;  %v104_v26 = vld [vmem:[#allocation2 + $0x60] sm:$0xff]  ;;  %v105_v27 = vld [vmem:[#allocation2 + $0x68] sm:$0xff]  ;;  %v108_v28 = vpack.c.bf16 %v93_v24, %v92_v23  ;;  %v107_v33 = vld [vmem:[#allocation2 + $0x78] sm:$0xff] }
  0x1e   :  { %4534 = vmatpush.bf16.msra.mxu2 %v7355_v8  ;;  %v114_v29 = vpack.c.bf16 %v105_v27, %v104_v26  ;;  %v115_v35 = vpack.c.bf16 %v107_v33, %v106_v32  ;;  %v96_v36 = vld [vmem:[#allocation2 + $0x20] sm:$0xff]  ;;  %v97_v37 = vld [vmem:[#allocation2 + $0x28] sm:$0xff]  ;;  %v98_v39 = vld [vmem:[#allocation2 + $0x30] sm:$0xff] }
  0x1f   :  { %v110_v38 = vpack.c.bf16 %v97_v37, %v96_v36  ;;  %v99_v40 = vld [vmem:[#allocation2 + $0x38] sm:$0xff]  ;;  %v100_v42 = vld [vmem:[#allocation2 + $0x40] sm:$0xff]  ;;  %v101_v43 = vld [vmem:[#allocation2 + $0x48] sm:$0xff] }
  0x20   :  { %187 = vmatpush.bf16.msra.mxu0 %v6744_v9  ;;  %6767 = vmatpush.bf16.msra.mxu3 %v6744_v9  ;;  %v111_v41 = vpack.c.bf16 %v99_v40, %v98_v39  ;;  %v112_v44 = vpack.c.bf16 %v101_v43, %v100_v42  ;;  %v102_v45 = vld [vmem:[#allocation2 + $0x50] sm:$0xff]  ;;  %v103_v46 = vld [vmem:[#allocation2 + $0x58] sm:$0xff]  ;;  %v7376_v50 = vld [vmem:[%s11438_s4] ss:$0 sm:$0xff] }
  0x21   :  { %2370 = vmatpush.bf16.msra.mxu1 %v6752_v10  ;;  %v113_v47 = vpack.c.bf16 %v103_v46, %v102_v45  ;;  %v7381_v53 = vld [vmem:[%s11436_s2] ss:$0 sm:$0xff] }
  0x22   :  { %4535 = vmatpush.bf16.msra.mxu2 %v7358_v11  ;;  %v7403_v63 = vld [vmem:[%s11440_s6] ss:$0 sm:$0xff] }
  0x24   :  { %188 = vmatpush.bf16.msra.mxu0 %v6743_v12  ;;  %6768 = vmatpush.bf16.msra.mxu3 %v6743_v12 }
  0x25   :  { %2371 = vmatpush.bf16.msra.mxu1 %v6751_v13 }
  0x26   :  { %4536 = vmatpush.bf16.msra.mxu2 %v7361_v14 }
  0x28   :  { %189 = vmatpush.bf16.msra.mxu0 %v6742_v15  ;;  %6769 = vmatpush.bf16.msra.mxu3 %v6742_v15 }
  0x29   :  { %2372 = vmatpush.bf16.msra.mxu1 %v6750_v16 }
  0x2a   :  { %4537 = vmatpush.bf16.msra.mxu2 %v7364_v17 }
  0x2c   :  { %190 = vmatpush.bf16.msra.mxu0 %v6741_v18  ;;  %6770 = vmatpush.bf16.msra.mxu3 %v6741_v18 }
  0x2d   :  { %2373 = vmatpush.bf16.msra.mxu1 %v6749_v19 }
  0x2e   :  { %4538 = vmatpush.bf16.msra.mxu2 %v6757_v20 }
  0x30   :  { %191 = vmatpush.bf16.msra.mxu0 %v6740_v21  ;;  %6771 = vmatpush.bf16.msra.mxu3 %v6740_v21 }
  0x31   :  { %2374 = vmatpush.bf16.msra.mxu1 %v6748_v22 }
  0x32   :  { %4539 = vmatpush.bf16.msra.mxu2 %v6756_v25 }
  0x33   :  { %192 = vmatmul.bf16.vlgmr.msra.gmra.mxu0 %v108_v28  ;;  %222 = vmatmul.bf16.vlgmr.msra.gmra.mxu3 %v114_v29 }
  0x34   :  { %6772 = vmatpush.bf16.msrb.mxu3 %v6755_v1  ;;  %2375 = vmatmul.bf16.vlgmr.msra.gmra.mxu1 %v108_v28 }
  0x35   :  { %4540 = vmatmul.bf16.vlgmr.msra.gmra.mxu2 %v108_v28 }
  0x38   :  { %6773 = vmatpush.bf16.msrb.mxu3 %v6754_v4 }
  0x3c   :  { %6774 = vmatpush.bf16.msrb.mxu3 %v6753_v7 }
  0x40   :  { %6775 = vmatpush.bf16.msrb.mxu3 %v6752_v10 }
  0x43   :  { %197 = vmatmul.bf16.gmra.mxu0 %v109_v34  ;;  %227 = vmatmul.bf16.gmra.mxu3 %v115_v35 }
  0x44   :  { %6776 = vmatpush.bf16.msrb.mxu3 %v6751_v13  ;;  %2380 = vmatmul.bf16.gmra.mxu1 %v109_v34 }
  0x45   :  { %4545 = vmatmul.bf16.gmra.mxu2 %v109_v34 }
  0x48   :  { %6777 = vmatpush.bf16.msrb.mxu3 %v6750_v16 }
  0x4c   :  { %6778 = vmatpush.bf16.msrb.mxu3 %v6749_v19 }
  0x50   :  { %6779 = vmatpush.bf16.msrb.mxu3 %v6748_v22 }
  0x53   :  { %202 = vmatmul.bf16.gmra.mxu0 %v110_v38  ;;  %2405 = vmatmul.bf16.vlgmr.msrb.gmra.mxu3 %v114_v29 }
  0x54   :  { %6780 = vmatpush.bf16.msra.mxu3 %v7349_v2  ;;  %2385 = vmatmul.bf16.gmra.mxu1 %v110_v38 }
  0x55   :  { %4550 = vmatmul.bf16.gmra.mxu2 %v110_v38 }
  0x58   :  { %6781 = vmatpush.bf16.msra.mxu3 %v7352_v5 }
  0x5c   :  { %6782 = vmatpush.bf16.msra.mxu3 %v7355_v8 }
  0x60   :  { %6783 = vmatpush.bf16.msra.mxu3 %v7358_v11 }
  0x63   :  { %207 = vmatmul.bf16.gmra.mxu0 %v111_v41  ;;  %2410 = vmatmul.bf16.gmra.mxu3 %v115_v35 }
  0x64   :  { %6784 = vmatpush.bf16.msra.mxu3 %v7361_v14  ;;  %2390 = vmatmul.bf16.gmra.mxu1 %v111_v41 }
  0x65   :  { %4555 = vmatmul.bf16.gmra.mxu2 %v111_v41 }
  0x68   :  { %6785 = vmatpush.bf16.msra.mxu3 %v7364_v17 }
  0x6c   :  { %6786 = vmatpush.bf16.msra.mxu3 %v6757_v20 }
  0x70   :  { %6787 = vmatpush.bf16.msra.mxu3 %v6756_v25 }
  0x73   :  { %212 = vmatmul.bf16.gmra.mxu0 %v112_v44  ;;  %4570 = vmatmul.bf16.vlgmr.msra.gmra.mxu3 %v114_v29 }
  0x74   :  { %2395 = vmatmul.bf16.gmra.mxu1 %v112_v44 }
  0x75   :  { %4560 = vmatmul.bf16.gmra.mxu2 %v112_v44 }
  0x83   :  { %4575 = vmatmul.bf16.gmra.mxu3 %v115_v35  ;;  %217 = vmatmul.bf16.gmra.mxu0 %v113_v47 }
  0x84   :  { %2400 = vmatmul.bf16.gmra.mxu1 %v113_v47 }
  0x85   :  { %4565 = vmatmul.bf16.gmra.mxu2 %v113_v47 }
  0xb0   :  { %v193_v48 = vpop.f32.mrf.mxu0 }
  0xb1   :  { %v2376_v49 = vpop.f32.mrf.mxu1  ;;  %v194_v59 = vadd.f32 %v7381_v53, %v193_v48 }
  0xb2   :  { %v7384_v54 = vadd.f32 %v7376_v50, %v2376_v49 }
  0xb3   :  { %v7398_v62 = vmul.f32 0.03125, %v194_v59 }
  0xb6   :  { %v223_v60 = vpop.f32.mrf.mxu3 }
  0xb7   :  { %v224_v6 = vadd.f32 %v7381_v53, %v223_v60 }
  0xb8   :  { %v195_v51 = vpop.f32.mrf.mxu0  ;;  %v4541_v56 = vpop.f32.mrf.mxu2 }
  0xb9   :  { %v2378_v52 = vpop.f32.mrf.mxu1  ;;  %v196_v57 = vadd.f32 %v7381_v53, %v195_v51  ;;  %v7411_v2 = vadd.f32 %v7403_v63, %v4541_v56  ;;  %v7423_v10 = vmul.f32 0.03125, %v224_v6 }
  0xba   :  { %v7387_v55 = vadd.f32 %v7376_v50, %v2378_v52 }
  0xbb   :  { %v7396_v61 = vmul.f32 0.03125, %v196_v57 }
  0xbc   :  { %v6810_v58 = vpack.i.bf16 %v7387_v55, %v7384_v54 }
  0xbd   :  { %v6825_v0 = vpack.i.bf16 %v7396_v61, %v7398_v62 }
  0xbe   :  { %6811 = vrot.lane.b32.xlu1 %v6810_v58, %s7277_s12  ;;  %6806 = vrot.lane.b32.xlu2 %v6810_v58, %s7270_s17  ;;  %v225_v4 = vpop.f32.mrf.mxu3 }
  0xbf   :  { %6801 = vrot.lane.b32.xlu0 %v6810_v58, %s7278_s13  ;;  %v226_v7 = vadd.f32 %v7381_v53, %v225_v4 }
  0xc0   :  { %v4543_v1 = vpop.f32.mrf.mxu2  ;;  %v198_v9 = vpop.f32.mrf.mxu0 }
  0xc1   :  { %v7414_v3 = vadd.f32 %v7403_v63, %v4543_v1  ;;  %v2381_v5 = vpop.f32.mrf.mxu1  ;;  %v7425_v11 = vmul.f32 0.03125, %v226_v7  ;;  %v199_v19 = vadd.f32 %v7381_v53, %v198_v9 }
  0xc2   :  { %v7433_v16 = vadd.f32 %v7376_v50, %v2381_v5 }
  0xc3   :  { %v6840_v8 = vpack.i.bf16 %v7414_v3, %v7411_v2  ;;  %v6855_v13 = vpack.i.bf16 %v7425_v11, %v7423_v10  ;;  %v7445_v23 = vmul.f32 0.03125, %v199_v19 }
  0xc6   :  { %6826 = vrot.lane.b32.xlu1 %v6825_v0, %s7277_s12  ;;  %6821 = vrot.lane.b32.xlu2 %v6825_v0, %s7270_s17  ;;  %v228_v15 = vpop.f32.mrf.mxu3 }
  0xc7   :  { %6816 = vrot.lane.b32.xlu0 %v6825_v0, %s7278_s13  ;;  %v229_v29 = vadd.f32 %v7381_v53, %v228_v15 }
  0xc8   :  { %v4546_v12 = vpop.f32.mrf.mxu2  ;;  %v200_v18 = vpop.f32.mrf.mxu0 }
  0xc9   :  { %v2383_v14 = vpop.f32.mrf.mxu1  ;;  %v201_v20 = vadd.f32 %v7381_v53, %v200_v18  ;;  %v7448_v24 = vadd.f32 %v7403_v63, %v4546_v12  ;;  %v7464_v34 = vmul.f32 0.03125, %v229_v29 }
  0xca   :  { %v7436_v17 = vadd.f32 %v7376_v50, %v2383_v14 }
  0xcb   :  { %v7450_v25 = vmul.f32 0.03125, %v201_v20 }
  0xcc   :  { %v6860_v21 = vpack.i.bf16 %v7436_v17, %v7433_v16 }
  0xcd   :  { %v6885_v32 = vpack.i.bf16 %v7450_v25, %v7445_v23 }
  0xce   :  { %6841 = vrot.lane.b32.xlu1 %v6840_v8, %s7277_s12  ;;  %6836 = vrot.lane.b32.xlu2 %v6840_v8, %s7270_s17  ;;  %v230_v27 = vpop.f32.mrf.mxu3 }
  0xcf   :  { %6831 = vrot.lane.b32.xlu0 %v6840_v8, %s7278_s13  ;;  %v231_v30 = vadd.f32 %v7381_v53, %v230_v27 }
  0xd0   :  { %v4548_v22 = vpop.f32.mrf.mxu2  ;;  %v203_v33 = vpop.f32.mrf.mxu0 }
  0xd1   :  { %v7453_v26 = vadd.f32 %v7403_v63, %v4548_v22  ;;  %v2386_v28 = vpop.f32.mrf.mxu1  ;;  %v7466_v35 = vmul.f32 0.03125, %v231_v30  ;;  %v204_v42 = vadd.f32 %v7381_v53, %v203_v33  ;;  %v2578_v33 = vrot.slane %v7384_v54, 4 }
  0xd2   :  { %v7474_v38 = vadd.f32 %v7376_v50, %v2386_v28 }
  0xd3   :  { %v6890_v31 = vpack.i.bf16 %v7453_v26, %v7448_v24  ;;  %v6905_v36 = vpack.i.bf16 %v7466_v35, %v7464_v34  ;;  %v7486_v45 = vmul.f32 0.03125, %v204_v42  ;;  %v2634_v42 = vrot.slane %v7387_v55, 4 }
  0xd6   :  { %6856 = vrot.lane.b32.xlu1 %v6855_v13, %s7277_s12  ;;  %6851 = vrot.lane.b32.xlu2 %v6855_v13, %s7270_s17  ;;  %v2406_v41 = vpop.f32.mrf.mxu3 }
  0xd7   :  { %6846 = vrot.lane.b32.xlu0 %v6855_v13, %s7278_s13  ;;  %v7493_v51 = vadd.f32 %v7376_v50, %v2406_v41 }
  0xd8   :  { %v205_v40 = vpop.f32.mrf.mxu0  ;;  %v4551_v47 = vpop.f32.mrf.mxu2 }
  0xd9   :  { %v2388_v37 = vpop.f32.mrf.mxu1  ;;  %v206_v43 = vadd.f32 %v7381_v53, %v205_v40  ;;  %v7504_v60 = vadd.f32 %v7403_v63, %v4551_v47  ;;  %v4743_v40 = vrot.slane %v7411_v2, 4 }
  0xda   :  { %v7477_v39 = vadd.f32 %v7376_v50, %v2388_v37 }
  0xdb   :  { %v7488_v46 = vmul.f32 0.03125, %v206_v43  ;;  %11485 = vst [vmem:[#allocation12_spill] sm:$0xff] %v7504_v60 }
  0xdc   :  { %v6925_v44 = vpack.i.bf16 %v7477_v39, %v7474_v38 }
  0xdd   :  { %v6935_v49 = vpack.i.bf16 %v7488_v46, %v7486_v45 }
  0xde   :  { %6861 = vrot.lane.b32.xlu1 %v6860_v21, %s7278_s13  ;;  %6871 = vrot.lane.b32.xlu2 %v6860_v21, %s7277_s12  ;;  %v2408_v48 = vpop.f32.mrf.mxu3 }
  0xdf   :  { %6866 = vrot.lane.b32.xlu0 %v6860_v21, %s7270_s17  ;;  %v7498_v52 = vadd.f32 %v7376_v50, %v2408_v48 }
  0xe0   :  { %v4553_v58 = vpop.f32.mrf.mxu2  ;;  %v208_v59 = vpop.f32.mrf.mxu0 }
  0xe1   :  { %v2391_v56 = vpop.f32.mrf.mxu1  ;;  %v6955_v57 = vpack.i.bf16 %v7498_v52, %v7493_v51  ;;  %v7509_v0 = vadd.f32 %v7403_v63, %v4553_v58  ;;  %v209_v9 = vadd.f32 %v7381_v53, %v208_v59  ;;  %v468_v58 = vrot.slane %v7396_v61, 4 }
  0xe2   :  { %v7515_v5 = vadd.f32 %v7376_v50, %v2391_v56  ;;  %v4799_v59 = vrot.slane %v7414_v3, 4 }
  0xe3   :  { %v6965_v1 = vpack.i.bf16 %v7509_v0, %v7504_v60  ;;  %v7527_v14 = vmul.f32 0.03125, %v209_v9 }
  0xe6   :  { %6891 = vrot.lane.b32.xlu1 %v6890_v31, %s7278_s13  ;;  %6886 = vrot.lane.b32.xlu2 %v6885_v32, %s7277_s12  ;;  %v2411_v8 = vpop.f32.mrf.mxu3 }
  0xe7   :  { %6876 = vrot.lane.b32.xlu0 %v6885_v32, %s7278_s13  ;;  %v7539_v22 = vadd.f32 %v7376_v50, %v2411_v8 }
  0xe8   :  { %v210_v7 = vpop.f32.mrf.mxu0  ;;  %v4556_v19 = vpop.f32.mrf.mxu2 }
  0xe9   :  { %v2393_v4 = vpop.f32.mrf.mxu1  ;;  %v211_v13 = vadd.f32 %v7381_v53, %v210_v7  ;;  %11486 = vst [vmem:[#allocation13_spill] sm:$0xff] %v7539_v22 }
  0xea   :  { %v7520_v6 = vadd.f32 %v7376_v50, %v2393_v4  ;;  %v7563_v4 = vadd.f32 %v7403_v63, %v4556_v19 }
  0xeb   :  { %v7531_v15 = vmul.f32 0.03125, %v211_v13 }
  0xec   :  { %v6985_v12 = vpack.i.bf16 %v7520_v6, %v7515_v5  ;;  %11488 = vst [vmem:[#allocation15_spill] sm:$0xff] %v7563_v4 }
  0xed   :  { %v7536_v20 = vpack.i.bf16 %v7531_v15, %v7527_v14 }
  0xee   :  { %6906 = vrot.lane.b32.xlu1 %v6905_v36, %s7278_s13  ;;  %6901 = vrot.lane.b32.xlu2 %v6890_v31, %s7277_s12  ;;  %v2413_v21 = vpop.f32.mrf.mxu3 }
  0xef   :  { %6881 = vrot.lane.b32.xlu0 %v6885_v32, %s7270_s17  ;;  %v7545_v27 = vadd.f32 %v7376_v50, %v2413_v21 }
  0xf0   :  { %v213_v13 = vpop.f32.mrf.mxu0 }
  0xf1   :  { %11487 = vst [vmem:[#allocation14_spill] sm:$0xff] %v7545_v27  ;;  %v7552_v37 = vpack.i.bf16 %v7545_v27, %v7539_v22  ;;  %v2396_v41 = vpop.f32.mrf.mxu1 }
  0xf6   :  { %6926 = vrot.lane.b32.xlu1 %v6925_v44, %s7270_s17  ;;  %6916 = vrot.lane.b32.xlu2 %v6905_v36, %s7277_s12 }
  0xf7   :  { %6896 = vrot.lane.b32.xlu0 %v6890_v31, %s7270_s17  ;;  %v7279_v31 = vmov 1983009808  }
  0xf8   :  { %v415_v32 = vunpack.c.l.s4 %v7279_v31  ;;  %v214_v31 = vadd.f32 %v7381_v53, %v213_v13 }
  0xfe   :  { %6936 = vrot.lane.b32.xlu1 %v6935_v49, %s7278_s13  ;;  %6921 = vrot.lane.b32.xlu2 %v6925_v44, %s7278_s13 }
  0xff   :  { %6911 = vrot.lane.b32.xlu0 %v6905_v36, %s7270_s17  ;;  %v412_v36 = vrot.slane %v7398_v62, 4 }
 0x106   :  { %6941 = vrot.lane.b32.xlu1 %v6935_v49, %s7270_s17  ;;  %6956 = vrot.lane.b32.xlu2 %v6955_v57, %s7270_s17 }
 0x107   :  { %6931 = vrot.lane.b32.xlu0 %v6925_v44, %s7277_s12  ;;  %v4558_v44 = vpop.f32.mrf.mxu2 }
 0x108   :  { %v7570_v7 = vadd.f32 %v7403_v63, %v4558_v44 }
 0x10a   :  { %11489 = vst [vmem:[#allocation16_spill] sm:$0xff] %v7570_v7 }
 0x10e   :  { %6961 = vrot.lane.b32.xlu1 %v6955_v57, %s7277_s12  ;;  %6966 = vrot.lane.b32.xlu2 %v6965_v1, %s7278_s13 }
 0x10f   :  { %6946 = vrot.lane.b32.xlu0 %v6935_v49, %s7277_s12 }
 0x116   :  { %6971 = vrot.lane.b32.xlu1 %v6965_v1, %s7270_s17  ;;  %6986 = vrot.lane.b32.xlu2 %v6985_v12, %s7270_s17 }
 0x117   :  { %6951 = vrot.lane.b32.xlu0 %v6955_v57, %s7278_s13  ;;  %v7557_v57 = vunpack.c.0.s8 %v415_v32  ;;  %v7280_v32 = vmov 1934713408  }
 0x118   :  { %v6807_v18 = vpop.permute.xlu2 %6806 }
 0x119   :  { %v6809_v28 = vunpack.i.h.bf16 %v6807_v18  ;;  %v6808_v29 = vunpack.i.l.bf16 %v6807_v18 }
 0x11b   :  { %v2632_v48 = vrot.slane %v6809_v28, 4  ;;  %v2576_v49 = vrot.slane %v6808_v29, 4  ;;  %v2579_v8 = vsel %vm410_vm0, %v6808_v29, %v2578_v33  ;;  %v439_v33 = vunpack.c.l.s4 %v7280_v32 }
 0x11d   :  { %v2633_v19 = vsel %vm410_vm0, %v2632_v48, %v7387_v55  ;;  %v2577_v21 = vsel %vm410_vm0, %v2576_v49, %v7384_v54  ;;  %v7590_v54 = vpack.i.bf16 %v7570_v7, %v7563_v4 }
 0x11e   :  { %6991 = vrot.lane.b32.xlu1 %v6985_v12, %s7277_s12  ;;  %7001 = vrot.lane.b32.xlu2 %v7536_v20, %s7270_s17  ;;  %v7593_v44 = vperm.slane %v2633_v19, %v7557_v57  ;;  %v7596_v48 = vperm.slane %v2577_v21, %v7557_v57  ;;  %v7612_v19 = vmul.f32 0.03125, %v214_v31  ;;  %v7614_v21 = vunpack.c.0.s8 %v439_v33 }
 0x11f   :  { %6976 = vrot.lane.b32.xlu0 %v6965_v1, %s7277_s12  ;;  %v2635_v1 = vsel %vm410_vm0, %v6809_v28, %v2634_v42  ;;  %v7586_v42 = vperm.slane %v2579_v8, %v7557_v57  ;;  %v2398_v8 = vpop.f32.mrf.mxu1 }
 0x120   :  { %v6822_v30 = vpop.permute.xlu2 %6821  ;;  %v7581_v63 = vperm.slane %v2635_v1, %v7557_v57  ;;  %11491 = vst [vmem:[#allocation18_spill] sm:$0xff] %v7612_v19  ;;  %v7633_v31 = vadd.f32 %v7376_v50, %v2398_v8 }
 0x121   :  { %v6824_v43 = vunpack.i.h.bf16 %v6822_v30  ;;  %v6823_v56 = vunpack.i.l.bf16 %v6822_v30 }
 0x122   :  { %v2670_v13 = vrot.slane %v7581_v63, 4  ;;  %11492 = vst [vmem:[#allocation19_spill] sm:$0xff] %v7633_v31 }
 0x123   :  { %v466_v9 = vrot.slane %v6824_v43, 4  ;;  %v409_v28 = vrot.slane %v6823_v56, 4  ;;  %v469_v29 = vsel %vm410_vm0, %v6824_v43, %v468_v58 }
 0x124   :  { %v7604_v49 = vperm.slane %v469_v29, %v7557_v57 }
 0x125   :  { %v467_v43 = vsel %vm410_vm0, %v466_v9, %v7396_v61 }
 0x126   :  { %6996 = vrot.lane.b32.xlu1 %v7536_v20, %s7278_s13  ;;  %7021 = vrot.lane.b32.xlu2 %v7552_v37, %s7277_s12 }
 0x127   :  { %6981 = vrot.lane.b32.xlu0 %v6985_v12, %s7278_s13  ;;  %v413_v12 = vsel %vm410_vm0, %v6823_v56, %v412_v36  ;;  %v7601_v36 = vadd.f32 %v7376_v50, %v2396_v41  ;;  %v411_v56 = vsel %vm410_vm0, %v409_v28, %v7398_v62  ;;  %v7618_v41 = vperm.slane %v467_v43, %v7557_v57 }
 0x128   :  { %v6837_v30 = vpop.permute.xlu2 %6836  ;;  %v7609_v58 = vperm.slane %v413_v12, %v7557_v57  ;;  %v2658_v62 = vrot.slane %v7593_v44, 4  ;;  %v2602_v28 = vrot.slane %v7596_v48, 4 }
 0x129   :  { %v6839_v55 = vunpack.i.h.bf16 %v6837_v30  ;;  %11490 = vst [vmem:[#allocation17_spill] sm:$0xff] %v7601_v36  ;;  %v6838_v1 = vunpack.i.l.bf16 %v6837_v30  ;;  %v7628_v30 = vperm.slane %v411_v56, %v7557_v57 }
 0x12b   :  { %v4797_v9 = vrot.slane %v6839_v55, 4  ;;  %v4800_v29 = vsel %vm410_vm0, %v6839_v55, %v4799_v59  ;;  %v4741_v12 = vrot.slane %v6838_v1, 4  ;;  %v4744_v55 = vsel %vm410_vm0, %v6838_v1, %v4743_v40 }
 0x12c   :  { %v7638_v33 = vperm.slane %v4800_v29, %v7557_v57  ;;  %v7649_v29 = vpack.i.bf16 %v7633_v31, %v7601_v36  ;;  %v7654_v1 = vperm.slane %v4744_v55, %v7557_v57 }
 0x12d   :  { %v4798_v50 = vsel %vm410_vm0, %v4797_v9, %v7414_v3  ;;  %v4742_v40 = vsel %vm410_vm0, %v4741_v12, %v7411_v2 }
 0x12e   :  { %7006 = vrot.lane.b32.xlu1 %v7536_v20, %s7277_s12  ;;  %7031 = vrot.lane.b32.xlu2 %v7590_v54, %s7270_s17  ;;  %v7659_v3 = vperm.slane %v4798_v50, %v7557_v57  ;;  %v7671_v50 = vperm.slane %v4742_v40, %v7557_v57 }
 0x12f   :  { %7016 = vrot.lane.b32.xlu0 %v7552_v37, %s7270_s17 }
 0x130   :  { %v6812_v32 = vpop.permute.xlu1 %6811  ;;  %v7656_v22 = vpop.permute.xlu2 %6851 }
 0x131   :  { %v6814_v43 = vunpack.i.h.bf16 %v6812_v32  ;;  %v6813_v56 = vunpack.i.l.bf16 %v6812_v32  ;;  %v6802_v47 = vpop.permute.xlu0 %6801 }
 0x132   :  { %v6804_v8 = vunpack.i.h.bf16 %v6802_v47  ;;  %v6803_v59 = vunpack.i.l.bf16 %v6802_v47 }
 0x133   :  { %v2644_v61 = vrot.slane %v6814_v43, 4  ;;  %v2588_v27 = vrot.slane %v6813_v56, 4 }
 0x134   :  { %v2646_v32 = vrot.slane %v6804_v8, 4  ;;  %v2590_v18 = vrot.slane %v6803_v59, 4 }
 0x135   :  { %v2645_v9 = vsel %vm410_vm0, %v2644_v61, %v6804_v8  ;;  %v2589_v20 = vsel %vm410_vm0, %v2588_v27, %v6803_v59 }
 0x136   :  { %v2647_v31 = vsel %vm410_vm0, %v6814_v43, %v2646_v32  ;;  %v2651_v2 = vperm.slane %v2645_v9, %v7557_v57  ;;  %v2591_v12 = vsel %vm410_vm0, %v6813_v56, %v2590_v18  ;;  %v2595_v55 = vperm.slane %v2589_v20, %v7557_v57  ;;  %7011 = vrot.lane.b32.xlu1 %v7552_v37, %s7278_s13 }
 0x137   :  { %v2655_v47 = vperm.slane %v2647_v31, %v7557_v57  ;;  %v2599_v61 = vperm.slane %v2591_v12, %v7557_v57  ;;  %7051 = vrot.lane.b32.xlu2 %v7649_v29, %s7277_s12  ;;  %7026 = vrot.lane.b32.xlu0 %v7590_v54, %s7278_s13 }
 0x138   :  { %v2656_v18 = vrot.slane %v2651_v2, 4  ;;  %v2659_v59 = vsel %vm410_vm0, %v2651_v2, %v2658_v62  ;;  %v2600_v20 = vrot.slane %v2595_v55, 4  ;;  %v2603_v37 = vsel %vm410_vm0, %v2595_v55, %v2602_v28 }
 0x139   :  { %v2667_v43 = vperm.slane %v2659_v59, %v7614_v21  ;;  %v2668_v56 = vrot.slane %v2655_v47, 4  ;;  %v2671_v31 = vsel %vm410_vm0, %v2655_v47, %v2670_v13  ;;  %v2611_v8 = vperm.slane %v2603_v37, %v7614_v21 }
 0x13a   :  { %v2657_v40 = vsel %vm410_vm0, %v2656_v18, %v7593_v44  ;;  %v2679_v32 = vperm.slane %v2671_v31, %v7614_v21  ;;  %v2601_v9 = vsel %vm410_vm0, %v2600_v20, %v7596_v48  ;;  %v2612_v12 = vrot.slane %v2599_v61, 4 }
 0x13b   :  { %v2663_v62 = vperm.slane %v2657_v40, %v7614_v21  ;;  %v2669_v28 = vsel %vm410_vm0, %v2668_v56, %v7581_v63  ;;  %v2682_v2 = vrot.slane %v2667_v43, 4  ;;  %v2607_v55 = vperm.slane %v2601_v9, %v7614_v21 }
 0x13c   :  { %v2675_v13 = vperm.slane %v2669_v28, %v7614_v21  ;;  %v2686_v47 = vrot.slane %v2679_v32, 4  ;;  %v2613_v44 = vsel %vm410_vm0, %v2612_v12, %v7586_v42  ;;  %v11493_v18 = vrot.slane %v7586_v42, 4 }
 0x13d   :  { %v2680_v48 = vrot.slane %v2663_v62, 4  ;;  %v2683_v20 = vsel %vm410_vm0, 0.0, %v2682_v2  ;;  %v3526_v37 = vsel %vm410_vm0, %v2682_v2, %v2663_v62  ;;  %v2619_v63 = vperm.slane %v2613_v44, %v7614_v21 }
 0x13e   :  { %v2615_v59 = vsel %vm410_vm0, %v2599_v61, %v11493_v18  ;;  %v2684_v43 = vrot.slane %v2675_v13, 4  ;;  %v2687_v56 = vsel %vm410_vm0, 0.0, %v2686_v47  ;;  %v3530_v31 = vperm.slane %v3526_v37, %v7557_v57  ;;  %7036 = vrot.lane.b32.xlu1 %v7590_v54, %s7277_s12 }
 0x13f   :  { %v3531_v40 = vrot.slane %v2683_v20, 4  ;;  %v2681_v32 = vsel %vm410_vm0, 0.0, %v2680_v48  ;;  %v3537_v9 = vsel %vm410_vm0, %v2686_v47, %v2675_v13  ;;  %v3542_v42 = vrot.slane %v2687_v56, 4  ;;  %7046 = vrot.lane.b32.xlu0 %v7649_v29, %s7270_s17 }
 0x140   :  { %v2623_v61 = vperm.slane %v2615_v59, %v7614_v21  ;;  %v2685_v12 = vsel %vm410_vm0, 0.0, %v2684_v43  ;;  %v3541_v28 = vperm.slane %v3537_v9, %v7557_v57  ;;  %v3550_v2 = vrot.slane %v3530_v31, 4 }
 0x141   :  { %v3532_v62 = vsel %vm410_vm0, %v3531_v40, %v2681_v32  ;;  %v3543_v18 = vsel %vm410_vm0, %v3542_v42, %v2685_v12  ;;  %v2624_v20 = vrot.slane %v2607_v55, 4  ;;  %v2626_v37 = vrot.slane %v2611_v8, 4 }
 0x142   :  { %v3536_v44 = vperm.slane %v3532_v62, %v7557_v57  ;;  %v3547_v48 = vperm.slane %v3543_v18, %v7557_v57  ;;  %v3562_v13 = vrot.slane %v3541_v28, 4  ;;  %v2628_v47 = vrot.slane %v2619_v63, 4 }
 0x143   :  { %v2630_v56 = vrot.slane %v2623_v61, 4  ;;  %v2625_v43 = vsel %vm410_vm0, 0.0, %v2624_v20  ;;  %v2627_v40 = vsel %vm410_vm0, 0.0, %v2626_v37  ;;  %v3472_v18 = vsel %vm410_vm0, %v2626_v37, %v2607_v55 }
 0x144   :  { %v3548_v59 = vrot.slane %v3536_v44, 4  ;;  %v3551_v27 = vsel %vm410_vm0, %v3536_v44, %v3550_v2  ;;  %v3560_v9 = vrot.slane %v3547_v48, 4  ;;  %v3563_v62 = vsel %vm410_vm0, %v3547_v48, %v3562_v13 }
 0x145   :  { %v3559_v32 = vperm.slane %v3551_v27, %v7614_v21  ;;  %v2629_v42 = vsel %vm410_vm0, 0.0, %v2628_v47  ;;  %v3571_v12 = vperm.slane %v3563_v62, %v7614_v21  ;;  %v2631_v61 = vsel %vm410_vm0, 0.0, %v2630_v56 }
 0x146   :  { %v3549_v8 = vsel %vm410_vm0, %v3548_v59, %v3530_v31  ;;  %v3561_v44 = vsel %vm410_vm0, %v3560_v9, %v3541_v28  ;;  %v3476_v27 = vperm.slane %v3472_v18, %v7557_v57  ;;  %v3477_v13 = vrot.slane %v2627_v40, 4  ;;  %7041 = vrot.lane.b32.xlu1 %v7649_v29, %s7278_s13 }
 0x147   :  { %v3555_v2 = vperm.slane %v3549_v8, %v7614_v21  ;;  %v3578_v20 = vrot.slane %v3559_v32, 4  ;;  %v3567_v36 = vperm.slane %v3561_v44, %v7614_v21  ;;  %v3576_v48 = vrot.slane %v3571_v12, 4 }
 0x148   :  { %v3483_v47 = vsel %vm410_vm0, %v2630_v56, %v2619_v63  ;;  %v3488_v7 = vrot.slane %v2631_v61, 4  ;;  %v3478_v28 = vsel %vm410_vm0, %v3477_v13, %v2625_v43  ;;  %v215_v63 = vpop.f32.mrf.mxu0  ;;  %v3496_v61 = vrot.slane %v3476_v27, 4 }
 0x149   :  { %v3574_v31 = vrot.slane %v3555_v2, 4  ;;  %v3579_v59 = vsel %vm410_vm0, %v3571_v12, %v3578_v20  ;;  %v3487_v62 = vperm.slane %v3483_v47, %v7557_v57  ;;  %v3572_v55 = vrot.slane %v3567_v36, 4 }
 0x14a   :  { %v3577_v37 = vsel %vm410_vm0, %v3576_v48, %v3559_v32  ;;  %v4385_v8 = vpack.c.bf16 %v3579_v59, %v3579_v59  ;;  %v3482_v44 = vperm.slane %v3478_v28, %v7557_v57  ;;  %v3489_v40 = vsel %vm410_vm0, %v3488_v7, %v2629_v42 }
 0x14b   :  { %v3575_v9 = vsel %vm410_vm0, %v3567_v36, %v3574_v31  ;;  %v4369_v18 = vpack.c.bf16 %v3577_v37, %v3577_v37  ;;  %v3573_v56 = vsel %vm410_vm0, %v3572_v55, %v3555_v2  ;;  %v3493_v32 = vperm.slane %v3489_v40, %v7557_v57  ;;  %v7747_v2 = vpop.permute.xlu1 %6826 }
 0x14c   :  { %v4353_v12 = vpack.c.bf16 %v3575_v9, %v3575_v9  ;;  %4449 = vst.msk [vmem:[%s11442_s8 + $0xc4] sm:$0xf] %vm2234_vm1, %v4385_v8  ;;  %v4337_v36 = vpack.c.bf16 %v3573_v56, %v3573_v56  ;;  %v3494_v7 = vrot.slane %v3482_v44, 4  ;;  %v3508_v42 = vrot.slane %v3487_v62, 4 }
 0x14d   :  { %4433 = vst.msk [vmem:[%s11442_s8 + $0x84] sm:$0xf] %vm2234_vm1, %v4369_v18  ;;  %v3497_v20 = vsel %vm410_vm0, %v3482_v44, %v3496_v61  ;;  %v3506_v48 = vrot.slane %v3493_v32, 4  ;;  %v11494_v13 = vrot.slane %v7425_v11, 4  ;;  %v11495_v47 = vunpack.i.h.bf16 %v7656_v22 }
 0x14e   :  { %4417 = vst.msk [vmem:[%s11442_s8 + $0x44] sm:$0xf] %vm2234_vm1, %v4353_v12  ;;  %v216_v59 = vadd.f32 %v7381_v53, %v215_v63  ;;  %v3495_v55 = vsel %vm410_vm0, %v3494_v7, %v3476_v27  ;;  %v3505_v37 = vperm.slane %v3497_v20, %v7614_v21  ;;  %v3509_v8 = vsel %vm410_vm0, %v3493_v32, %v3508_v42 }
 0x14f   :  { %v1141_v31 = vsel %vm410_vm0, %v11495_v47, %v11494_v13  ;;  %4401 = vst.msk [vmem:[%s11442_s8 + $0x4] sm:$0xf] %vm2234_vm1, %v4337_v36  ;;  %v11496_v28 = vmov %v11495_v47  ;;  %v3501_v44 = vperm.slane %v3495_v55, %v7614_v21  ;;  %v3507_v53 = vsel %vm410_vm0, %v3506_v48, %v3487_v62  ;;  %v6817_v13 = vpop.permute.xlu0 %6816 }
 0x150   :  { %v1138_v9 = vrot.slane %v11496_v28, 4  ;;  %v3517_v40 = vperm.slane %v3509_v8, %v7614_v21  ;;  %v3513_v63 = vperm.slane %v3507_v53, %v7614_v21  ;;  %v3524_v56 = vrot.slane %v3505_v37, 4 }
 0x151   :  { %v7775_v27 = vperm.slane %v1141_v31, %v7557_v57  ;;  %v6853_v12 = vunpack.i.l.bf16 %v7656_v22  ;;  %v3520_v32 = vrot.slane %v3501_v44, 4  ;;  %v6829_v36 = vunpack.i.h.bf16 %v7747_v2 }
 0x152   :  { %v3522_v61 = vrot.slane %v3517_v40, 4  ;;  %v6828_v7 = vunpack.i.l.bf16 %v7747_v2  ;;  %v3518_v42 = vrot.slane %v3513_v63, 4  ;;  %v3525_v20 = vsel %vm410_vm0, %v3517_v40, %v3524_v56 }
 0x153   :  { %v1139_v62 = vsel %vm410_vm0, %v1138_v9, %v7425_v11  ;;  %v7783_v48 = vmul.f32 0.03125, %v216_v59  ;;  %v3521_v47 = vsel %vm410_vm0, %v3513_v63, %v3520_v32  ;;  %v4384_v22 = vpack.c.bf16 %v3525_v20, %v3525_v20  ;;  %v7807_v56 = vpop.permute.xlu1 %6841 }
 0x154   :  { %v3523_v31 = vsel %vm410_vm0, %v3522_v61, %v3505_v37  ;;  %v478_v55 = vrot.slane %v6829_v36, 4  ;;  %v3519_v8 = vsel %vm410_vm0, %v3518_v42, %v3501_v44  ;;  %v4352_v28 = vpack.c.bf16 %v3521_v47, %v3521_v47 }
 0x155   :  { %11497 = vst [vmem:[#allocation20_spill] sm:$0xff] %v7783_v48  ;;  %v4368_v53 = vpack.c.bf16 %v3523_v31, %v3523_v31  ;;  %v422_v2 = vrot.slane %v6828_v7, 4  ;;  %v4336_v40 = vpack.c.bf16 %v3519_v8, %v3519_v8  ;;  %v7793_v11 = vrot.slane %v6853_v12, 4 }
 0x156   :  { %4448 = vst.msk [vmem:[%s11442_s8 + $0xc0] sm:$0xf] %vm2234_vm1, %v4384_v22  ;;  %v6819_v59 = vunpack.i.h.bf16 %v6817_v13  ;;  %v7800_v37 = vperm.slane %v1139_v62, %v7557_v57  ;;  %v11498_v9 = vrot.slane %v7423_v10, 4  ;;  %v6818_v63 = vunpack.i.l.bf16 %v6817_v13 }
 0x157   :  { %4416 = vst.msk [vmem:[%s11442_s8 + $0x40] sm:$0xf] %vm2234_vm1, %v4352_v28  ;;  %v7816_v42 = vpack.i.bf16 %v7783_v48, %v7612_v19  ;;  %v6844_v22 = vunpack.i.h.bf16 %v7807_v56  ;;  %v580_v19 = vrot.slane %v7450_v25, 4 }
 0x158   :  { %v7805_v44 = vsel %vm410_vm0, %v6853_v12, %v11498_v9  ;;  %4400 = vst.msk [vmem:[%s11442_s8] sm:$0xf] %vm2234_vm1, %v4336_v40  ;;  %v479_v32 = vsel %vm410_vm0, %v478_v55, %v6819_v59  ;;  %v480_v61 = vrot.slane %v6819_v59, 4  ;;  %v423_v62 = vsel %vm410_vm0, %v422_v2, %v6818_v63 }
 0x159   :  { %4432 = vst.msk [vmem:[%s11442_s8 + $0x80] sm:$0xf] %vm2234_vm1, %v4368_v53  ;;  %v485_v20 = vperm.slane %v479_v32, %v7557_v57  ;;  %v424_v13 = vrot.slane %v6818_v63, 4  ;;  %v429_v31 = vperm.slane %v423_v62, %v7557_v57  ;;  %7056 = vrot.lane.b32.xlu2 %v7816_v42, %s7278_s13  ;;  %v11499_v53 = vrot.slane %v7618_v41, 4  ;;  %7061 = vrot.lane.b32.xlu0 %v7816_v42, %s7270_s17 }
 0x15a   :  { %v481_v47 = vsel %vm410_vm0, %v6829_v36, %v480_v61  ;;  %v11500_v9 = vrot.slane %v7628_v30, 4  ;;  %v11501_v62 = vrot.slane %v7604_v49, 4 }
 0x15b   :  { %v489_v8 = vperm.slane %v481_v47, %v7557_v57  ;;  %v490_v28 = vrot.slane %v485_v20, 4  ;;  %v493_v54 = vsel %vm410_vm0, %v485_v20, %v11499_v53  ;;  %v425_v36 = vsel %vm410_vm0, %v6828_v7, %v424_v13 }
 0x15c   :  { %v501_v2 = vperm.slane %v493_v54, %v7614_v21  ;;  %v433_v40 = vperm.slane %v425_v36, %v7557_v57  ;;  %v434_v59 = vrot.slane %v429_v31, 4  ;;  %v437_v63 = vsel %vm410_vm0, %v429_v31, %v11500_v9 }
 0x15d   :  { %v491_v32 = vsel %vm410_vm0, %v490_v28, %v7618_v41  ;;  %v502_v61 = vrot.slane %v489_v8, 4  ;;  %v505_v47 = vsel %vm410_vm0, %v489_v8, %v11501_v62  ;;  %v445_v20 = vperm.slane %v437_v63, %v7614_v21 }
 0x15e   :  { %v497_v7 = vperm.slane %v491_v32, %v7614_v21  ;;  %v513_v13 = vperm.slane %v505_v47, %v7614_v21  ;;  %v516_v53 = vrot.slane %v501_v2, 4  ;;  %v435_v54 = vsel %vm410_vm0, %v434_v59, %v7628_v30 }
 0x15f   :  { %v503_v31 = vsel %vm410_vm0, %v502_v61, %v7604_v49  ;;  %v441_v41 = vperm.slane %v435_v54, %v7614_v21  ;;  %v446_v28 = vrot.slane %v433_v40, 4  ;;  %v11502_v36 = vrot.slane %v7609_v58, 4 }
 0x160   :  { %v509_v9 = vperm.slane %v503_v31, %v7614_v21  ;;  %v514_v63 = vrot.slane %v497_v7, 4  ;;  %v517_v32 = vsel %vm410_vm0, 0.0, %v516_v53  ;;  %v520_v62 = vrot.slane %v513_v13, 4 }
 0x161   :  { %v449_v8 = vsel %vm410_vm0, %v433_v40, %v11502_v36  ;;  %v1360_v2 = vsel %vm410_vm0, %v516_v53, %v497_v7  ;;  %v1365_v47 = vrot.slane %v517_v32, 4  ;;  %v447_v30 = vsel %vm410_vm0, %v446_v28, %v7609_v58  ;;  %7066 = vrot.lane.b32.xlu2 %v7816_v42, %s7277_s12 }
 0x162   :  { %v457_v49 = vperm.slane %v449_v8, %v7614_v21  ;;  %v515_v59 = vsel %vm410_vm0, 0.0, %v514_v63  ;;  %v518_v61 = vrot.slane %v509_v9, 4  ;;  %v521_v54 = vsel %vm410_vm0, 0.0, %v520_v62 }
 0x163   :  { %v1364_v40 = vperm.slane %v1360_v2, %v7557_v57  ;;  %v1366_v31 = vsel %vm410_vm0, %v1365_v47, %v515_v59  ;;  %v1371_v36 = vsel %vm410_vm0, %v520_v62, %v509_v9  ;;  %v1376_v13 = vrot.slane %v521_v54, 4 }
 0x164   :  { %v453_v7 = vperm.slane %v447_v30, %v7614_v21  ;;  %v519_v53 = vsel %vm410_vm0, 0.0, %v518_v61  ;;  %v1370_v58 = vperm.slane %v1366_v31, %v7557_v57  ;;  %v1375_v28 = vperm.slane %v1371_v36, %v7557_v57 }
 0x165   :  { %v1384_v8 = vrot.slane %v1364_v40, 4  ;;  %v1377_v63 = vsel %vm410_vm0, %v1376_v13, %v519_v53  ;;  %v458_v32 = vrot.slane %v441_v41, 4  ;;  %v460_v12 = vrot.slane %v445_v20, 4 }
 0x166   :  { %v462_v43 = vrot.slane %v453_v7, 4  ;;  %v1381_v2 = vperm.slane %v1377_v63, %v7557_v57  ;;  %v1382_v47 = vrot.slane %v1370_v58, 4  ;;  %v1396_v62 = vrot.slane %v1375_v28, 4 }
 0x167   :  { %v1385_v9 = vsel %vm410_vm0, %v1370_v58, %v1384_v8  ;;  %v459_v59 = vsel %vm410_vm0, 0.0, %v458_v32  ;;  %v461_v61 = vsel %vm410_vm0, 0.0, %v460_v12  ;;  %v464_v13 = vrot.slane %v457_v49, 4 }
 0x168   :  { %v1393_v30 = vperm.slane %v1385_v9, %v7614_v21  ;;  %v463_v54 = vsel %vm410_vm0, 0.0, %v462_v43  ;;  %v1383_v31 = vsel %vm410_vm0, %v1382_v47, %v1364_v40  ;;  %v1394_v36 = vrot.slane %v1381_v2, 4 }
 0x169   :  { %v1397_v20 = vsel %vm410_vm0, %v1381_v2, %v1396_v62  ;;  %v1389_v53 = vperm.slane %v1383_v31, %v7614_v21  ;;  %v1306_v8 = vsel %vm410_vm0, %v460_v12, %v441_v41  ;;  %v465_v32 = vsel %vm410_vm0, 0.0, %v464_v13 }
 0x16a   :  { %v1405_v63 = vperm.slane %v1397_v20, %v7614_v21  ;;  %v1412_v58 = vrot.slane %v1393_v30, 4  ;;  %v1395_v9 = vsel %vm410_vm0, %v1394_v36, %v1375_v28  ;;  %v1310_v18 = vperm.slane %v1306_v8, %v7557_v57 }
 0x16b   :  { %v1311_v43 = vrot.slane %v461_v61, 4  ;;  %v1401_v40 = vperm.slane %v1395_v9, %v7614_v21  ;;  %v1408_v47 = vrot.slane %v1389_v53, 4  ;;  %v1317_v31 = vsel %vm410_vm0, %v464_v13, %v453_v7 }
 0x16c   :  { %v1410_v55 = vrot.slane %v1405_v63, 4  ;;  %v1413_v49 = vsel %vm410_vm0, %v1405_v63, %v1412_v58  ;;  %v1322_v20 = vrot.slane %v465_v32, 4  ;;  %v1321_v63 = vperm.slane %v1317_v31, %v7557_v57 }
 0x16d   :  { %v2219_v2 = vpack.c.bf16 %v1413_v49, %v1413_v49  ;;  %v1312_v62 = vsel %vm410_vm0, %v1311_v43, %v459_v59  ;;  %v1406_v12 = vrot.slane %v1401_v40, 4  ;;  %v1409_v41 = vsel %vm410_vm0, %v1401_v40, %v1408_v47  ;;  %v6832_v40 = vpop.permute.xlu0 %6831 }
 0x16e   :  { %v1411_v28 = vsel %vm410_vm0, %v1410_v55, %v1393_v30  ;;  %v1316_v36 = vperm.slane %v1312_v62, %v7557_v57  ;;  %v2187_v61 = vpack.c.bf16 %v1409_v41, %v1409_v41  ;;  %v1323_v59 = vsel %vm410_vm0, %v1322_v20, %v463_v54 }
 0x16f   :  { %v2203_v8 = vpack.c.bf16 %v1411_v28, %v1411_v28  ;;  %2284 = vst.msk [vmem:[%s11441_s7 + $0xc4] sm:$0xf] %vm2234_vm1, %v2219_v2  ;;  %v1407_v7 = vsel %vm410_vm0, %v1406_v12, %v1389_v53  ;;  %v1327_v13 = vperm.slane %v1323_v59, %v7557_v57  ;;  %v1330_v9 = vrot.slane %v1310_v18, 4 }
 0x170   :  { %v1328_v58 = vrot.slane %v1316_v36, 4  ;;  %v1164_v55 = vrot.slane %v7800_v37, 4  ;;  %v2171_v30 = vpack.c.bf16 %v1407_v7, %v1407_v7  ;;  %2252 = vst.msk [vmem:[%s11441_s7 + $0x44] sm:$0xf] %vm2234_vm1, %v2187_v61  ;;  %v1342_v32 = vrot.slane %v1321_v63, 4 }
 0x171   :  { %v4809_v43 = vrot.slane %v6844_v22, 4  ;;  %2268 = vst.msk [vmem:[%s11441_s7 + $0x84] sm:$0xf] %vm2234_vm1, %v2203_v8  ;;  %v1331_v53 = vsel %vm410_vm0, %v1316_v36, %v1330_v9  ;;  %v1340_v47 = vrot.slane %v1327_v13, 4  ;;  %v11503_v49 = vunpack.i.l.bf16 %v7807_v56 }
 0x172   :  { %v1329_v54 = vsel %vm410_vm0, %v1328_v58, %v1310_v18  ;;  %v7924_v62 = vsel %vm410_vm0, %v7793_v11, %v7423_v10  ;;  %2236 = vst.msk [vmem:[%s11441_s7 + $0x4] sm:$0xf] %vm2234_vm1, %v2171_v30  ;;  %v1339_v18 = vperm.slane %v1331_v53, %v7614_v21  ;;  %v1343_v20 = vsel %vm410_vm0, %v1327_v13, %v1342_v32 }
 0x173   :  { %v4753_v2 = vrot.slane %v11503_v49, 4  ;;  %v1335_v31 = vperm.slane %v1329_v54, %v7614_v21  ;;  %v1341_v12 = vsel %vm410_vm0, %v1340_v47, %v1321_v63  ;;  %v1351_v41 = vperm.slane %v1343_v20, %v7614_v21 }
 0x174   :  { %v6834_v28 = vunpack.i.h.bf16 %v6832_v40  ;;  %v6833_v36 = vunpack.i.l.bf16 %v6832_v40  ;;  %v7937_v10 = vperm.slane %v7805_v44, %v7557_v57  ;;  %v1347_v11 = vperm.slane %v1341_v12, %v7614_v21 }
 0x175   :  { %v1354_v61 = vrot.slane %v1335_v31, 4  ;;  %v1358_v8 = vrot.slane %v1339_v18, 4  ;;  %v1356_v59 = vrot.slane %v1351_v41, 4 }
 0x176   :  { %v4810_v7 = vsel %vm410_vm0, %v4809_v43, %v6834_v28  ;;  %v4811_v58 = vrot.slane %v6834_v28, 4  ;;  %v4754_v13 = vsel %vm410_vm0, %v4753_v2, %v6833_v36  ;;  %v1352_v9 = vrot.slane %v1347_v11, 4 }
 0x177   :  { %v1355_v63 = vsel %vm410_vm0, %v1347_v11, %v1354_v61  ;;  %v1359_v30 = vsel %vm410_vm0, %v1351_v41, %v1358_v8  ;;  %v4816_v32 = vperm.slane %v4810_v7, %v7557_v57  ;;  %v1357_v44 = vsel %vm410_vm0, %v1356_v59, %v1339_v18 }
 0x178   :  { %v2186_v40 = vpack.c.bf16 %v1355_v63, %v1355_v63  ;;  %v2218_v54 = vpack.c.bf16 %v1359_v30, %v1359_v30  ;;  %v4812_v53 = vsel %vm410_vm0, %v6844_v22, %v4811_v58  ;;  %v1353_v43 = vsel %vm410_vm0, %v1352_v9, %v1335_v31 }
 0x179   :  { %v2202_v47 = vpack.c.bf16 %v1357_v44, %v1357_v44  ;;  %v4820_v49 = vperm.slane %v4812_v53, %v7557_v57  ;;  %v4821_v2 = vrot.slane %v4816_v32, 4  ;;  %v2170_v20 = vpack.c.bf16 %v1353_v43, %v1353_v43 }
 0x17a   :  { %2251 = vst.msk [vmem:[%s11441_s7 + $0x40] sm:$0xf] %vm2234_vm1, %v2186_v40  ;;  %v11504_v18 = vrot.slane %v7659_v3, 4  ;;  %v4755_v41 = vrot.slane %v6833_v36, 4  ;;  %v4760_v28 = vperm.slane %v4754_v13, %v7557_v57  ;;  %v11505_v61 = vrot.slane %v7638_v33, 4 }
 0x17b   :  { %2267 = vst.msk [vmem:[%s11441_s7 + $0x80] sm:$0xf] %vm2234_vm1, %v2202_v47  ;;  %v4822_v22 = vsel %vm410_vm0, %v4821_v2, %v7659_v3  ;;  %v4833_v11 = vrot.slane %v4820_v49, 4  ;;  %v11506_v7 = vunpack.i.l.bf16 %v7807_v56  ;;  %v11507_v30 = vrot.slane %v7671_v50, 4 }
 0x17c   :  { %v4824_v12 = vsel %vm410_vm0, %v4816_v32, %v11504_v18  ;;  %v4836_v8 = vsel %vm410_vm0, %v4820_v49, %v11505_v61  ;;  %2235 = vst.msk [vmem:[%s11441_s7] sm:$0xf] %vm2234_vm1, %v2170_v20  ;;  %v4828_v36 = vperm.slane %v4822_v22, %v7614_v21  ;;  %v4765_v58 = vrot.slane %v4760_v28, 4 }
 0x17d   :  { %v4832_v31 = vperm.slane %v4824_v12, %v7614_v21  ;;  %v4844_v59 = vperm.slane %v4836_v8, %v7614_v21  ;;  %v4756_v3 = vsel %vm410_vm0, %v11506_v7, %v4755_v41  ;;  %2283 = vst.msk [vmem:[%s11441_s7 + $0xc0] sm:$0xf] %vm2234_vm1, %v2218_v54  ;;  %v4834_v13 = vsel %vm410_vm0, %v4833_v11, %v7638_v33 }
 0x17e   :  { %v4764_v63 = vperm.slane %v4756_v3, %v7557_v57  ;;  %v4768_v32 = vsel %vm410_vm0, %v4760_v28, %v11507_v30  ;;  %v4840_v56 = vperm.slane %v4834_v13, %v7614_v21  ;;  %v4845_v44 = vrot.slane %v4828_v36, 4 }
 0x17f   :  { %v4847_v9 = vrot.slane %v4832_v31, 4  ;;  %v4851_v40 = vrot.slane %v4844_v59, 4  ;;  %v4766_v53 = vsel %vm410_vm0, %v4765_v58, %v7671_v50  ;;  %v4776_v47 = vperm.slane %v4768_v32, %v7614_v21 }
 0x180   :  { %v4772_v33 = vperm.slane %v4766_v53, %v7614_v21  ;;  %v4846_v49 = vsel %vm410_vm0, 0.0, %v4845_v44  ;;  %v4849_v2 = vrot.slane %v4840_v56, 4  ;;  %v4777_v50 = vrot.slane %v4764_v63, 4 }
 0x181   :  { %v4848_v43 = vsel %vm410_vm0, 0.0, %v4847_v9  ;;  %v5691_v54 = vsel %vm410_vm0, %v4847_v9, %v4828_v36  ;;  %v4852_v20 = vsel %vm410_vm0, 0.0, %v4851_v40  ;;  %v5702_v41 = vsel %vm410_vm0, %v4851_v40, %v4840_v56 }
 0x182   :  { %v5695_v18 = vperm.slane %v5691_v54, %v7557_v57  ;;  %v5696_v12 = vrot.slane %v4848_v43, 4  ;;  %v5707_v28 = vrot.slane %v4852_v20, 4  ;;  %v4850_v22 = vsel %vm410_vm0, 0.0, %v4849_v2 }
 0x183   :  { %v5706_v31 = vperm.slane %v5702_v41, %v7557_v57  ;;  %v11508_v61 = vrot.slane %v7654_v1, 4  ;;  %v4778_v7 = vsel %vm410_vm0, %v4777_v50, %v7654_v1  ;;  %v8014_v32 = vperm.slane %v7924_v62, %v7557_v57 }
 0x184   :  { %v5715_v11 = vrot.slane %v5695_v18, 4  ;;  %v5697_v36 = vsel %vm410_vm0, %v5696_v12, %v4846_v49  ;;  %v5708_v59 = vsel %vm410_vm0, %v5707_v28, %v4850_v22  ;;  %v4784_v30 = vperm.slane %v4778_v7, %v7614_v21  ;;  %v8022_v12 = vpop.f32.mrf.mxu2 }
 0x185   :  { %v4780_v8 = vsel %vm410_vm0, %v4764_v63, %v11508_v61  ;;  %v5701_v58 = vperm.slane %v5697_v36, %v7557_v57  ;;  %v5712_v13 = vperm.slane %v5708_v59, %v7557_v57  ;;  %v5727_v9 = vrot.slane %v5706_v31, 4 }
 0x186   :  { %v4788_v3 = vperm.slane %v4780_v8, %v7614_v21  ;;  %v4789_v63 = vrot.slane %v4772_v33, 4  ;;  %v4791_v56 = vrot.slane %v4776_v47, 4  ;;  %v4793_v41 = vrot.slane %v4784_v30, 4  ;;  %v8029_v8 = vpop.f32.mrf.mxu3 }
 0x187   :  { %v5713_v40 = vrot.slane %v5701_v58, 4  ;;  %v5716_v53 = vsel %vm410_vm0, %v5701_v58, %v5715_v11  ;;  %v5725_v1 = vrot.slane %v5712_v13, 4  ;;  %v5728_v43 = vsel %vm410_vm0, %v5712_v13, %v5727_v9  ;;  %v8036_v9 = vpop.permute.xlu2 %6871 }
 0x188   :  { %v4795_v44 = vrot.slane %v4788_v3, 4  ;;  %v5724_v54 = vperm.slane %v5716_v53, %v7614_v21  ;;  %v5736_v49 = vperm.slane %v5728_v43, %v7614_v21  ;;  %v4790_v2 = vsel %vm410_vm0, 0.0, %v4789_v63 }
 0x189   :  { %v4792_v20 = vsel %vm410_vm0, 0.0, %v4791_v56  ;;  %v5714_v62 = vsel %vm410_vm0, %v5713_v40, %v5695_v18  ;;  %v5726_v47 = vsel %vm410_vm0, %v5725_v1, %v5706_v31  ;;  %v4794_v36 = vsel %vm410_vm0, 0.0, %v4793_v41 }
 0x18a   :  { %v4796_v28 = vsel %vm410_vm0, 0.0, %v4795_v44  ;;  %v5720_v50 = vperm.slane %v5714_v62, %v7614_v21  ;;  %v5732_v22 = vperm.slane %v5726_v47, %v7614_v21  ;;  %v5741_v11 = vrot.slane %v5736_v49, 4 }
 0x18b   :  { %v5743_v61 = vrot.slane %v5724_v54, 4  ;;  %v5637_v59 = vsel %vm410_vm0, %v4791_v56, %v4772_v33  ;;  %v5642_v7 = vrot.slane %v4792_v20, 4  ;;  %v5648_v18 = vsel %vm410_vm0, %v4795_v44, %v4784_v30 }
 0x18c   :  { %v5737_v3 = vrot.slane %v5732_v22, 4  ;;  %v5739_v31 = vrot.slane %v5720_v50, 4  ;;  %v5742_v58 = vsel %vm410_vm0, %v5741_v11, %v5724_v54  ;;  %v5641_v53 = vperm.slane %v5637_v59, %v7557_v57 }
 0x18d   :  { %v5744_v13 = vsel %vm410_vm0, %v5736_v49, %v5743_v61  ;;  %v6534_v63 = vpack.c.bf16 %v5742_v58, %v5742_v58  ;;  %v5643_v1 = vsel %vm410_vm0, %v5642_v7, %v4790_v2  ;;  %v5652_v56 = vperm.slane %v5648_v18, %v7557_v57 }
 0x18e   :  { %v6550_v40 = vpack.c.bf16 %v5744_v13, %v5744_v13  ;;  %v5738_v43 = vsel %vm410_vm0, %v5737_v3, %v5720_v50  ;;  %v5740_v33 = vsel %vm410_vm0, %v5732_v22, %v5739_v31  ;;  %v5647_v30 = vperm.slane %v5643_v1, %v7557_v57  ;;  %v8054_v50 = vpop.permute.xlu1 %6856  ;;  %v4563_v3 = vpop.f32.mrf.mxu2 }
 0x18f   :  { %v6502_v44 = vpack.c.bf16 %v5738_v43, %v5738_v43  ;;  %v6518_v54 = vpack.c.bf16 %v5740_v33, %v5740_v33  ;;  %6598 = vst.msk [vmem:[%s11443_s9 + $0x84] sm:$0xf] %vm2234_vm1, %v6534_v63  ;;  %v5653_v49 = vrot.slane %v4796_v28, 4  ;;  %v5661_v20 = vrot.slane %v5641_v53, 4  ;;  %v4573_v33 = vpop.f32.mrf.mxu3 }
 0x190   :  { %v1120_v62 = vrot.slane %v7937_v10, 4  ;;  %v11454_v2 = vunpack.i.h.bf16 %v8036_v9  ;;  %6614 = vst.msk [vmem:[%s11443_s9 + $0xc4] sm:$0xf] %vm2234_vm1, %v6550_v40  ;;  %v5659_v47 = vrot.slane %v5647_v30, 4  ;;  %v5673_v41 = vrot.slane %v5652_v56, 4 }
 0x191   :  { %6566 = vst.msk [vmem:[%s11443_s9 + $0x4] sm:$0xf] %vm2234_vm1, %v6502_v44  ;;  %v5654_v28 = vsel %vm410_vm0, %v5653_v49, %v4794_v36  ;;  %v5662_v22 = vsel %vm410_vm0, %v5647_v30, %v5661_v20  ;;  %v1108_v7 = vrot.slane %v8014_v32, 4  ;;  %v6859_v36 = vunpack.i.h.bf16 %v8054_v50  ;;  %v8089_v44 = vld [vmem:[%s11440_s6] ss:$0 sm:$0xff] }
 0x192   :  { %6582 = vst.msk [vmem:[%s11443_s9 + $0x44] sm:$0xf] %vm2234_vm1, %v6518_v54  ;;  %v5658_v11 = vperm.slane %v5654_v28, %v7557_v57  ;;  %v5660_v61 = vsel %vm410_vm0, %v5659_v47, %v5641_v53  ;;  %v5670_v59 = vperm.slane %v5662_v22, %v7614_v21  ;;  %v6858_v31 = vunpack.i.l.bf16 %v8054_v50  ;;  %v6847_v53 = vpop.permute.xlu0 %6846 }
 0x193   :  { %v5666_v18 = vperm.slane %v5660_v61, %v7614_v21  ;;  %v6873_v58 = vunpack.i.l.bf16 %v8036_v9  ;;  %v8083_v29 = vrot.slane %v11454_v2, 4  ;;  %v1150_v30 = vrot.slane %v6859_v36, 4 }
 0x194   :  { %v5671_v13 = vrot.slane %v5658_v11, 4  ;;  %v5674_v63 = vsel %vm410_vm0, %v5658_v11, %v5673_v41  ;;  %v5689_v40 = vrot.slane %v5670_v59, 4  ;;  %v8093_v54 = vadd.f32 %v8089_v44, %v8022_v12 }
 0x195   :  { %v5682_v1 = vperm.slane %v5674_v63, %v7614_v21  ;;  %v5685_v43 = vrot.slane %v5666_v18, 4  ;;  %v8097_v49 = vadd.f32 %v8089_v44, %v4563_v3  ;;  %v1094_v20 = vrot.slane %v6858_v31, 4 }
 0x196   :  { %11509 = vst [vmem:[#allocation21_spill] sm:$0xff] %v8093_v54  ;;  %v5672_v42 = vsel %vm410_vm0, %v5671_v13, %v5652_v56  ;;  %v6849_v28 = vunpack.i.h.bf16 %v6847_v53  ;;  %v8103_v22 = vadd.f32 %v8089_v44, %v8029_v8  ;;  %v8106_v12 = vadd.f32 %v8089_v44, %v4573_v33 }
 0x197   :  { %11510 = vst [vmem:[#allocation22_spill] sm:$0xff] %v8097_v49  ;;  %v5678_v47 = vperm.slane %v5672_v42, %v7614_v21  ;;  %v5687_v41 = vrot.slane %v5682_v1, 4  ;;  %v5690_v50 = vsel %vm410_vm0, %v5682_v1, %v5689_v40  ;;  %v6848_v61 = vunpack.i.l.bf16 %v6847_v53 }
 0x198   :  { %11511 = vst [vmem:[#allocation23_spill] sm:$0xff] %v8103_v22  ;;  %v6549_v11 = vpack.c.bf16 %v5690_v50, %v5690_v50  ;;  %v1151_v63 = vsel %vm410_vm0, %v1150_v30, %v6849_v28  ;;  %v1152_v8 = vrot.slane %v6849_v28, 4 }
 0x199   :  { %11512 = vst [vmem:[#allocation24_spill] sm:$0xff] %v8106_v12  ;;  %v5683_v56 = vrot.slane %v5678_v47, 4  ;;  %v5686_v3 = vsel %vm410_vm0, %v5678_v47, %v5685_v43  ;;  %v5688_v13 = vsel %vm410_vm0, %v5687_v41, %v5670_v59  ;;  %v1157_v40 = vperm.slane %v1151_v63, %v7557_v57  ;;  %v8122_v43 = vpop.permute.xlu1 %6861 }
 0x19a   :  { %v6517_v42 = vpack.c.bf16 %v5686_v3, %v5686_v3  ;;  %v6533_v2 = vpack.c.bf16 %v5688_v13, %v5688_v13  ;;  %6613 = vst.msk [vmem:[%s11443_s9 + $0xc0] sm:$0xf] %vm2234_vm1, %v6549_v11  ;;  %v1095_v53 = vsel %vm410_vm0, %v1094_v20, %v6848_v61  ;;  %v1096_v33 = vrot.slane %v6848_v61, 4 }
 0x19b   :  { %v5684_v1 = vsel %vm410_vm0, %v5683_v56, %v5666_v18  ;;  %v8120_v59 = vpack.i.bf16 %v8097_v49, %v8093_v54  ;;  %v1153_v47 = vsel %vm410_vm0, %v6859_v36, %v1152_v8  ;;  %v1162_v41 = vrot.slane %v1157_v40, 4 }
 0x19c   :  { %v6501_v30 = vpack.c.bf16 %v5684_v1, %v5684_v1  ;;  %6581 = vst.msk [vmem:[%s11443_s9 + $0x40] sm:$0xf] %vm2234_vm1, %v6517_v42  ;;  %v1165_v18 = vsel %vm410_vm0, %v1157_v40, %v1164_v55  ;;  %v1161_v20 = vperm.slane %v1153_v47, %v7557_v57  ;;  %v1097_v28 = vsel %vm410_vm0, %v6858_v31, %v1096_v33 }
 0x19d   :  { %6597 = vst.msk [vmem:[%s11443_s9 + $0x80] sm:$0xf] %vm2234_vm1, %v6533_v2  ;;  %v1173_v50 = vperm.slane %v1165_v18, %v7614_v21  ;;  %v1101_v11 = vperm.slane %v1095_v53, %v7557_v57  ;;  %v1163_v55 = vsel %vm410_vm0, %v1162_v41, %v7800_v37  ;;  %v1105_v36 = vperm.slane %v1097_v28, %v7557_v57 }
 0x19e   :  { %6565 = vst.msk [vmem:[%s11443_s9] sm:$0xf] %vm2234_vm1, %v6501_v30  ;;  %7071 = vrot.lane.b32.xlu1 %v8120_v59, %s7278_s13  ;;  %v8151_v2 = vpack.i.bf16 %v8106_v12, %v8103_v22  ;;  %v6864_v31 = vunpack.i.h.bf16 %v8122_v43  ;;  %v1169_v61 = vperm.slane %v1163_v55, %v7614_v21  ;;  %v1174_v56 = vrot.slane %v1161_v20, 4 }
 0x19f   :  { %v11513_v3 = vrot.slane %v7775_v27, 4  ;;  %v1188_v63 = vrot.slane %v1173_v50, 4  ;;  %v1106_v42 = vrot.slane %v1101_v11, 4  ;;  %v1109_v8 = vsel %vm410_vm0, %v1101_v11, %v1108_v7 }
 0x1a0   :  { %v1118_v40 = vrot.slane %v1105_v36, 4  ;;  %7086 = vrot.lane.b32.xlu2 %v8151_v2, %s7270_s17  ;;  %v1175_v1 = vsel %vm410_vm0, %v1174_v56, %v7775_v27  ;;  %v1186_v53 = vrot.slane %v1169_v61, 4  ;;  %v1117_v28 = vperm.slane %v1109_v8, %v7614_v21  ;;  %7076 = vrot.lane.b32.xlu0 %v8151_v2, %s7278_s13 }
 0x1a1   :  { %v1177_v13 = vsel %vm410_vm0, %v1161_v20, %v11513_v3  ;;  %v1189_v33 = vsel %vm410_vm0, 0.0, %v1188_v63  ;;  %v2008_v30 = vsel %vm410_vm0, %v1188_v63, %v1169_v61  ;;  %v1181_v47 = vperm.slane %v1175_v1, %v7614_v21 }
 0x1a2   :  { %v1185_v37 = vperm.slane %v1177_v13, %v7614_v21  ;;  %v2012_v18 = vperm.slane %v2008_v30, %v7557_v57  ;;  %v2013_v20 = vrot.slane %v1189_v33, 4  ;;  %v1187_v7 = vsel %vm410_vm0, 0.0, %v1186_v53 }
 0x1a3   :  { %v1107_v50 = vsel %vm410_vm0, %v1106_v42, %v8014_v32  ;;  %v1119_v27 = vsel %vm410_vm0, %v1118_v40, %v7937_v10  ;;  %v1190_v11 = vrot.slane %v1181_v47, 4  ;;  %v1121_v8 = vsel %vm410_vm0, %v1105_v36, %v1120_v62  ;;  %v2401_v62 = vpop.f32.mrf.mxu1 }
 0x1a4   :  { %v1192_v41 = vrot.slane %v1185_v37, 4  ;;  %v2014_v61 = vsel %vm410_vm0, %v2013_v20, %v1187_v7  ;;  %v2032_v37 = vrot.slane %v2012_v18, 4  ;;  %v1113_v42 = vperm.slane %v1107_v50, %v7614_v21 }
 0x1a5   :  { %v2018_v3 = vperm.slane %v2014_v61, %v7557_v57  ;;  %v1191_v32 = vsel %vm410_vm0, 0.0, %v1190_v11  ;;  %v1125_v40 = vperm.slane %v1119_v27, %v7614_v21  ;;  %v1129_v20 = vperm.slane %v1121_v8, %v7614_v21 }
 0x1a6   :  { %v1193_v55 = vsel %vm410_vm0, 0.0, %v1192_v41  ;;  %v2019_v56 = vsel %vm410_vm0, %v1192_v41, %v1181_v47  ;;  %v1130_v7 = vrot.slane %v1113_v42, 4  ;;  %v1132_v10 = vrot.slane %v1117_v28, 4 }
 0x1a7   :  { %v2023_v13 = vperm.slane %v2019_v56, %v7557_v57  ;;  %v2024_v63 = vrot.slane %v1193_v55, 4  ;;  %v2030_v53 = vrot.slane %v2018_v3, 4  ;;  %v2033_v33 = vsel %vm410_vm0, %v2018_v3, %v2032_v37 }
 0x1a8   :  { %v2041_v41 = vperm.slane %v2033_v33, %v7614_v21  ;;  %v1134_v11 = vrot.slane %v1125_v40, 4  ;;  %v1131_v3 = vsel %vm410_vm0, 0.0, %v1130_v7  ;;  %v1954_v8 = vsel %vm410_vm0, %v1132_v10, %v1113_v42  ;;  %7091 = vrot.lane.b32.xlu2 %v8120_v59, %s7277_s12  ;;  %7081 = vrot.lane.b32.xlu0 %v8120_v59, %s7270_s17 }
 0x1a9   :  { %v2025_v1 = vsel %vm410_vm0, %v2024_v63, %v1191_v32  ;;  %v2044_v30 = vrot.slane %v2023_v13, 4  ;;  %v2031_v50 = vsel %vm410_vm0, %v2030_v53, %v2012_v18  ;;  %v1133_v63 = vsel %vm410_vm0, 0.0, %v1132_v10 }
 0x1aa   :  { %v2029_v47 = vperm.slane %v2025_v1, %v7557_v57  ;;  %v2037_v36 = vperm.slane %v2031_v50, %v7614_v21  ;;  %v2060_v61 = vrot.slane %v2041_v41, 4  ;;  %v1135_v37 = vsel %vm410_vm0, 0.0, %v1134_v11 }
 0x1ab   :  { %v1136_v32 = vrot.slane %v1129_v20, 4  ;;  %v1959_v50 = vrot.slane %v1133_v63, 4 }
 0x1ac   :  { %v2042_v27 = vrot.slane %v2029_v47, 4  ;;  %v2045_v55 = vsel %vm410_vm0, %v2029_v47, %v2044_v30  ;;  %v2056_v28 = vrot.slane %v2037_v36, 4  ;;  %v1958_v30 = vperm.slane %v1954_v8, %v7557_v57 }
 0x1ad   :  { %v2053_v56 = vperm.slane %v2045_v55, %v7614_v21  ;;  %v1137_v7 = vsel %vm410_vm0, 0.0, %v1136_v32  ;;  %v1965_v11 = vsel %vm410_vm0, %v1136_v32, %v1125_v40  ;;  %v8208_v55 = vpop.permute.xlu2 %6886 }
 0x1ae   :  { %v2043_v18 = vsel %vm410_vm0, %v2042_v27, %v2023_v13  ;;  %v1969_v10 = vperm.slane %v1965_v11, %v7557_v57  ;;  %v1978_v32 = vrot.slane %v1958_v30, 4  ;;  %v11514_v11 = vunpack.i.h.bf16 %v8036_v9 }
 0x1af   :  { %v2049_v1 = vperm.slane %v2043_v18, %v7614_v21  ;;  %v2058_v53 = vrot.slane %v2053_v56, 4  ;;  %v2061_v33 = vsel %vm410_vm0, %v2053_v56, %v2060_v61  ;;  %v1960_v61 = vsel %vm410_vm0, %v1959_v50, %v1131_v3 }
 0x1b0   :  { %v2231_v47 = vpack.c.bf16 %v2061_v33, %v2061_v33  ;;  %v1970_v56 = vrot.slane %v1137_v7, 4  ;;  %v1964_v63 = vperm.slane %v1960_v61, %v7557_v57  ;;  %v2758_v3 = vrot.slane %v6864_v31, 4  ;;  %v2403_v7 = vpop.f32.mrf.mxu1 }
 0x1b1   :  { %v2054_v13 = vrot.slane %v2049_v1, 4  ;;  %v2057_v20 = vsel %vm410_vm0, %v2049_v1, %v2056_v28  ;;  %v2059_v42 = vsel %vm410_vm0, %v2058_v53, %v2041_v41  ;;  %v1990_v28 = vrot.slane %v1969_v10, 4 }
 0x1b2   :  { %v2199_v27 = vpack.c.bf16 %v2057_v20, %v2057_v20  ;;  %v2215_v18 = vpack.c.bf16 %v2059_v42, %v2059_v42  ;;  %2296 = vst.msk [vmem:[%s11441_s7 + $0xf4] sm:$0xf] %vm2234_vm1, %v2231_v47  ;;  %v2700_v41 = vrot.slane %v6873_v58, 4  ;;  %v1971_v1 = vsel %vm410_vm0, %v1970_v56, %v1135_v37 }
 0x1b3   :  { %v2055_v40 = vsel %vm410_vm0, %v2054_v13, %v2037_v36  ;;  %v1975_v36 = vperm.slane %v1971_v1, %v7557_v57  ;;  %v1976_v53 = vrot.slane %v1964_v63, 4  ;;  %v1979_v33 = vsel %vm410_vm0, %v1964_v63, %v1978_v32 }
 0x1b4   :  { %v2183_v8 = vpack.c.bf16 %v2055_v40, %v2055_v40  ;;  %2264 = vst.msk [vmem:[%s11441_s7 + $0x74] sm:$0xf] %vm2234_vm1, %v2199_v27  ;;  %v6863_v47 = vunpack.i.l.bf16 %v8122_v43  ;;  %v1987_v37 = vperm.slane %v1979_v33, %v7614_v21  ;;  %v2757_v50 = vsel %vm410_vm0, %v8083_v29, %v6864_v31  ;;  %v7164_v29 = vld [vmem:[%s11438_s4] ss:$0 sm:$0xff]  ;;  %v6867_v33 = vpop.permute.xlu0 %6866 }
 0x1b5   :  { %2280 = vst.msk [vmem:[%s11441_s7 + $0xb4] sm:$0xf] %vm2234_vm1, %v2215_v18  ;;  %v2759_v13 = vsel %vm410_vm0, %v11514_v11, %v2758_v3  ;;  %v1977_v20 = vsel %vm410_vm0, %v1976_v53, %v1958_v30  ;;  %v1988_v42 = vrot.slane %v1975_v36, 4  ;;  %v1991_v27 = vsel %vm410_vm0, %v1975_v36, %v1990_v28  ;;  %v8266_v3 = vpop.permute.xlu2 %6901 }
 0x1b6   :  { %2248 = vst.msk [vmem:[%s11441_s7 + $0x34] sm:$0xf] %vm2234_vm1, %v2183_v8  ;;  %v2701_v18 = vsel %vm410_vm0, %v2700_v41, %v6863_v47  ;;  %v1983_v61 = vperm.slane %v1977_v20, %v7614_v21  ;;  %v1999_v56 = vperm.slane %v1991_v27, %v7614_v21  ;;  %v2006_v40 = vrot.slane %v1987_v37, 4 }
 0x1b7   :  { %v2702_v43 = vrot.slane %v6863_v47, 4  ;;  %v8256_v31 = vadd.f32 %v7164_v29, %v2401_v62  ;;  %v1989_v63 = vsel %vm410_vm0, %v1988_v42, %v1969_v10  ;;  %v8259_v30 = vadd.f32 %v7164_v29, %v2403_v7 }
 0x1b8   :  { %v8262_v32 = vperm.slane %v2701_v18, %v7557_v57  ;;  %v1995_v28 = vperm.slane %v1989_v63, %v7614_v21  ;;  %v2002_v41 = vrot.slane %v1983_v61, 4  ;;  %v2004_v8 = vrot.slane %v1999_v56, 4  ;;  %v8289_v63 = vpop.permute.xlu1 %6891 }
 0x1b9   :  { %11515 = vst [vmem:[#allocation25_spill] sm:$0xff] %v8256_v31  ;;  %v2007_v1 = vsel %vm410_vm0, %v1999_v56, %v2006_v40  ;;  %v2703_v62 = vsel %vm410_vm0, %v6873_v58, %v2702_v43  ;;  %v2763_v10 = vperm.slane %v2757_v50, %v7557_v57  ;;  %v2767_v53 = vperm.slane %v2759_v13, %v7557_v57 }
 0x1ba   :  { %11516 = vst [vmem:[#allocation26_spill] sm:$0xff] %v8259_v30  ;;  %v2230_v36 = vpack.c.bf16 %v2007_v1, %v2007_v1  ;;  %v2000_v47 = vrot.slane %v1995_v28, 4  ;;  %v2003_v7 = vsel %vm410_vm0, %v1995_v28, %v2002_v41  ;;  %v2005_v11 = vsel %vm410_vm0, %v2004_v8, %v1987_v37 }
 0x1bb   :  { %v2711_v20 = vperm.slane %v2703_v62, %v7557_v57  ;;  %v2198_v42 = vpack.c.bf16 %v2003_v7, %v2003_v7  ;;  %v2214_v27 = vpack.c.bf16 %v2005_v11, %v2005_v11  ;;  %v2690_v9 = vrot.slane %v7433_v16, 4 }
 0x1bc   :  { %2295 = vst.msk [vmem:[%s11441_s7 + $0xf0] sm:$0xf] %vm2234_vm1, %v2230_v36  ;;  %v2746_v58 = vrot.slane %v7436_v17, 4  ;;  %v11455_v50 = vunpack.i.l.bf16 %v8266_v3  ;;  %v2001_v13 = vsel %vm410_vm0, %v2000_v47, %v1983_v61  ;;  %v2712_v18 = vrot.slane %v8262_v32, 4 }
 0x1bd   :  { %v6869_v37 = vunpack.i.h.bf16 %v6867_v33  ;;  %v2182_v56 = vpack.c.bf16 %v2001_v13, %v2001_v13  ;;  %2263 = vst.msk [vmem:[%s11441_s7 + $0x70] sm:$0xf] %vm2234_vm1, %v2198_v42  ;;  %v2768_v40 = vrot.slane %v2763_v10, 4  ;;  %v2780_v43 = vrot.slane %v2767_v53, 4 }
 0x1be   :  { %v6868_v29 = vunpack.i.l.bf16 %v6867_v33  ;;  %2279 = vst.msk [vmem:[%s11441_s7 + $0xb0] sm:$0xf] %vm2234_vm1, %v2214_v27  ;;  %v2724_v61 = vrot.slane %v2711_v20, 4  ;;  %v8298_v8 = vpack.i.bf16 %v8259_v30, %v8256_v31  ;;  %v6894_v7 = vunpack.i.h.bf16 %v8289_v63 }
 0x1bf   :  { %v2744_v28 = vrot.slane %v6869_v37, 4  ;;  %v2747_v41 = vsel %vm410_vm0, %v6869_v37, %v2746_v58  ;;  %2247 = vst.msk [vmem:[%s11441_s7 + $0x30] sm:$0xf] %vm2234_vm1, %v2182_v56  ;;  %v3250_v30 = vrot.slane %v7493_v51, 4 }
 0x1c0   :  { %v2755_v1 = vperm.slane %v2747_v41, %v7557_v57  ;;  %v2688_v36 = vrot.slane %v6868_v29, 4  ;;  %v2691_v62 = vsel %vm410_vm0, %v6868_v29, %v2690_v9  ;;  %7101 = vrot.lane.b32.xlu1 %v8298_v8, %s7270_s17  ;;  %7096 = vrot.lane.b32.xlu2 %v8298_v8, %s7278_s13 }
 0x1c1   :  { %v2745_v33 = vsel %vm410_vm0, %v2744_v28, %v7436_v17  ;;  %v2699_v47 = vperm.slane %v2691_v62, %v7557_v57  ;;  %7106 = vrot.lane.b32.xlu0 %v8298_v8, %s7277_s12 }
 0x1c2   :  { %v2751_v11 = vperm.slane %v2745_v33, %v7557_v57  ;;  %v2781_v42 = vsel %vm410_vm0, %v2780_v43, %v2755_v1  ;;  %v2782_v27 = vrot.slane %v2755_v1, 4  ;;  %v2689_v58 = vsel %vm410_vm0, %v2688_v36, %v7433_v16 }
 0x1c3   :  { %v2787_v17 = vperm.slane %v2781_v42, %v7614_v21  ;;  %v2695_v9 = vperm.slane %v2689_v58, %v7557_v57  ;;  %v2725_v13 = vsel %vm410_vm0, %v2724_v61, %v2699_v47  ;;  %v2726_v37 = vrot.slane %v2699_v47, 4 }
 0x1c4   :  { %v2769_v56 = vsel %vm410_vm0, %v2768_v40, %v2751_v11  ;;  %v2770_v43 = vrot.slane %v2751_v11, 4  ;;  %v2783_v29 = vsel %vm410_vm0, %v2767_v53, %v2782_v27  ;;  %v2731_v16 = vperm.slane %v2725_v13, %v7614_v21 }
 0x1c5   :  { %v2775_v28 = vperm.slane %v2769_v56, %v7614_v21  ;;  %v2791_v41 = vperm.slane %v2783_v29, %v7614_v21  ;;  %v2796_v1 = vrot.slane %v2787_v17, 4  ;;  %v2713_v36 = vsel %vm410_vm0, %v2712_v18, %v2695_v9 }
 0x1c6   :  { %v2771_v61 = vsel %vm410_vm0, %v2763_v10, %v2770_v43  ;;  %v2714_v62 = vrot.slane %v2695_v9, 4  ;;  %v2719_v33 = vperm.slane %v2713_v36, %v7614_v21  ;;  %v2727_v59 = vsel %vm410_vm0, %v2711_v20, %v2726_v37 }
 0x1c7   :  { %v2779_v40 = vperm.slane %v2771_v61, %v7614_v21  ;;  %v2792_v47 = vrot.slane %v2775_v28, 4  ;;  %v2797_v53 = vsel %vm410_vm0, 0.0, %v2796_v1  ;;  %v2798_v11 = vrot.slane %v2791_v41, 4 }
 0x1c8   :  { %v2715_v42 = vsel %vm410_vm0, %v8262_v32, %v2714_v62  ;;  %v2735_v27 = vperm.slane %v2727_v59, %v7614_v21  ;;  %v2736_v58 = vrot.slane %v2719_v33, 4  ;;  %v2740_v18 = vrot.slane %v2731_v16, 4 }
 0x1c9   :  { %v2793_v10 = vsel %vm410_vm0, 0.0, %v2792_v47  ;;  %v2794_v9 = vrot.slane %v2779_v40, 4  ;;  %v2799_v13 = vsel %vm410_vm0, 0.0, %v2798_v11  ;;  %v3645_v20 = vsel %vm410_vm0, %v2798_v11, %v2787_v17 }
 0x1ca   :  { %v3649_v37 = vperm.slane %v3645_v20, %v7557_v57  ;;  %v3650_v56 = vrot.slane %v2799_v13, 4  ;;  %v2723_v43 = vperm.slane %v2715_v42, %v7614_v21  ;;  %v2737_v29 = vsel %vm410_vm0, 0.0, %v2736_v58  ;;  %v218_v58 = vpop.f32.mrf.mxu0 }
 0x1cb   :  { %v2795_v32 = vsel %vm410_vm0, 0.0, %v2794_v9  ;;  %v3634_v41 = vsel %vm410_vm0, %v2794_v9, %v2775_v28  ;;  %v2741_v1 = vsel %vm410_vm0, 0.0, %v2740_v18  ;;  %v2742_v36 = vrot.slane %v2735_v27, 4 }
 0x1cc   :  { %v3638_v61 = vperm.slane %v3634_v41, %v7557_v57  ;;  %v3639_v62 = vrot.slane %v2795_v32, 4  ;;  %v3651_v59 = vsel %vm410_vm0, %v3650_v56, %v2797_v53  ;;  %v3670_v17 = vrot.slane %v3649_v37, 4 }
 0x1cd   :  { %v3655_v40 = vperm.slane %v3651_v59, %v7557_v57  ;;  %v2738_v47 = vrot.slane %v2723_v43, 4  ;;  %v2743_v11 = vsel %vm410_vm0, 0.0, %v2742_v36  ;;  %v3591_v42 = vsel %vm410_vm0, %v2742_v36, %v2731_v16 }
 0x1ce   :  { %v3640_v13 = vsel %vm410_vm0, %v3639_v62, %v2793_v10  ;;  %v3658_v28 = vrot.slane %v3638_v61, 4  ;;  %v3595_v18 = vperm.slane %v3591_v42, %v7557_v57  ;;  %v3596_v27 = vrot.slane %v2743_v11, 4  ;;  %v8362_v11 = vpop.permute.xlu2 %6916 }
 0x1cf   :  { %v3644_v9 = vperm.slane %v3640_v13, %v7557_v57  ;;  %v3668_v20 = vrot.slane %v3655_v40, 4  ;;  %v3671_v53 = vsel %vm410_vm0, %v3655_v40, %v3670_v17  ;;  %v2739_v56 = vsel %vm410_vm0, 0.0, %v2738_v47 }
 0x1d0   :  { %v3679_v43 = vperm.slane %v3671_v53, %v7614_v21  ;;  %v3580_v32 = vsel %vm410_vm0, %v2738_v47, %v2719_v33  ;;  %v3585_v41 = vrot.slane %v2739_v56, 4  ;;  %v3597_v16 = vsel %vm410_vm0, %v3596_v27, %v2741_v1 }
 0x1d1   :  { %v3656_v36 = vrot.slane %v3644_v9, 4  ;;  %v3659_v10 = vsel %vm410_vm0, %v3644_v9, %v3658_v28  ;;  %v3669_v62 = vsel %vm410_vm0, %v3668_v20, %v3649_v37  ;;  %v3584_v59 = vperm.slane %v3580_v32, %v7557_v57 }
 0x1d2   :  { %v3667_v17 = vperm.slane %v3659_v10, %v7614_v21  ;;  %v3675_v40 = vperm.slane %v3669_v62, %v7614_v21  ;;  %v3684_v42 = vrot.slane %v3679_v43, 4  ;;  %v3586_v13 = vsel %vm410_vm0, %v3585_v41, %v2737_v29 }
 0x1d3   :  { %v3657_v33 = vsel %vm410_vm0, %v3656_v36, %v3638_v61  ;;  %v3590_v1 = vperm.slane %v3586_v13, %v7557_v57  ;;  %v3601_v47 = vperm.slane %v3597_v16, %v7557_v57  ;;  %v3604_v28 = vrot.slane %v3584_v59, 4  ;;  %v220_v13 = vpop.f32.mrf.mxu0 }
 0x1d4   :  { %v3663_v37 = vperm.slane %v3657_v33, %v7614_v21  ;;  %v3680_v27 = vrot.slane %v3675_v40, 4  ;;  %v3685_v9 = vsel %vm410_vm0, %v3684_v42, %v3667_v17  ;;  %v3686_v20 = vrot.slane %v3667_v17, 4 }
 0x1d5   :  { %v4371_v53 = vpack.c.bf16 %v3685_v9, %v3685_v9  ;;  %v3602_v56 = vrot.slane %v3590_v1, 4  ;;  %v3605_v32 = vsel %vm410_vm0, %v3590_v1, %v3604_v28  ;;  %v3614_v10 = vrot.slane %v3601_v47, 4 }
 0x1d6   :  { %v3681_v29 = vsel %vm410_vm0, %v3680_v27, %v3663_v37  ;;  %v3682_v41 = vrot.slane %v3663_v37, 4  ;;  %v3687_v61 = vsel %vm410_vm0, %v3679_v43, %v3686_v20  ;;  %v3613_v36 = vperm.slane %v3605_v32, %v7614_v21  ;;  %v7165_v32 = vld [vmem:[%s11436_s2] ss:$0 sm:$0xff] }
 0x1d7   :  { %v4339_v16 = vpack.c.bf16 %v3681_v29, %v3681_v29  ;;  %v4387_v62 = vpack.c.bf16 %v3687_v61, %v3687_v61  ;;  %4435 = vst.msk [vmem:[%s11442_s8 + $0x8c] sm:$0xf] %vm2234_vm1, %v4371_v53  ;;  %v3603_v17 = vsel %vm410_vm0, %v3602_v56, %v3584_v59  ;;  %v3615_v42 = vsel %vm410_vm0, %v3614_v10, %v3595_v18 }
 0x1d8   :  { %v3683_v33 = vsel %vm410_vm0, %v3675_v40, %v3682_v41  ;;  %v3609_v1 = vperm.slane %v3603_v17, %v7614_v21  ;;  %v3616_v28 = vrot.slane %v3595_v18, 4  ;;  %v3621_v43 = vperm.slane %v3615_v42, %v7614_v21 }
 0x1d9   :  { %v6889_v37 = vunpack.i.h.bf16 %v8208_v55  ;;  %v6904_v27 = vunpack.i.h.bf16 %v8266_v3  ;;  %v4355_v9 = vpack.c.bf16 %v3683_v33, %v3683_v33  ;;  %4403 = vst.msk [vmem:[%s11442_s8 + $0xc] sm:$0xf] %vm2234_vm1, %v4339_v16  ;;  %v3632_v59 = vrot.slane %v3613_v36, 4  ;;  %v4576_v33 = vpop.f32.mrf.mxu3 }
 0x1da   :  { %4451 = vst.msk [vmem:[%s11442_s8 + $0xcc] sm:$0xf] %vm2234_vm1, %v4387_v62  ;;  %v3617_v18 = vsel %vm410_vm0, %v3601_v47, %v3616_v28  ;;  %v3626_v40 = vrot.slane %v3621_v43, 4  ;;  %v3628_v20 = vrot.slane %v3609_v1, 4  ;;  %v6893_v53 = vunpack.i.l.bf16 %v8289_v63  ;;  %v8412_v62 = vpop.permute.xlu2 %6921  ;;  %v6877_v28 = vpop.permute.xlu0 %6876 }
 0x1db   :  { %v6888_v56 = vunpack.i.l.bf16 %v8208_v55  ;;  %v219_v10 = vadd.f32 %v7165_v32, %v218_v58  ;;  %v221_v29 = vadd.f32 %v7165_v32, %v220_v13  ;;  %4419 = vst.msk [vmem:[%s11442_s8 + $0x4c] sm:$0xf] %vm2234_vm1, %v4355_v9  ;;  %v3625_v41 = vperm.slane %v3617_v18, %v7614_v21 }
 0x1dc   :  { %v4865_v47 = vrot.slane %v11455_v50, 4  ;;  %v3627_v61 = vsel %vm410_vm0, %v3626_v40, %v3609_v1  ;;  %v3629_v55 = vsel %vm410_vm0, %v3621_v43, %v3628_v20  ;;  %v4923_v16 = vrot.slane %v6894_v7, 4 }
 0x1dd   :  { %v3630_v58 = vrot.slane %v3625_v41, 4  ;;  %v3633_v17 = vsel %vm410_vm0, %v3625_v41, %v3632_v59  ;;  %v4338_v42 = vpack.c.bf16 %v3627_v61, %v3627_v61  ;;  %v4354_v13 = vpack.c.bf16 %v3629_v55, %v3629_v55 }
 0x1de   :  { %v4921_v9 = vrot.slane %v6904_v27, 4  ;;  %v11456_v18 = vunpack.i.h.bf16 %v8362_v11  ;;  %v4386_v32 = vpack.c.bf16 %v3633_v17, %v3633_v17  ;;  %v4867_v50 = vrot.slane %v6893_v53, 4 }
 0x1df   :  { %v8416_v1 = vmul.f32 0.03125, %v219_v10  ;;  %v8418_v43 = vmul.f32 0.03125, %v221_v29  ;;  %v3631_v40 = vsel %vm410_vm0, %v3630_v58, %v3613_v36  ;;  %4402 = vst.msk [vmem:[%s11442_s8 + $0x8] sm:$0xf] %vm2234_vm1, %v4338_v42  ;;  %v4866_v59 = vsel %vm410_vm0, %v4865_v47, %v6893_v53  ;;  %v6907_v58 = vpop.permute.xlu1 %6906 }
 0x1e0   :  { %v4370_v20 = vpack.c.bf16 %v3631_v40, %v3631_v40  ;;  %4418 = vst.msk [vmem:[%s11442_s8 + $0x48] sm:$0xf] %vm2234_vm1, %v4354_v13  ;;  %v4922_v10 = vsel %vm410_vm0, %v4921_v9, %v6894_v7  ;;  %v4924_v29 = vsel %vm410_vm0, %v6904_v27, %v4923_v16  ;;  %v6879_v36 = vunpack.i.h.bf16 %v6877_v28 }
 0x1e1   :  { %11517 = vst [vmem:[#allocation27_spill] sm:$0xff] %v8416_v1  ;;  %v590_v41 = vrot.slane %v6889_v37, 4  ;;  %v534_v61 = vrot.slane %v6888_v56, 4  ;;  %v6918_v55 = vunpack.i.l.bf16 %v8362_v11  ;;  %v6878_v53 = vunpack.i.l.bf16 %v6877_v28 }
 0x1e2   :  { %11518 = vst [vmem:[#allocation28_spill] sm:$0xff] %v8418_v43  ;;  %v1262_v47 = vrot.slane %v11456_v18, 4  ;;  %v11519_v63 = vunpack.i.l.bf16 %v8266_v3  ;;  %v8449_v27 = vperm.slane %v4866_v59, %v7557_v57  ;;  %v592_v16 = vrot.slane %v6879_v36, 4  ;;  %v4566_v18 = vpop.f32.mrf.mxu2 }
 0x1e3   :  { %4450 = vst.msk [vmem:[%s11442_s8 + $0xc8] sm:$0xf] %vm2234_vm1, %v4386_v32  ;;  %v8452_v17 = vperm.slane %v4922_v10, %v7557_v57  ;;  %v8455_v42 = vperm.slane %v4924_v29, %v7557_v57  ;;  %v536_v13 = vrot.slane %v6878_v53, 4  ;;  %v8459_v28 = vpack.i.bf16 %v8418_v43, %v8416_v1 }
 0x1e4   :  { %4434 = vst.msk [vmem:[%s11442_s8 + $0x88] sm:$0xf] %vm2234_vm1, %v4370_v20  ;;  %v4868_v7 = vsel %vm410_vm0, %v11519_v63, %v4867_v50  ;;  %v591_v3 = vsel %vm410_vm0, %v590_v41, %v6879_v36  ;;  %v535_v50 = vsel %vm410_vm0, %v534_v61, %v6878_v53  ;;  %v8464_v9 = vadd.f32 %v8089_v44, %v4576_v33  ;;  %v6957_v36 = vpop.permute.xlu2 %6956  ;;  %v4578_v63 = vpop.f32.mrf.mxu3 }
 0x1e5   :  { %v8467_v32 = vperm.slane %v4868_v7, %v7557_v57  ;;  %v593_v40 = vsel %vm410_vm0, %v6889_v37, %v592_v16  ;;  %7116 = vrot.lane.b32.xlu1 %v8459_v28, %s7270_s17  ;;  %v6909_v59 = vunpack.i.h.bf16 %v6907_v58  ;;  %v11461_v20 = vunpack.i.h.bf16 %v8412_v62  ;;  %7111 = vrot.lane.b32.xlu2 %v8459_v28, %s7278_s13 }
 0x1e6   :  { %v537_v29 = vsel %vm410_vm0, %v6888_v56, %v536_v13  ;;  %v6908_v33 = vunpack.i.l.bf16 %v6907_v58  ;;  %v1206_v41 = vrot.slane %v6918_v55, 4  ;;  %v8481_v61 = vperm.slane %v591_v3, %v7557_v57  ;;  %7121 = vrot.lane.b32.xlu0 %v8459_v28, %s7277_s12 }
 0x1e7   :  { %v8484_v53 = vperm.slane %v535_v50, %v7557_v57  ;;  %v601_v16 = vperm.slane %v593_v40, %v7557_v57  ;;  %v1264_v13 = vrot.slane %v6909_v59, 4  ;;  %v545_v58 = vperm.slane %v537_v29, %v7557_v57 }
 0x1e8   :  { %v1208_v37 = vrot.slane %v6908_v33, 4  ;;  %v6959_v10 = vunpack.i.h.bf16 %v6957_v36  ;;  %v8493_v3 = vrot.slane %v11461_v20, 4  ;;  %v11520_v50 = vunpack.i.l.bf16 %v8412_v62  ;;  %v6882_v20 = vpop.permute.xlu0 %6881 }
 0x1e9   :  { %v8500_v56 = vadd.f32 %v8089_v44, %v4566_v18  ;;  %v8503_v40 = vadd.f32 %v8089_v44, %v4578_v63  ;;  %v602_v8 = vrot.slane %v8481_v61, 4  ;;  %v546_v29 = vrot.slane %v8484_v53, 4 }
 0x1ea   :  { %v8497_v1 = vrot.slane %v11520_v50, 4  ;;  %v1263_v7 = vsel %vm410_vm0, %v1262_v47, %v6909_v59  ;;  %v3306_v43 = vrot.slane %v7498_v52, 4  ;;  %v614_v49 = vrot.slane %v601_v16, 4 }
 0x1eb   :  { %v1207_v54 = vsel %vm410_vm0, %v1206_v41, %v6908_v33  ;;  %v11521_v50 = vunpack.i.h.bf16 %v8362_v11  ;;  %v558_v44 = vrot.slane %v545_v58, 4  ;;  %v1209_v63 = vsel %vm410_vm0, %v6918_v55, %v1208_v37 }
 0x1ec   :  { %v3307_v31 = vsel %vm410_vm0, %v6959_v10, %v3306_v43  ;;  %v6958_v48 = vunpack.i.l.bf16 %v6957_v36  ;;  %v8517_v47 = vperm.slane %v1263_v7, %v7557_v57  ;;  %v3304_v59 = vrot.slane %v6959_v10, 4 }
 0x1ed   :  { %v1265_v18 = vsel %vm410_vm0, %v11521_v50, %v1264_v13  ;;  %v6884_v12 = vunpack.i.h.bf16 %v6882_v20  ;;  %v8521_v33 = vperm.slane %v1207_v54, %v7557_v57  ;;  %v524_v41 = vrot.slane %v7445_v23, 4 }
 0x1ee   :  { %v8524_v11 = vperm.slane %v1265_v18, %v7557_v57  ;;  %v6883_v13 = vunpack.i.l.bf16 %v6882_v20  ;;  %v8528_v55 = vperm.slane %v1209_v63, %v7557_v57  ;;  %v8531_v43 = vperm.slane %v3307_v31, %v7557_v57 }
 0x1ef   :  { %v578_v36 = vrot.slane %v6884_v12, 4  ;;  %v581_v10 = vsel %vm410_vm0, %v6884_v12, %v580_v19  ;;  %v8534_v37 = vrot.slane %v6958_v48, 4  ;;  %v8540_v18 = vsel %vm410_vm0, %v3304_v59, %v7498_v52 }
 0x1f0   :  { %v589_v54 = vperm.slane %v581_v10, %v7557_v57  ;;  %v522_v7 = vrot.slane %v6883_v13, 4  ;;  %v525_v50 = vsel %vm410_vm0, %v6883_v13, %v524_v41  ;;  %v8543_v20 = vsel %vm410_vm0, %v6958_v48, %v3250_v30 }
 0x1f1   :  { %v579_v31 = vsel %vm410_vm0, %v578_v36, %v7450_v25  ;;  %v533_v63 = vperm.slane %v525_v50, %v7557_v57  ;;  %v2802_v28 = vrot.slane %v7474_v38, 4 }
 0x1f2   :  { %v585_v19 = vperm.slane %v579_v31, %v7557_v57  ;;  %v616_v12 = vrot.slane %v589_v54, 4  ;;  %v523_v10 = vsel %vm410_vm0, %v522_v7, %v7445_v23  ;;  %v615_v41 = vsel %vm410_vm0, %v614_v49, %v589_v54 }
 0x1f3   :  { %v529_v13 = vperm.slane %v523_v10, %v7557_v57  ;;  %v559_v52 = vsel %vm410_vm0, %v558_v44, %v533_v63  ;;  %v560_v59 = vrot.slane %v533_v63, 4  ;;  %v621_v48 = vperm.slane %v615_v41, %v7614_v21 }
 0x1f4   :  { %v604_v30 = vrot.slane %v585_v19, 4  ;;  %v565_v25 = vperm.slane %v559_v52, %v7614_v21  ;;  %v603_v36 = vsel %vm410_vm0, %v602_v8, %v585_v19  ;;  %v617_v50 = vsel %vm410_vm0, %v601_v16, %v616_v12 }
 0x1f5   :  { %v547_v31 = vsel %vm410_vm0, %v546_v29, %v529_v13  ;;  %v548_v22 = vrot.slane %v529_v13, 4  ;;  %v561_v23 = vsel %vm410_vm0, %v545_v58, %v560_v59  ;;  %v609_v49 = vperm.slane %v603_v36, %v7614_v21 }
 0x1f6   :  { %v553_v54 = vperm.slane %v547_v31, %v7614_v21  ;;  %v569_v44 = vperm.slane %v561_v23, %v7614_v21  ;;  %v574_v7 = vrot.slane %v565_v25, 4  ;;  %v605_v63 = vsel %vm410_vm0, %v8481_v61, %v604_v30 }
 0x1f7   :  { %v549_v8 = vsel %vm410_vm0, %v8484_v53, %v548_v22  ;;  %v613_v16 = vperm.slane %v605_v63, %v7614_v21  ;;  %v625_v29 = vperm.slane %v617_v50, %v7614_v21  ;;  %v626_v19 = vrot.slane %v609_v49, 4 }
 0x1f8   :  { %v557_v58 = vperm.slane %v549_v8, %v7614_v21  ;;  %v570_v12 = vrot.slane %v553_v54, 4  ;;  %v575_v10 = vsel %vm410_vm0, 0.0, %v574_v7  ;;  %v576_v41 = vrot.slane %v569_v44, 4 }
 0x1f9   :  { %v627_v13 = vsel %vm410_vm0, 0.0, %v626_v19  ;;  %v628_v52 = vrot.slane %v613_v16, 4  ;;  %v630_v59 = vrot.slane %v621_v48, 4  ;;  %v632_v36 = vrot.slane %v625_v29, 4 }
 0x1fa   :  { %v571_v61 = vsel %vm410_vm0, 0.0, %v570_v12  ;;  %v572_v30 = vrot.slane %v557_v58, 4  ;;  %v577_v22 = vsel %vm410_vm0, 0.0, %v576_v41  ;;  %v1425_v53 = vsel %vm410_vm0, %v576_v41, %v565_v25 }
 0x1fb   :  { %v629_v50 = vsel %vm410_vm0, 0.0, %v628_v52  ;;  %v631_v31 = vsel %vm410_vm0, 0.0, %v630_v59  ;;  %v633_v23 = vsel %vm410_vm0, 0.0, %v632_v36  ;;  %v1429_v44 = vperm.slane %v1425_v53, %v7557_v57 }
 0x1fc   :  { %v573_v7 = vsel %vm410_vm0, 0.0, %v572_v30  ;;  %v1414_v63 = vsel %vm410_vm0, %v572_v30, %v553_v54  ;;  %v1430_v8 = vrot.slane %v577_v22, 4  ;;  %v1468_v16 = vsel %vm410_vm0, %v628_v52, %v609_v49 }
 0x1fd   :  { %v1418_v29 = vperm.slane %v1414_v63, %v7557_v57  ;;  %v1419_v19 = vrot.slane %v573_v7, 4  ;;  %v1450_v58 = vrot.slane %v1429_v44, 4  ;;  %v1472_v25 = vperm.slane %v1468_v16, %v7557_v57 }
 0x1fe   :  { %v1431_v12 = vsel %vm410_vm0, %v1430_v8, %v575_v10  ;;  %v1473_v41 = vrot.slane %v629_v50, 4  ;;  %v1479_v59 = vsel %vm410_vm0, %v632_v36, %v621_v48  ;;  %v1484_v4 = vrot.slane %v633_v23, 4 }
 0x1ff   :  { %v1420_v53 = vsel %vm410_vm0, %v1419_v19, %v571_v61  ;;  %v1435_v60 = vperm.slane %v1431_v12, %v7557_v57  ;;  %v1438_v54 = vrot.slane %v1418_v29, 4  ;;  %v1483_v30 = vperm.slane %v1479_v59, %v7557_v57 }
 0x200   :  { %v1424_v49 = vperm.slane %v1420_v53, %v7557_v57  ;;  %v1474_v52 = vsel %vm410_vm0, %v1473_v41, %v627_v13  ;;  %v1485_v22 = vsel %vm410_vm0, %v1484_v4, %v631_v31  ;;  %v1492_v7 = vrot.slane %v1472_v25, 4 }
 0x201   :  { %v1448_v63 = vrot.slane %v1435_v60, 4  ;;  %v1451_v10 = vsel %vm410_vm0, %v1435_v60, %v1450_v58  ;;  %v1478_v48 = vperm.slane %v1474_v52, %v7557_v57  ;;  %v1489_v36 = vperm.slane %v1485_v22, %v7557_v57 }
 0x202   :  { %v1436_v61 = vrot.slane %v1424_v49, 4  ;;  %v1439_v50 = vsel %vm410_vm0, %v1424_v49, %v1438_v54  ;;  %v1459_v23 = vperm.slane %v1451_v10, %v7614_v21  ;;  %v1504_v8 = vrot.slane %v1483_v30, 4 }
 0x203   :  { %v1447_v16 = vperm.slane %v1439_v50, %v7614_v21  ;;  %v1449_v13 = vsel %vm410_vm0, %v1448_v63, %v1429_v44  ;;  %v1490_v19 = vrot.slane %v1478_v48, 4  ;;  %v1493_v4 = vsel %vm410_vm0, %v1478_v48, %v1492_v7 }
 0x204   :  { %v1437_v31 = vsel %vm410_vm0, %v1436_v61, %v1418_v29  ;;  %v1455_v60 = vperm.slane %v1449_v13, %v7614_v21  ;;  %v1464_v58 = vrot.slane %v1459_v23, 4  ;;  %v1501_v12 = vperm.slane %v1493_v4, %v7614_v21 }
 0x205   :  { %v1443_v41 = vperm.slane %v1437_v31, %v7614_v21  ;;  %v1466_v59 = vrot.slane %v1447_v16, 4  ;;  %v1491_v53 = vsel %vm410_vm0, %v1490_v19, %v1472_v25  ;;  %v1502_v54 = vrot.slane %v1489_v36, 4 }
 0x206   :  { %v8607_v49 = vperm.slane %v8543_v20, %v7557_v57  ;;  %v1460_v44 = vrot.slane %v1455_v60, 4  ;;  %v1497_v52 = vperm.slane %v1491_v53, %v7614_v21  ;;  %v1505_v29 = vsel %vm410_vm0, %v1489_v36, %v1504_v8 }
 0x207   :  { %v1462_v22 = vrot.slane %v1443_v41, 4  ;;  %v1465_v7 = vsel %vm410_vm0, %v1464_v58, %v1447_v16  ;;  %v1503_v63 = vsel %vm410_vm0, %v1502_v54, %v1483_v30  ;;  %v1513_v10 = vperm.slane %v1505_v29, %v7614_v21 }
 0x208   :  { %v1461_v48 = vsel %vm410_vm0, %v1460_v44, %v1443_v41  ;;  %v1509_v25 = vperm.slane %v1503_v63, %v7614_v21  ;;  %v1516_v61 = vrot.slane %v1497_v52, 4  ;;  %v1520_v50 = vrot.slane %v1501_v12, 4 }
 0x209   :  { %v1463_v20 = vsel %vm410_vm0, %v1455_v60, %v1462_v22  ;;  %v1467_v13 = vsel %vm410_vm0, %v1459_v23, %v1466_v59  ;;  %v1518_v19 = vrot.slane %v1513_v10, 4  ;;  %v2172_v4 = vpack.c.bf16 %v1461_v48, %v1461_v48  ;;  %v6897_v23 = vpop.permute.xlu0 %6896 }
 0x20a   :  { %v1514_v36 = vrot.slane %v1509_v25, 4  ;;  %v1517_v8 = vsel %vm410_vm0, %v1509_v25, %v1516_v61  ;;  %v2188_v16 = vpack.c.bf16 %v1463_v20, %v1463_v20  ;;  %v2204_v31 = vpack.c.bf16 %v1465_v7, %v1465_v7  ;;  %v4568_v25 = vpop.f32.mrf.mxu2  ;;  %v8675_v20 = vpop.permute.xlu2 %6966 }
 0x20b   :  { %v3249_v30 = vsel %vm410_vm0, %v8534_v37, %v7493_v51  ;;  %v1519_v58 = vsel %vm410_vm0, %v1518_v19, %v1501_v12  ;;  %v1521_v41 = vsel %vm410_vm0, %v1513_v10, %v1520_v50  ;;  %v2189_v53 = vpack.c.bf16 %v1517_v8, %v1517_v8  ;;  %2237 = vst.msk [vmem:[%s11441_s7 + $0x8] sm:$0xf] %vm2234_vm1, %v2172_v4 }
 0x20c   :  { %v8630_v60 = vperm.slane %v8540_v18, %v7557_v57  ;;  %v1515_v59 = vsel %vm410_vm0, %v1514_v36, %v1497_v52  ;;  %v2205_v54 = vpack.c.bf16 %v1519_v58, %v1519_v58  ;;  %2253 = vst.msk [vmem:[%s11441_s7 + $0x48] sm:$0xf] %vm2234_vm1, %v2188_v16  ;;  %v8639_v51 = vpack.i.bf16 %v8503_v40, %v8464_v9  ;;  %v8645_v18 = vpop.permute.xlu1 %6926 }
 0x20d   :  { %v2173_v37 = vpack.c.bf16 %v1515_v59, %v1515_v59  ;;  %v2220_v12 = vpack.c.bf16 %v1467_v13, %v1467_v13  ;;  %2254 = vst.msk [vmem:[%s11441_s7 + $0x4c] sm:$0xf] %vm2234_vm1, %v2189_v53  ;;  %v8649_v52 = vperm.slane %v3249_v30, %v7557_v57  ;;  %v2221_v29 = vpack.c.bf16 %v1521_v41, %v1521_v41 }
 0x20e   :  { %2269 = vst.msk [vmem:[%s11441_s7 + $0x88] sm:$0xf] %vm2234_vm1, %v2204_v31  ;;  %7131 = vrot.lane.b32.xlu1 %v8639_v51, %s7278_s13  ;;  %v6899_v22 = vunpack.i.h.bf16 %v6897_v23  ;;  %v1286_v10 = vrot.slane %v8524_v11, 4  ;;  %v6929_v50 = vunpack.i.h.bf16 %v8645_v18  ;;  %v4911_v13 = vrot.slane %v7453_v26, 4  ;;  %v7166_v31 = vld [vmem:[%s11440_s6] ss:$0 sm:$0xff]  ;;  %7141 = vrot.lane.b32.xlu0 %v8639_v51, %s7270_s17 }
 0x20f   :  { %2238 = vst.msk [vmem:[%s11441_s7 + $0xc] sm:$0xf] %vm2234_vm1, %v2173_v37  ;;  %v6898_v19 = vunpack.i.l.bf16 %v6897_v23  ;;  %v2858_v36 = vrot.slane %v7477_v39, 4  ;;  %v8693_v30 = vadd.f32 %v7166_v31, %v4568_v25  ;;  %v4855_v58 = vrot.slane %v7448_v24, 4 }
 0x210   :  { %2270 = vst.msk [vmem:[%s11441_s7 + $0x8c] sm:$0xf] %vm2234_vm1, %v2205_v54  ;;  %v4909_v8 = vrot.slane %v6899_v22, 4  ;;  %v4912_v41 = vsel %vm410_vm0, %v6899_v22, %v4911_v13  ;;  %v6928_v53 = vunpack.i.l.bf16 %v8645_v18  ;;  %v6969_v23 = vunpack.i.h.bf16 %v8675_v20 }
 0x211   :  { %2285 = vst.msk [vmem:[%s11441_s7 + $0xc8] sm:$0xf] %vm2234_vm1, %v2220_v12  ;;  %v4920_v54 = vperm.slane %v4912_v41, %v7557_v57  ;;  %v8702_v37 = vrot.slane %v6929_v50, 4  ;;  %v4856_v25 = vsel %vm410_vm0, %v6898_v19, %v4855_v58  ;;  %v8707_v31 = vsel %vm410_vm0, %v6929_v50, %v2858_v36 }
 0x212   :  { %2286 = vst.msk [vmem:[%s11441_s7 + $0xcc] sm:$0xf] %vm2234_vm1, %v2221_v29  ;;  %v4910_v59 = vsel %vm410_vm0, %v4909_v8, %v7453_v26  ;;  %v4853_v29 = vrot.slane %v6898_v19, 4  ;;  %v11522_v22 = vrot.slane %v8455_v42, 4  ;;  %v4864_v16 = vperm.slane %v4856_v25, %v7557_v57 }
 0x213   :  { %v4916_v12 = vperm.slane %v4910_v59, %v7557_v57  ;;  %v4947_v61 = vrot.slane %v4920_v54, 4  ;;  %v11523_v26 = vrot.slane %v8452_v17, 4 }
 0x214   :  { %v4946_v13 = vsel %vm410_vm0, %v11522_v22, %v4920_v54  ;;  %v4854_v19 = vsel %vm410_vm0, %v4853_v29, %v7448_v24  ;;  %v11524_v54 = vrot.slane %v8467_v32, 4 }
 0x215   :  { %v4934_v8 = vsel %vm410_vm0, %v11523_v26, %v4916_v12  ;;  %v4935_v41 = vrot.slane %v4916_v12, 4  ;;  %v4952_v59 = vperm.slane %v4946_v13, %v7614_v21  ;;  %v4948_v36 = vsel %vm410_vm0, %v8455_v42, %v4947_v61 }
 0x216   :  { %v4940_v50 = vperm.slane %v4934_v8, %v7614_v21  ;;  %v4860_v58 = vperm.slane %v4854_v19, %v7557_v57  ;;  %v4890_v25 = vsel %vm410_vm0, %v11524_v54, %v4864_v16  ;;  %v4956_v12 = vperm.slane %v4948_v36, %v7614_v21 }
 0x217   :  { %v4936_v22 = vsel %vm410_vm0, %v8452_v17, %v4935_v41  ;;  %v4961_v13 = vrot.slane %v4952_v59, 4  ;;  %v4891_v26 = vrot.slane %v4864_v16, 4  ;;  %v11525_v8 = vrot.slane %v8449_v27, 4 }
 0x218   :  { %v4944_v24 = vperm.slane %v4936_v22, %v7614_v21  ;;  %v4957_v29 = vrot.slane %v4940_v50, 4  ;;  %v4879_v61 = vrot.slane %v4860_v58, 4  ;;  %v4963_v48 = vrot.slane %v4956_v12, 4 }
 0x219   :  { %v4878_v42 = vsel %vm410_vm0, %v11525_v8, %v4860_v58  ;;  %v4962_v19 = vsel %vm410_vm0, 0.0, %v4961_v13  ;;  %v4892_v17 = vsel %vm410_vm0, %v8467_v32, %v4891_v26  ;;  %v4896_v22 = vperm.slane %v4890_v25, %v7614_v21 }
 0x21a   :  { %v4884_v54 = vperm.slane %v4878_v42, %v7614_v21  ;;  %v4958_v41 = vsel %vm410_vm0, 0.0, %v4957_v29  ;;  %v4959_v36 = vrot.slane %v4944_v24, 4  ;;  %v4880_v16 = vsel %vm410_vm0, %v8449_v27, %v4879_v61 }
 0x21b   :  { %v4964_v4 = vsel %vm410_vm0, 0.0, %v4963_v48  ;;  %v5810_v58 = vsel %vm410_vm0, %v4963_v48, %v4952_v59  ;;  %v4888_v13 = vperm.slane %v4880_v16, %v7614_v21  ;;  %v4900_v12 = vperm.slane %v4892_v17, %v7614_v21 }
 0x21c   :  { %v4960_v8 = vsel %vm410_vm0, 0.0, %v4959_v36  ;;  %v5799_v32 = vsel %vm410_vm0, %v4959_v36, %v4940_v50  ;;  %v5814_v26 = vperm.slane %v5810_v58, %v7557_v57  ;;  %v5815_v24 = vrot.slane %v4964_v4, 4 }
 0x21d   :  { %v5803_v29 = vperm.slane %v5799_v32, %v7557_v57  ;;  %v5804_v27 = vrot.slane %v4960_v8, 4  ;;  %v4901_v42 = vrot.slane %v4884_v54, 4  ;;  %v4903_v25 = vrot.slane %v4888_v13, 4 }
 0x21e   :  { %v5816_v61 = vsel %vm410_vm0, %v5815_v24, %v4962_v19  ;;  %v5835_v7 = vrot.slane %v5814_v26, 4  ;;  %v4905_v48 = vrot.slane %v4896_v22, 4  ;;  %v4907_v59 = vrot.slane %v4900_v12, 4 }
 0x21f   :  { %v5805_v16 = vsel %vm410_vm0, %v5804_v27, %v4958_v41  ;;  %v5820_v17 = vperm.slane %v5816_v61, %v7557_v57  ;;  %v5823_v44 = vrot.slane %v5803_v29, 4  ;;  %v4902_v50 = vsel %vm410_vm0, 0.0, %v4901_v42 }
 0x220   :  { %v5809_v36 = vperm.slane %v5805_v16, %v7557_v57  ;;  %v4904_v4 = vsel %vm410_vm0, 0.0, %v4903_v25  ;;  %v4906_v58 = vsel %vm410_vm0, 0.0, %v4905_v48  ;;  %v4908_v13 = vsel %vm410_vm0, 0.0, %v4907_v59 }
 0x221   :  { %v5833_v8 = vrot.slane %v5820_v17, 4  ;;  %v5836_v19 = vsel %vm410_vm0, %v5820_v17, %v5835_v7  ;;  %v5745_v12 = vsel %vm410_vm0, %v4903_v25, %v4884_v54  ;;  %v5750_v32 = vrot.slane %v4904_v4, 4 }
 0x222   :  { %v5821_v41 = vrot.slane %v5809_v36, 4  ;;  %v5824_v24 = vsel %vm410_vm0, %v5809_v36, %v5823_v44  ;;  %v5844_v27 = vperm.slane %v5836_v19, %v7614_v21  ;;  %v5749_v42 = vperm.slane %v5745_v12, %v7557_v57 }
 0x223   :  { %v5832_v61 = vperm.slane %v5824_v24, %v7614_v21  ;;  %v5834_v16 = vsel %vm410_vm0, %v5833_v8, %v5814_v26  ;;  %v5751_v48 = vsel %vm410_vm0, %v5750_v32, %v4902_v50  ;;  %v5756_v63 = vsel %vm410_vm0, %v4907_v59, %v4896_v22 }
 0x224   :  { %v5822_v7 = vsel %vm410_vm0, %v5821_v41, %v5803_v29  ;;  %v5840_v54 = vperm.slane %v5834_v16, %v7614_v21  ;;  %v5849_v25 = vrot.slane %v5844_v27, 4  ;;  %v5755_v17 = vperm.slane %v5751_v48, %v7557_v57 }
 0x225   :  { %v5828_v44 = vperm.slane %v5822_v7, %v7614_v21  ;;  %v5851_v36 = vrot.slane %v5832_v61, 4  ;;  %v5760_v4 = vperm.slane %v5756_v63, %v7557_v57  ;;  %v5761_v19 = vrot.slane %v4908_v13, 4 }
 0x226   :  { %v5845_v12 = vrot.slane %v5840_v54, 4  ;;  %v5850_v26 = vsel %vm410_vm0, %v5849_v25, %v5832_v61  ;;  %v5767_v8 = vrot.slane %v5755_v17, 4  ;;  %v5769_v50 = vrot.slane %v5749_v42, 4 }
 0x227   :  { %v5847_v32 = vrot.slane %v5828_v44, 4  ;;  %v5852_v22 = vsel %vm410_vm0, %v5844_v27, %v5851_v36  ;;  %v6536_v29 = vpack.c.bf16 %v5850_v26, %v5850_v26  ;;  %v5762_v59 = vsel %vm410_vm0, %v5761_v19, %v4906_v58  ;;  %v6987_v36 = vpop.permute.xlu2 %6986 }
 0x228   :  { %v5846_v41 = vsel %vm410_vm0, %v5845_v12, %v5828_v44  ;;  %v6552_v24 = vpack.c.bf16 %v5852_v22, %v5852_v22  ;;  %v5766_v16 = vperm.slane %v5762_v59, %v7557_v57  ;;  %v5768_v48 = vsel %vm410_vm0, %v5767_v8, %v5749_v42 }
 0x229   :  { %v5848_v63 = vsel %vm410_vm0, %v5840_v54, %v5847_v32  ;;  %v6504_v13 = vpack.c.bf16 %v5846_v41, %v5846_v41  ;;  %6600 = vst.msk [vmem:[%s11443_s9 + $0x8c] sm:$0xf] %vm2234_vm1, %v6536_v29  ;;  %v5770_v27 = vsel %vm410_vm0, %v5755_v17, %v5769_v50  ;;  %v5774_v61 = vperm.slane %v5768_v48, %v7614_v21 }
 0x22a   :  { %v6520_v58 = vpack.c.bf16 %v5848_v63, %v5848_v63  ;;  %6616 = vst.msk [vmem:[%s11443_s9 + $0xcc] sm:$0xf] %vm2234_vm1, %v6552_v24  ;;  %v5778_v42 = vperm.slane %v5770_v27, %v7614_v21  ;;  %v5779_v7 = vrot.slane %v5766_v16, 4  ;;  %v5781_v54 = vrot.slane %v5760_v4, 4 }
 0x22b   :  { %v6968_v25 = vunpack.i.l.bf16 %v8675_v20  ;;  %6568 = vst.msk [vmem:[%s11443_s9 + $0xc] sm:$0xf] %vm2234_vm1, %v6504_v13  ;;  %v5793_v17 = vrot.slane %v5774_v61, 4  ;;  %v8796_v44 = vpack.i.bf16 %v8693_v30, %v8500_v56  ;;  %v8806_v8 = vperm.slane %v8707_v31, %v7557_v57 }
 0x22c   :  { %6584 = vst.msk [vmem:[%s11443_s9 + $0x4c] sm:$0xf] %vm2234_vm1, %v6520_v58  ;;  %v5780_v19 = vsel %vm410_vm0, %v5779_v7, %v5760_v4  ;;  %v5782_v12 = vsel %vm410_vm0, %v5766_v16, %v5781_v54  ;;  %v5797_v26 = vrot.slane %v5778_v42, 4  ;;  %v2914_v22 = vrot.slane %v7515_v5, 4  ;;  %v6912_v58 = vpop.permute.xlu0 %6911 }
 0x22d   :  { %v5786_v50 = vperm.slane %v5780_v19, %v7614_v21  ;;  %v5790_v32 = vperm.slane %v5782_v12, %v7614_v21  ;;  %7136 = vrot.lane.b32.xlu1 %v8796_v44, %s7270_s17  ;;  %7126 = vrot.lane.b32.xlu2 %v8796_v44, %s7278_s13  ;;  %v2857_v4 = vsel %vm410_vm0, %v8702_v37, %v7477_v39  ;;  %v2800_v31 = vrot.slane %v6928_v53, 4 }
 0x22e   :  { %v2803_v29 = vsel %vm410_vm0, %v6928_v53, %v2802_v28  ;;  %v6989_v59 = vunpack.i.h.bf16 %v6987_v36  ;;  %v6988_v13 = vunpack.i.l.bf16 %v6987_v36  ;;  %v8831_v27 = vrot.slane %v6969_v23, 4  ;;  %v8845_v36 = vpop.permute.xlu1 %6936  ;;  %7146 = vrot.lane.b32.xlu0 %v8796_v44, %s7277_s12 }
 0x22f   :  { %v5791_v41 = vrot.slane %v5786_v50, 4  ;;  %v5794_v24 = vsel %vm410_vm0, %v5786_v50, %v5793_v17  ;;  %v5795_v16 = vrot.slane %v5790_v32, 4  ;;  %v5798_v48 = vsel %vm410_vm0, %v5790_v32, %v5797_v26 }
 0x230   :  { %v6519_v39 = vpack.c.bf16 %v5794_v24, %v5794_v24  ;;  %v6551_v37 = vpack.c.bf16 %v5798_v48, %v5798_v48  ;;  %v2968_v63 = vrot.slane %v6989_v59, 4  ;;  %v2970_v53 = vrot.slane %v7520_v6, 4 }
 0x231   :  { %v5792_v18 = vsel %vm410_vm0, %v5791_v41, %v5774_v61  ;;  %v5796_v28 = vsel %vm410_vm0, %v5795_v16, %v5778_v42  ;;  %v2801_v7 = vsel %vm410_vm0, %v2800_v31, %v7474_v38  ;;  %v8839_v54 = vperm.slane %v2803_v29, %v7557_v57 }
 0x232   :  { %v6503_v17 = vpack.c.bf16 %v5792_v18, %v5792_v18  ;;  %v6535_v19 = vpack.c.bf16 %v5796_v28, %v5796_v28  ;;  %6583 = vst.msk [vmem:[%s11443_s9 + $0x48] sm:$0xf] %vm2234_vm1, %v6519_v39  ;;  %v8848_v61 = vperm.slane %v2857_v4, %v7557_v57  ;;  %v2894_v42 = vrot.slane %v8806_v8, 4 }
 0x233   :  { %v8853_v38 = vrot.slane %v6968_v25, 4  ;;  %6615 = vst.msk [vmem:[%s11443_s9 + $0xc8] sm:$0xf] %vm2234_vm1, %v6551_v37  ;;  %v2971_v12 = vsel %vm410_vm0, %v6989_v59, %v2970_v53  ;;  %v2969_v26 = vsel %vm410_vm0, %v2968_v63, %v7520_v6  ;;  %v2912_v50 = vrot.slane %v6988_v13, 4 }
 0x234   :  { %6567 = vst.msk [vmem:[%s11443_s9 + $0x8] sm:$0xf] %vm2234_vm1, %v6503_v17  ;;  %v1252_v32 = vrot.slane %v7466_v35, 4  ;;  %v6914_v4 = vunpack.i.h.bf16 %v6912_v58  ;;  %v8868_v31 = vperm.slane %v2801_v7, %v7557_v57  ;;  %v6939_v29 = vunpack.i.h.bf16 %v8845_v36 }
 0x235   :  { %6599 = vst.msk [vmem:[%s11443_s9 + $0x88] sm:$0xf] %vm2234_vm1, %v6535_v19  ;;  %v1196_v59 = vrot.slane %v7464_v34, 4  ;;  %v6913_v41 = vunpack.i.l.bf16 %v6912_v58  ;;  %v6938_v24 = vunpack.i.l.bf16 %v8845_v36  ;;  %v8878_v6 = vperm.slane %v2971_v12, %v7557_v57  ;;  %7151 = vrot.lane.b32.xlu1 %v8151_v2, %s7277_s12  ;;  %7156 = vrot.lane.b32.xlu2 %v8639_v51, %s7277_s12 }
 0x236   :  { %v1250_v16 = vrot.slane %v6914_v4, 4  ;;  %v1253_v48 = vsel %vm410_vm0, %v6914_v4, %v1252_v32  ;;  %v8882_v39 = vperm.slane %v2969_v26, %v7557_v57  ;;  %v8888_v28 = vsel %vm410_vm0, %v2912_v50, %v7515_v5 }
 0x237   :  { %v1261_v37 = vperm.slane %v1253_v48, %v7557_v57  ;;  %v1194_v63 = vrot.slane %v6913_v41, 4  ;;  %v1197_v18 = vsel %vm410_vm0, %v6913_v41, %v1196_v59  ;;  %v8891_v53 = vsel %vm410_vm0, %v6988_v13, %v2914_v22 }
 0x238   :  { %v1251_v58 = vsel %vm410_vm0, %v1250_v16, %v7466_v35  ;;  %v1205_v7 = vperm.slane %v1197_v18, %v7557_v57  ;;  %v11526_v13 = vrot.slane %v8528_v55, 4  ;;  %v11527_v32 = vrot.slane %v8517_v47, 4 }
 0x239   :  { %v1257_v17 = vperm.slane %v1251_v58, %v7557_v57  ;;  %v1287_v19 = vsel %vm410_vm0, %v1286_v10, %v1261_v37  ;;  %v1288_v12 = vrot.slane %v1261_v37, 4  ;;  %v1195_v26 = vsel %vm410_vm0, %v1194_v63, %v7464_v34 }
 0x23a   :  { %v1293_v5 = vperm.slane %v1287_v19, %v7614_v21  ;;  %v1201_v22 = vperm.slane %v1195_v26, %v7557_v57  ;;  %v1231_v35 = vsel %vm410_vm0, %v11526_v13, %v1205_v7  ;;  %v1232_v50 = vrot.slane %v1205_v7, 4 }
 0x23b   :  { %v1275_v4 = vsel %vm410_vm0, %v11527_v32, %v1257_v17  ;;  %v1276_v59 = vrot.slane %v1257_v17, 4  ;;  %v1289_v10 = vsel %vm410_vm0, %v8524_v11, %v1288_v12  ;;  %v1237_v41 = vperm.slane %v1231_v35, %v7614_v21 }
 0x23c   :  { %v1281_v34 = vperm.slane %v1275_v4, %v7614_v21  ;;  %v1297_v16 = vperm.slane %v1289_v10, %v7614_v21  ;;  %v1302_v48 = vrot.slane %v1293_v5, 4  ;;  %v11528_v37 = vrot.slane %v8521_v33, 4 }
 0x23d   :  { %v1277_v18 = vsel %vm410_vm0, %v8517_v47, %v1276_v59  ;;  %v1220_v58 = vrot.slane %v1201_v22, 4  ;;  %v1233_v11 = vsel %vm410_vm0, %v8528_v55, %v1232_v50  ;;  %v1246_v4 = vrot.slane %v1237_v41, 4 }
 0x23e   :  { %v1219_v63 = vsel %vm410_vm0, %v11528_v37, %v1201_v22  ;;  %v1285_v17 = vperm.slane %v1277_v18, %v7614_v21  ;;  %v1298_v19 = vrot.slane %v1281_v34, 4  ;;  %v1303_v12 = vsel %vm410_vm0, 0.0, %v1302_v48 }
 0x23f   :  { %v1225_v7 = vperm.slane %v1219_v63, %v7614_v21  ;;  %v1304_v26 = vrot.slane %v1297_v16, 4  ;;  %v1221_v13 = vsel %vm410_vm0, %v8521_v33, %v1220_v58  ;;  %v1241_v35 = vperm.slane %v1233_v11, %v7614_v21 }
 0x240   :  { %v1299_v47 = vsel %vm410_vm0, 0.0, %v1298_v19  ;;  %v1300_v22 = vrot.slane %v1285_v17, 4  ;;  %v1229_v48 = vperm.slane %v1221_v13, %v7614_v21  ;;  %v1247_v63 = vsel %vm410_vm0, 0.0, %v1246_v4 }
 0x241   :  { %v1242_v32 = vrot.slane %v1225_v7, 4  ;;  %v1305_v59 = vsel %vm410_vm0, 0.0, %v1304_v26  ;;  %v2127_v55 = vsel %vm410_vm0, %v1304_v26, %v1293_v5  ;;  %v1248_v18 = vrot.slane %v1241_v35, 4 }
 0x242   :  { %v2131_v50 = vperm.slane %v2127_v55, %v7557_v57  ;;  %v2132_v10 = vrot.slane %v1305_v59, 4  ;;  %v1301_v33 = vsel %vm410_vm0, 0.0, %v1300_v22  ;;  %v2116_v37 = vsel %vm410_vm0, %v1300_v22, %v1281_v34 }
 0x243   :  { %v1243_v16 = vsel %vm410_vm0, 0.0, %v1242_v32  ;;  %v2120_v58 = vperm.slane %v2116_v37, %v7557_v57  ;;  %v2121_v11 = vrot.slane %v1301_v33, 4  ;;  %v1244_v26 = vrot.slane %v1229_v48, 4 }
 0x244   :  { %v2133_v17 = vsel %vm410_vm0, %v2132_v10, %v1303_v12  ;;  %v2152_v5 = vrot.slane %v2131_v50, 4  ;;  %v1249_v13 = vsel %vm410_vm0, 0.0, %v1248_v18  ;;  %v2073_v32 = vsel %vm410_vm0, %v1248_v18, %v1237_v41 }
 0x245   :  { %v2137_v19 = vperm.slane %v2133_v17, %v7557_v57  ;;  %v2122_v59 = vsel %vm410_vm0, %v2121_v11, %v1299_v47  ;;  %v2140_v55 = vrot.slane %v2120_v58, 4  ;;  %v2077_v34 = vperm.slane %v2073_v32, %v7557_v57 }
 0x246   :  { %v2078_v4 = vrot.slane %v1249_v13, 4  ;;  %v2126_v35 = vperm.slane %v2122_v59, %v7557_v57  ;;  %v1245_v12 = vsel %vm410_vm0, 0.0, %v1244_v26  ;;  %v2062_v48 = vsel %vm410_vm0, %v1244_v26, %v1225_v7 }
 0x247   :  { %v2150_v22 = vrot.slane %v2137_v19, 4  ;;  %v2153_v33 = vsel %vm410_vm0, %v2137_v19, %v2152_v5  ;;  %v2067_v37 = vrot.slane %v1245_v12, 4  ;;  %v2066_v17 = vperm.slane %v2062_v48, %v7557_v57 }
 0x248   :  { %v2161_v10 = vperm.slane %v2153_v33, %v7614_v21  ;;  %v2079_v41 = vsel %vm410_vm0, %v2078_v4, %v1247_v63  ;;  %v2138_v18 = vrot.slane %v2126_v35, 4  ;;  %v2141_v47 = vsel %vm410_vm0, %v2126_v35, %v2140_v55 }
 0x249   :  { %v2151_v11 = vsel %vm410_vm0, %v2150_v22, %v2131_v50  ;;  %v2149_v13 = vperm.slane %v2141_v47, %v7614_v21  ;;  %v2068_v32 = vsel %vm410_vm0, %v2067_v37, %v1243_v16  ;;  %v2083_v63 = vperm.slane %v2079_v41, %v7557_v57 }
 0x24a   :  { %v2157_v5 = vperm.slane %v2151_v11, %v7614_v21  ;;  %v2166_v19 = vrot.slane %v2161_v10, 4  ;;  %v2139_v59 = vsel %vm410_vm0, %v2138_v18, %v2120_v58  ;;  %v2072_v7 = vperm.slane %v2068_v32, %v7557_v57 }
 0x24b   :  { %v2086_v26 = vrot.slane %v2066_v17, 4  ;;  %v2145_v55 = vperm.slane %v2139_v59, %v7614_v21  ;;  %v2168_v35 = vrot.slane %v2149_v13, 4  ;;  %v2096_v48 = vrot.slane %v2083_v63, 4 }
 0x24c   :  { %v2162_v4 = vrot.slane %v2157_v5, 4  ;;  %v2167_v50 = vsel %vm410_vm0, %v2166_v19, %v2149_v13  ;;  %v2084_v33 = vrot.slane %v2072_v7, 4  ;;  %v2098_v59 = vrot.slane %v2077_v34, 4 }
 0x24d   :  { %v2217_v22 = vpack.c.bf16 %v2167_v50, %v2167_v50  ;;  %v2087_v12 = vsel %vm410_vm0, %v2072_v7, %v2086_v26  ;;  %v2164_v37 = vrot.slane %v2145_v55, 4  ;;  %v2169_v58 = vsel %vm410_vm0, %v2161_v10, %v2168_v35  ;;  %v6942_v7 = vpop.permute.xlu1 %6941 }
 0x24e   :  { %v2163_v16 = vsel %vm410_vm0, %v2162_v4, %v2145_v55  ;;  %v2095_v18 = vperm.slane %v2087_v12, %v7614_v21  ;;  %v2233_v47 = vpack.c.bf16 %v2169_v58, %v2169_v58  ;;  %v2085_v11 = vsel %vm410_vm0, %v2084_v33, %v2066_v17  ;;  %v8978_v4 = vpop.permute.xlu2 %7001 }
 0x24f   :  { %v2185_v41 = vpack.c.bf16 %v2163_v16, %v2163_v16  ;;  %2282 = vst.msk [vmem:[%s11441_s7 + $0xbc] sm:$0xf] %vm2234_vm1, %v2217_v22  ;;  %v2097_v13 = vsel %vm410_vm0, %v2096_v48, %v2077_v34  ;;  %v2165_v19 = vsel %vm410_vm0, %v2157_v5, %v2164_v37  ;;  %v2091_v32 = vperm.slane %v2085_v11, %v7614_v21 }
 0x250   :  { %v2103_v10 = vperm.slane %v2097_v13, %v7614_v21  ;;  %v2201_v26 = vpack.c.bf16 %v2165_v19, %v2165_v19  ;;  %v2114_v55 = vrot.slane %v2095_v18, 4  ;;  %2298 = vst.msk [vmem:[%s11441_s7 + $0xfc] sm:$0xf] %vm2234_vm1, %v2233_v47  ;;  %v2099_v17 = vsel %vm410_vm0, %v2083_v63, %v2098_v59 }
 0x251   :  { %2250 = vst.msk [vmem:[%s11441_s7 + $0x3c] sm:$0xf] %vm2234_vm1, %v2185_v41  ;;  %v2110_v5 = vrot.slane %v2091_v32, 4  ;;  %v2107_v50 = vperm.slane %v2099_v17, %v7614_v21  ;;  %v636_v35 = vrot.slane %v7486_v45, 4  ;;  %v6944_v22 = vunpack.i.h.bf16 %v6942_v7 }
 0x252   :  { %v2108_v34 = vrot.slane %v2103_v10, 4  ;;  %2266 = vst.msk [vmem:[%s11441_s7 + $0x7c] sm:$0xf] %vm2234_vm1, %v2201_v26  ;;  %v6943_v33 = vunpack.i.l.bf16 %v6942_v7  ;;  %v692_v48 = vrot.slane %v7488_v46, 4  ;;  %v7004_v16 = vunpack.i.h.bf16 %v8978_v4 }
 0x253   :  { %v2111_v12 = vsel %vm410_vm0, %v2103_v10, %v2110_v5  ;;  %v2112_v37 = vrot.slane %v2107_v50, 4  ;;  %v2115_v2 = vsel %vm410_vm0, %v2107_v50, %v2114_v55  ;;  %v690_v47 = vrot.slane %v6944_v22, 4 }
 0x254   :  { %v2109_v63 = vsel %vm410_vm0, %v2108_v34, %v2091_v32  ;;  %v2200_v51 = vpack.c.bf16 %v2111_v12, %v2111_v12  ;;  %v2232_v41 = vpack.c.bf16 %v2115_v2, %v2115_v2  ;;  %v693_v11 = vsel %vm410_vm0, %v6944_v22, %v692_v48 }
 0x255   :  { %v2184_v58 = vpack.c.bf16 %v2109_v63, %v2109_v63  ;;  %v634_v13 = vrot.slane %v6943_v33, 4  ;;  %v2838_v19 = vrot.slane %v8839_v54, 4  ;;  %v9006_v32 = vperm.slane %v8888_v28, %v7557_v57 }
 0x256   :  { %v9010_v44 = vperm.slane %v8891_v53, %v7557_v57  ;;  %v2113_v59 = vsel %vm410_vm0, %v2112_v37, %v2095_v18  ;;  %v2882_v10 = vrot.slane %v8848_v61, 4  ;;  %v2826_v7 = vrot.slane %v8868_v31, 4  ;;  %2265 = vst.msk [vmem:[%s11441_s7 + $0x78] sm:$0xf] %vm2234_vm1, %v2200_v51  ;;  %v6932_v53 = vpop.permute.xlu0 %6931 }
 0x257   :  { %2249 = vst.msk [vmem:[%s11441_s7 + $0x38] sm:$0xf] %vm2234_vm1, %v2184_v58  ;;  %v2216_v26 = vpack.c.bf16 %v2113_v59, %v2113_v59  ;;  %v637_v28 = vsel %vm410_vm0, %v6943_v33, %v636_v35  ;;  %v9026_v18 = vrot.slane %v6939_v29, 4  ;;  %v9030_v55 = vrot.slane %v6938_v24, 4 }
 0x258   :  { %2297 = vst.msk [vmem:[%s11441_s7 + $0xf8] sm:$0xf] %vm2234_vm1, %v2232_v41  ;;  %v691_v17 = vsel %vm410_vm0, %v690_v47, %v7488_v46  ;;  %v9039_v34 = vperm.slane %v693_v11, %v7557_v57  ;;  %v635_v35 = vsel %vm410_vm0, %v634_v13, %v7486_v45  ;;  %v802_v22 = vrot.slane %v7004_v16, 4 }
 0x259   :  { %2281 = vst.msk [vmem:[%s11441_s7 + $0xb8] sm:$0xf] %vm2234_vm1, %v2216_v26  ;;  %v9052_v63 = vperm.slane %v637_v28, %v7557_v57  ;;  %v6934_v12 = vunpack.i.h.bf16 %v6932_v53  ;;  %v9055_v48 = vperm.slane %v691_v17, %v7557_v57  ;;  %v748_v37 = vrot.slane %v7527_v14, 4 }
 0x25a   :  { %v804_v2 = vrot.slane %v7531_v15, 4  ;;  %v6933_v58 = vunpack.i.l.bf16 %v6932_v53  ;;  %v728_v51 = vrot.slane %v9039_v34, 4  ;;  %v9061_v45 = vperm.slane %v635_v35, %v7557_v57 }
 0x25b   :  { %v2868_v41 = vrot.slane %v6934_v12, 4  ;;  %v2871_v47 = vsel %vm410_vm0, %v6934_v12, %v8493_v3  ;;  %v803_v11 = vsel %vm410_vm0, %v802_v22, %v7531_v15  ;;  %v672_v28 = vrot.slane %v9052_v63, 4 }
 0x25c   :  { %v2879_v13 = vperm.slane %v2871_v47, %v7557_v57  ;;  %v2812_v59 = vrot.slane %v6933_v58, 4  ;;  %v2815_v26 = vsel %vm410_vm0, %v6933_v58, %v8497_v1  ;;  %v9072_v53 = vsel %vm410_vm0, %v7004_v16, %v804_v2 }
 0x25d   :  { %v11529_v17 = vunpack.i.h.bf16 %v8412_v62  ;;  %v2823_v3 = vperm.slane %v2815_v26, %v7557_v57  ;;  %v11530_v1 = vunpack.i.l.bf16 %v8412_v62  ;;  %v9086_v16 = vperm.slane %v803_v11, %v7557_v57 }
 0x25e   :  { %v2892_v15 = vrot.slane %v2879_v13, 4  ;;  %v2895_v22 = vsel %vm410_vm0, %v2879_v13, %v2894_v42 }
 0x25f   :  { %v2869_v35 = vsel %vm410_vm0, %v2868_v41, %v11529_v17  ;;  %v2813_v58 = vsel %vm410_vm0, %v2812_v59, %v11530_v1  ;;  %v2903_v2 = vperm.slane %v2895_v22, %v7614_v21  ;;  %v2836_v47 = vrot.slane %v2823_v3, 4 }
 0x260   :  { %v2875_v12 = vperm.slane %v2869_v35, %v7557_v57  ;;  %v2819_v41 = vperm.slane %v2813_v58, %v7557_v57  ;;  %v2893_v35 = vsel %vm410_vm0, %v2892_v15, %v8806_v8  ;;  %v2839_v42 = vsel %vm410_vm0, %v2823_v3, %v2838_v19 }
 0x261   :  { %v2899_v13 = vperm.slane %v2893_v35, %v7614_v21  ;;  %v2910_v59 = vrot.slane %v2903_v2, 4  ;;  %v2837_v58 = vsel %vm410_vm0, %v2836_v47, %v8839_v54 }
 0x262   :  { %v2880_v26 = vrot.slane %v2875_v12, 4  ;;  %v2883_v17 = vsel %vm410_vm0, %v2875_v12, %v2882_v10  ;;  %v2824_v11 = vrot.slane %v2819_v41, 4  ;;  %v2827_v1 = vsel %vm410_vm0, %v2819_v41, %v2826_v7 }
 0x263   :  { %v2891_v62 = vperm.slane %v2883_v17, %v7614_v21  ;;  %v2847_v10 = vperm.slane %v2839_v42, %v7614_v21  ;;  %v2908_v19 = vrot.slane %v2899_v13, 4  ;;  %v2911_v3 = vsel %vm410_vm0, 0.0, %v2910_v59 }
 0x264   :  { %v2881_v22 = vsel %vm410_vm0, %v2880_v26, %v8848_v61  ;;  %v3753_v15 = vsel %vm410_vm0, %v2910_v59, %v2899_v13  ;;  %v3758_v2 = vrot.slane %v2911_v3, 4  ;;  %v2825_v17 = vsel %vm410_vm0, %v2824_v11, %v8868_v31 }
 0x265   :  { %v2887_v8 = vperm.slane %v2881_v22, %v7614_v21  ;;  %v2906_v12 = vrot.slane %v2891_v62, 4  ;;  %v2835_v61 = vperm.slane %v2827_v1, %v7614_v21  ;;  %v2909_v54 = vsel %vm410_vm0, 0.0, %v2908_v19 }
 0x266   :  { %v3757_v42 = vperm.slane %v3753_v15, %v7557_v57  ;;  %v3759_v62 = vsel %vm410_vm0, %v3758_v2, %v2909_v54  ;;  %v2831_v59 = vperm.slane %v2825_v17, %v7614_v21  ;;  %v2843_v11 = vperm.slane %v2837_v58, %v7614_v21 }
 0x267   :  { %v2904_v7 = vrot.slane %v2887_v8, 4  ;;  %v2907_v41 = vsel %vm410_vm0, 0.0, %v2906_v12  ;;  %v3742_v47 = vsel %vm410_vm0, %v2906_v12, %v2887_v8  ;;  %v3763_v31 = vperm.slane %v3759_v62, %v7557_v57 }
 0x268   :  { %v3746_v26 = vperm.slane %v3742_v47, %v7557_v57  ;;  %v3747_v35 = vrot.slane %v2907_v41, 4  ;;  %v3778_v19 = vrot.slane %v3757_v42, 4  ;;  %v2850_v8 = vrot.slane %v2835_v61, 4 }
 0x269   :  { %v2905_v13 = vsel %vm410_vm0, 0.0, %v2904_v7  ;;  %v3776_v3 = vrot.slane %v3763_v31, 4  ;;  %v2848_v41 = vrot.slane %v2831_v59, 4  ;;  %v2852_v15 = vrot.slane %v2843_v11, 4 }
 0x26a   :  { %v3748_v22 = vsel %vm410_vm0, %v3747_v35, %v2905_v13  ;;  %v3766_v1 = vrot.slane %v3746_v26, 4  ;;  %v3779_v2 = vsel %vm410_vm0, %v3763_v31, %v3778_v19  ;;  %v2851_v7 = vsel %vm410_vm0, 0.0, %v2850_v8 }
 0x26b   :  { %v3752_v12 = vperm.slane %v3748_v22, %v7557_v57  ;;  %v2854_v54 = vrot.slane %v2847_v10, 4  ;;  %v3688_v47 = vsel %vm410_vm0, %v2850_v8, %v2831_v59  ;;  %v3777_v35 = vsel %vm410_vm0, %v3776_v3, %v3757_v42 }
 0x26c   :  { %v3787_v62 = vperm.slane %v3779_v2, %v7614_v21  ;;  %v3783_v13 = vperm.slane %v3777_v35, %v7614_v21  ;;  %v2849_v22 = vsel %vm410_vm0, 0.0, %v2848_v41  ;;  %v2853_v31 = vsel %vm410_vm0, 0.0, %v2852_v15 }
 0x26d   :  { %v3764_v17 = vrot.slane %v3752_v12, 4  ;;  %v3767_v58 = vsel %vm410_vm0, %v3752_v12, %v3766_v1  ;;  %v2855_v59 = vsel %vm410_vm0, 0.0, %v2854_v54  ;;  %v3692_v8 = vperm.slane %v3688_v47, %v7557_v57 }
 0x26e   :  { %v3775_v61 = vperm.slane %v3767_v58, %v7614_v21  ;;  %v3792_v10 = vrot.slane %v3787_v62, 4  ;;  %v3788_v42 = vrot.slane %v3783_v13, 4  ;;  %v3693_v3 = vrot.slane %v2851_v7, 4 }
 0x26f   :  { %v3765_v19 = vsel %vm410_vm0, %v3764_v17, %v3746_v26  ;;  %v3699_v58 = vsel %vm410_vm0, %v2854_v54, %v2843_v11  ;;  %v3704_v35 = vrot.slane %v2855_v59, 4  ;;  %v3712_v41 = vrot.slane %v3692_v8, 4 }
 0x270   :  { %v3771_v1 = vperm.slane %v3765_v19, %v7614_v21  ;;  %v3794_v12 = vrot.slane %v3775_v61, 4  ;;  %v3793_v2 = vsel %vm410_vm0, %v3792_v10, %v3775_v61  ;;  %v3694_v47 = vsel %vm410_vm0, %v3693_v3, %v2849_v22 }
 0x271   :  { %v4373_v17 = vpack.c.bf16 %v3793_v2, %v3793_v2  ;;  %v3703_v19 = vperm.slane %v3699_v58, %v7557_v57  ;;  %v7003_v7 = vunpack.i.l.bf16 %v8978_v4  ;;  %v3698_v11 = vperm.slane %v3694_v47, %v7557_v57 }
 0x272   :  { %v3789_v15 = vsel %vm410_vm0, %v3788_v42, %v3771_v1  ;;  %v3790_v46 = vrot.slane %v3771_v1, 4  ;;  %v3795_v26 = vsel %vm410_vm0, %v3787_v62, %v3794_v12  ;;  %v3705_v54 = vsel %vm410_vm0, %v3704_v35, %v2853_v31  ;;  %v6947_v1 = vpop.permute.xlu0 %6946 }
 0x273   :  { %v4341_v33 = vpack.c.bf16 %v3789_v15, %v3789_v15  ;;  %v4389_v50 = vpack.c.bf16 %v3795_v26, %v3795_v26  ;;  %4437 = vst.msk [vmem:[%s11442_s8 + $0x94] sm:$0xf] %vm2234_vm1, %v4373_v17  ;;  %v716_v62 = vrot.slane %v9055_v48, 4  ;;  %v3709_v4 = vperm.slane %v3705_v54, %v7557_v57  ;;  %v11535_v17 = vld [vmem:[#allocation13_spill] sm:$0xff] }
 0x274   :  { %v3791_v61 = vsel %vm410_vm0, %v3783_v13, %v3790_v46  ;;  %v3724_v46 = vrot.slane %v3703_v19, 4  ;;  %v660_v13 = vrot.slane %v9061_v45, 4  ;;  %v9157_v22 = vperm.slane %v9072_v53, %v7557_v57 }
 0x275   :  { %v4357_v10 = vpack.c.bf16 %v3791_v61, %v3791_v61  ;;  %4405 = vst.msk [vmem:[%s11442_s8 + $0x14] sm:$0xf] %vm2234_vm1, %v4341_v33  ;;  %v3710_v31 = vrot.slane %v3698_v11, 4  ;;  %v3713_v59 = vsel %vm410_vm0, %v3698_v11, %v3712_v41  ;;  %v3722_v53 = vrot.slane %v3709_v4, 4 }
 0x276   :  { %4453 = vst.msk [vmem:[%s11442_s8 + $0xd4] sm:$0xf] %vm2234_vm1, %v4389_v50  ;;  %v3721_v42 = vperm.slane %v3713_v59, %v7614_v21  ;;  %v3725_v12 = vsel %vm410_vm0, %v3709_v4, %v3724_v46  ;;  %v746_v3 = vrot.slane %v7003_v7, 4  ;;  %v9174_v50 = vsel %vm410_vm0, %v7003_v7, %v748_v37 }
 0x277   :  { %4421 = vst.msk [vmem:[%s11442_s8 + $0x54] sm:$0xf] %vm2234_vm1, %v4357_v10  ;;  %v3711_v2 = vsel %vm410_vm0, %v3710_v31, %v3692_v8  ;;  %v3733_v58 = vperm.slane %v3725_v12, %v7614_v21  ;;  %v3723_v41 = vsel %vm410_vm0, %v3722_v53, %v3703_v19  ;;  %v6949_v26 = vunpack.i.h.bf16 %v6947_v1  ;;  %v9188_v53 = vpop.permute.xlu1 %6961 }
 0x278   :  { %v3717_v35 = vperm.slane %v3711_v2, %v7614_v21  ;;  %v3740_v15 = vrot.slane %v3721_v42, 4  ;;  %v3729_v47 = vperm.slane %v3723_v41, %v7614_v21  ;;  %v6948_v11 = vunpack.i.l.bf16 %v6947_v1 }
 0x279   :  { %v3738_v61 = vrot.slane %v3733_v58, 4  ;;  %v702_v7 = vrot.slane %v6949_v26, 4  ;;  %v705_v8 = vsel %vm410_vm0, %v6949_v26, %v9026_v18 }
 0x27a   :  { %v3736_v54 = vrot.slane %v3717_v35, 4  ;;  %v3741_v37 = vsel %vm410_vm0, %v3733_v58, %v3740_v15  ;;  %v3734_v10 = vrot.slane %v3729_v47, 4  ;;  %v713_v19 = vperm.slane %v705_v8, %v7557_v57 }
 0x27b   :  { %v3739_v4 = vsel %vm410_vm0, %v3738_v61, %v3721_v42  ;;  %v4388_v46 = vpack.c.bf16 %v3741_v37, %v3741_v37  ;;  %v703_v1 = vsel %vm410_vm0, %v702_v7, %v6939_v29  ;;  %v646_v12 = vrot.slane %v6948_v11, 4 }
 0x27c   :  { %v3737_v31 = vsel %vm410_vm0, %v3729_v47, %v3736_v54  ;;  %v4372_v59 = vpack.c.bf16 %v3739_v4, %v3739_v4  ;;  %v3735_v2 = vsel %vm410_vm0, %v3734_v10, %v3717_v35  ;;  %v709_v18 = vperm.slane %v703_v1, %v7557_v57 }
 0x27d   :  { %v4356_v58 = vpack.c.bf16 %v3737_v31, %v3737_v31  ;;  %4452 = vst.msk [vmem:[%s11442_s8 + $0xd0] sm:$0xf] %vm2234_vm1, %v4388_v46  ;;  %v726_v42 = vrot.slane %v713_v19, 4  ;;  %v4340_v41 = vpack.c.bf16 %v3735_v2, %v3735_v2  ;;  %v729_v29 = vsel %vm410_vm0, %v713_v19, %v728_v51 }
 0x27e   :  { %4436 = vst.msk [vmem:[%s11442_s8 + $0x90] sm:$0xf] %vm2234_vm1, %v4372_v59  ;;  %v647_v35 = vsel %vm410_vm0, %v646_v12, %v6938_v24  ;;  %v649_v15 = vsel %vm410_vm0, %v6948_v11, %v9030_v55  ;;  %v714_v26 = vrot.slane %v709_v18, 4  ;;  %v717_v47 = vsel %vm410_vm0, %v709_v18, %v716_v62 }
 0x27f   :  { %4420 = vst.msk [vmem:[%s11442_s8 + $0x50] sm:$0xf] %vm2234_vm1, %v4356_v58  ;;  %v727_v61 = vsel %vm410_vm0, %v726_v42, %v9039_v34  ;;  %v737_v51 = vperm.slane %v729_v29, %v7614_v21  ;;  %v725_v36 = vperm.slane %v717_v47, %v7614_v21  ;;  %v653_v55 = vperm.slane %v647_v35, %v7557_v57  ;;  %v9251_v35 = vpop.permute.xlu1 %6971 }
 0x280   :  { %4404 = vst.msk [vmem:[%s11442_s8 + $0x10] sm:$0xf] %vm2234_vm1, %v4340_v41  ;;  %v733_v24 = vperm.slane %v727_v61, %v7614_v21  ;;  %v657_v11 = vperm.slane %v649_v15, %v7557_v57  ;;  %v9229_v62 = vsel %vm410_vm0, %v746_v3, %v7527_v14  ;;  %v6964_v34 = vunpack.i.h.bf16 %v9188_v53 }
 0x281   :  { %v715_v54 = vsel %vm410_vm0, %v714_v26, %v9055_v48  ;;  %v744_v37 = vrot.slane %v737_v51, 4  ;;  %v740_v8 = vrot.slane %v725_v36, 4  ;;  %v658_v4 = vrot.slane %v653_v55, 4 }
 0x282   :  { %v721_v7 = vperm.slane %v715_v54, %v7614_v21  ;;  %v742_v10 = vrot.slane %v733_v24, 4  ;;  %v661_v14 = vsel %vm410_vm0, %v653_v55, %v660_v13  ;;  %v670_v3 = vrot.slane %v657_v11, 4 }
 0x283   :  { %v745_v46 = vsel %vm410_vm0, 0.0, %v744_v37  ;;  %v1587_v19 = vsel %vm410_vm0, %v744_v37, %v733_v24  ;;  %v741_v59 = vsel %vm410_vm0, 0.0, %v740_v8  ;;  %v659_v41 = vsel %vm410_vm0, %v658_v4, %v9061_v45 }
 0x284   :  { %v738_v31 = vrot.slane %v721_v7, 4  ;;  %v743_v48 = vsel %vm410_vm0, 0.0, %v742_v10  ;;  %v1576_v1 = vsel %vm410_vm0, %v740_v8, %v721_v7  ;;  %v1581_v2 = vrot.slane %v741_v59, 4 }
 0x285   :  { %v1580_v12 = vperm.slane %v1576_v1, %v7557_v57  ;;  %v1591_v58 = vperm.slane %v1587_v19, %v7557_v57  ;;  %v1592_v18 = vrot.slane %v745_v46, 4  ;;  %v669_v13 = vperm.slane %v661_v14, %v7614_v21 }
 0x286   :  { %v739_v42 = vsel %vm410_vm0, 0.0, %v738_v31  ;;  %v671_v29 = vsel %vm410_vm0, %v670_v3, %v9052_v63  ;;  %v665_v24 = vperm.slane %v659_v41, %v7614_v21  ;;  %v673_v45 = vsel %vm410_vm0, %v657_v11, %v672_v28 }
 0x287   :  { %v1582_v15 = vsel %vm410_vm0, %v1581_v2, %v739_v42  ;;  %v1593_v26 = vsel %vm410_vm0, %v1592_v18, %v743_v48  ;;  %v1600_v47 = vrot.slane %v1580_v12, 4  ;;  %v1612_v61 = vrot.slane %v1591_v58, 4 }
 0x288   :  { %v1586_v51 = vperm.slane %v1582_v15, %v7557_v57  ;;  %v1597_v36 = vperm.slane %v1593_v26, %v7557_v57  ;;  %v677_v55 = vperm.slane %v671_v29, %v7614_v21  ;;  %v681_v54 = vperm.slane %v673_v45, %v7614_v21 }
 0x289   :  { %v684_v37 = vrot.slane %v669_v13, 4  ;;  %v6974_v7 = vunpack.i.h.bf16 %v9251_v35  ;;  %v682_v63 = vrot.slane %v665_v24, 4 }
 0x28a   :  { %v1598_v8 = vrot.slane %v1586_v51, 4  ;;  %v1601_v10 = vsel %vm410_vm0, %v1586_v51, %v1600_v47  ;;  %v1610_v4 = vrot.slane %v1597_v36, 4  ;;  %v1613_v46 = vsel %vm410_vm0, %v1597_v36, %v1612_v61 }
 0x28b   :  { %v1609_v19 = vperm.slane %v1601_v10, %v7614_v21  ;;  %v1621_v14 = vperm.slane %v1613_v46, %v7614_v21  ;;  %v685_v28 = vsel %vm410_vm0, 0.0, %v684_v37  ;;  %v686_v31 = vrot.slane %v677_v55, 4 }
 0x28c   :  { %v1599_v11 = vsel %vm410_vm0, %v1598_v8, %v1580_v12  ;;  %v1611_v3 = vsel %vm410_vm0, %v1610_v4, %v1591_v58  ;;  %v688_v59 = vrot.slane %v681_v54, 4  ;;  %v683_v42 = vsel %vm410_vm0, 0.0, %v682_v63  ;;  %v9283_v4 = vpop.permute.xlu2 %7021 }
 0x28d   :  { %v1605_v48 = vperm.slane %v1599_v11, %v7614_v21  ;;  %v1617_v1 = vperm.slane %v1611_v3, %v7614_v21  ;;  %v1626_v2 = vrot.slane %v1621_v14, 4  ;;  %v1628_v18 = vrot.slane %v1609_v19, 4 }
 0x28e   :  { %v687_v41 = vsel %vm410_vm0, 0.0, %v686_v31  ;;  %v689_v13 = vsel %vm410_vm0, 0.0, %v688_v59  ;;  %v1522_v29 = vsel %vm410_vm0, %v684_v37, %v665_v24  ;;  %v1527_v36 = vrot.slane %v685_v28, 4 }
 0x28f   :  { %v1622_v15 = vrot.slane %v1617_v1, 4  ;;  %v1624_v12 = vrot.slane %v1605_v48, 4  ;;  %v1627_v58 = vsel %vm410_vm0, %v1626_v2, %v1609_v19  ;;  %v1629_v26 = vsel %vm410_vm0, %v1621_v14, %v1628_v18 }
 0x290   :  { %v2207_v47 = vpack.c.bf16 %v1627_v58, %v1627_v58  ;;  %v2223_v61 = vpack.c.bf16 %v1629_v26, %v1629_v26  ;;  %v1526_v51 = vperm.slane %v1522_v29, %v7557_v57  ;;  %v1533_v8 = vsel %vm410_vm0, %v688_v59, %v677_v55 }
 0x291   :  { %v1623_v45 = vsel %vm410_vm0, %v1622_v15, %v1605_v48  ;;  %v1625_v54 = vsel %vm410_vm0, %v1617_v1, %v1624_v12  ;;  %v1538_v10 = vrot.slane %v689_v13, 4  ;;  %v1528_v46 = vsel %vm410_vm0, %v1527_v36, %v683_v42 }
 0x292   :  { %v2175_v24 = vpack.c.bf16 %v1623_v45, %v1623_v45  ;;  %v2191_v37 = vpack.c.bf16 %v1625_v54, %v1625_v54  ;;  %2272 = vst.msk [vmem:[%s11441_s7 + $0x94] sm:$0xf] %vm2234_vm1, %v2207_v47  ;;  %v1537_v19 = vperm.slane %v1533_v8, %v7557_v57  ;;  %v9293_v14 = vperm.slane %v9174_v50, %v7557_v57  ;;  %v11531_v54 = vld [vmem:[#allocation12_spill] sm:$0xff] }
 0x293   :  { %2288 = vst.msk [vmem:[%s11441_s7 + $0xd4] sm:$0xf] %vm2234_vm1, %v2223_v61  ;;  %v1532_v55 = vperm.slane %v1528_v46, %v7557_v57  ;;  %v1539_v63 = vsel %vm410_vm0, %v1538_v10, %v687_v41  ;;  %v1546_v28 = vrot.slane %v1526_v51, 4  ;;  %v9303_v11 = vperm.slane %v9229_v62, %v7557_v57 }
 0x294   :  { %2240 = vst.msk [vmem:[%s11441_s7 + $0x14] sm:$0xf] %vm2234_vm1, %v2175_v24  ;;  %v1543_v50 = vperm.slane %v1539_v63, %v7557_v57  ;;  %v1558_v3 = vrot.slane %v1537_v19, 4  ;;  %v6973_v31 = vunpack.i.l.bf16 %v9251_v35  ;;  %v3316_v59 = vrot.slane %v6964_v34, 4 }
 0x295   :  { %v6963_v48 = vunpack.i.l.bf16 %v9188_v53  ;;  %2256 = vst.msk [vmem:[%s11441_s7 + $0x54] sm:$0xf] %vm2234_vm1, %v2191_v37  ;;  %v1544_v62 = vrot.slane %v1532_v55, 4  ;;  %v1547_v1 = vsel %vm410_vm0, %v1532_v55, %v1546_v28  ;;  %v5021_v41 = vrot.slane %v6974_v7, 4 }
 0x296   :  { %v1555_v2 = vperm.slane %v1547_v1, %v7614_v21  ;;  %v1556_v18 = vrot.slane %v1543_v50, 4  ;;  %v1559_v42 = vsel %vm410_vm0, %v1543_v50, %v1558_v3  ;;  %v5023_v15 = vrot.slane %v7509_v0, 4  ;;  %v6952_v50 = vpop.permute.xlu0 %6951  ;;  %v9346_v1 = vpop.permute.xlu2 %7031 }
 0x297   :  { %v1545_v13 = vsel %vm410_vm0, %v1544_v62, %v1526_v51  ;;  %v1567_v29 = vperm.slane %v1559_v42, %v7614_v21  ;;  %v4965_v12 = vrot.slane %v6973_v31, 4  ;;  %v11482_v58 = vunpack.i.h.bf16 %v9283_v4 }
 0x298   :  { %v1551_v26 = vperm.slane %v1545_v13, %v7614_v21  ;;  %v1557_v47 = vsel %vm410_vm0, %v1556_v18, %v1537_v19  ;;  %v1574_v61 = vrot.slane %v1555_v2, 4  ;;  %v4967_v8 = vrot.slane %v11531_v54, 4 }
 0x299   :  { %v1563_v36 = vperm.slane %v1557_v47, %v7614_v21  ;;  %v1572_v45 = vrot.slane %v1567_v29, 4  ;;  %v5024_v51 = vsel %vm410_vm0, %v6974_v7, %v5023_v15  ;;  %v5022_v37 = vsel %vm410_vm0, %v5021_v41, %v7509_v0 }
 0x29a   :  { %v1570_v10 = vrot.slane %v1551_v26, 4  ;;  %v1575_v24 = vsel %vm410_vm0, %v1567_v29, %v1574_v61  ;;  %v4966_v46 = vsel %vm410_vm0, %v4965_v12, %v11531_v54  ;;  %v4968_v28 = vsel %vm410_vm0, %v6973_v31, %v4967_v8 }
 0x29b   :  { %v1568_v19 = vrot.slane %v1563_v36, 4  ;;  %v1573_v55 = vsel %vm410_vm0, %v1572_v45, %v1555_v2  ;;  %v2222_v63 = vpack.c.bf16 %v1575_v24, %v1575_v24  ;;  %v11483_v35 = vunpack.i.l.bf16 %v9283_v4 }
 0x29c   :  { %v1571_v7 = vsel %vm410_vm0, %v1563_v36, %v1570_v10  ;;  %v2206_v3 = vpack.c.bf16 %v1573_v55, %v1573_v55  ;;  %v9344_v62 = vperm.slane %v5024_v51, %v7557_v57  ;;  %v9354_v31 = vperm.slane %v5022_v37, %v7557_v57  ;;  %v11532_v51 = vld [vmem:[#allocation15_spill] sm:$0xff]  ;;  %v11533_v55 = vld [vmem:[#allocation16_spill] sm:$0xff] }
 0x29d   :  { %v1569_v0 = vsel %vm410_vm0, %v1568_v19, %v1551_v26  ;;  %v2190_v18 = vpack.c.bf16 %v1571_v7, %v1571_v7  ;;  %2287 = vst.msk [vmem:[%s11441_s7 + $0xd0] sm:$0xf] %vm2234_vm1, %v2222_v63  ;;  %v9357_v2 = vperm.slane %v4966_v46, %v7557_v57  ;;  %v9364_v41 = vperm.slane %v4968_v28, %v7557_v57 }
 0x29e   :  { %v2174_v42 = vpack.c.bf16 %v1569_v0, %v1569_v0  ;;  %2271 = vst.msk [vmem:[%s11441_s7 + $0x90] sm:$0xf] %vm2234_vm1, %v2206_v3  ;;  %v6954_v13 = vunpack.i.h.bf16 %v6952_v50  ;;  %v6953_v29 = vunpack.i.l.bf16 %v6952_v50  ;;  %v3260_v26 = vrot.slane %v6963_v48, 4 }
 0x29f   :  { %2255 = vst.msk [vmem:[%s11441_s7 + $0x50] sm:$0xf] %vm2234_vm1, %v2190_v18  ;;  %v7034_v47 = vunpack.i.h.bf16 %v9346_v1  ;;  %v9377_v61 = vrot.slane %v11482_v58, 4  ;;  %v9381_v36 = vrot.slane %v11483_v35, 4  ;;  %v5059_v45 = vrot.slane %v9344_v62, 4 }
 0x2a0   :  { %2239 = vst.msk [vmem:[%s11441_s7 + $0x10] sm:$0xf] %vm2234_vm1, %v2174_v42  ;;  %v3317_v54 = vsel %vm410_vm0, %v3316_v59, %v6954_v13  ;;  %v5047_v8 = vrot.slane %v9354_v31, 4  ;;  %v5079_v10 = vrot.slane %v11532_v51, 4  ;;  %v3318_v24 = vrot.slane %v6954_v13, 4 }
 0x2a1   :  { %v3323_v37 = vperm.slane %v3317_v54, %v7557_v57  ;;  %v4991_v46 = vrot.slane %v9357_v2, 4  ;;  %v5003_v19 = vrot.slane %v9364_v41, 4  ;;  %v5135_v63 = vrot.slane %v11533_v55, 4 }
 0x2a2   :  { %v3261_v28 = vsel %vm410_vm0, %v3260_v26, %v6953_v29  ;;  %v9396_v50 = vrot.slane %v7034_v47, 4  ;;  %v7033_v7 = vunpack.i.l.bf16 %v9346_v1  ;;  %v3319_v59 = vsel %vm410_vm0, %v6964_v34, %v3318_v24 }
 0x2a3   :  { %v3328_v3 = vrot.slane %v3323_v37, 4  ;;  %v9403_v0 = vsel %vm410_vm0, %v7034_v47, %v5135_v63  ;;  %v3327_v18 = vperm.slane %v3319_v59, %v7557_v57  ;;  %v11534_v42 = vrot.slane %v8630_v60, 4 }
 0x2a4   :  { %v3262_v54 = vrot.slane %v6953_v29, 4  ;;  %v3267_v35 = vperm.slane %v3261_v28, %v7557_v57  ;;  %v11536_v63 = vrot.slane %v8531_v43, 4 }
 0x2a5   :  { %v3331_v13 = vsel %vm410_vm0, %v3323_v37, %v11534_v42  ;;  %v3329_v26 = vsel %vm410_vm0, %v3328_v3, %v8630_v60  ;;  %v3340_v47 = vrot.slane %v3327_v18, 4  ;;  %v9423_v60 = vrot.slane %v7033_v7, 4 }
 0x2a6   :  { %v3339_v58 = vperm.slane %v3331_v13, %v7614_v21  ;;  %v3335_v24 = vperm.slane %v3329_v26, %v7614_v21  ;;  %v3343_v59 = vsel %vm410_vm0, %v3327_v18, %v11536_v63  ;;  %v3263_v29 = vsel %vm410_vm0, %v6963_v48, %v3262_v54 }
 0x2a7   :  { %v3351_v37 = vperm.slane %v3343_v59, %v7614_v21  ;;  %v3272_v3 = vrot.slane %v3267_v35, 4  ;;  %v3341_v42 = vsel %vm410_vm0, %v3340_v47, %v8531_v43  ;;  %v3271_v26 = vperm.slane %v3263_v29, %v7557_v57 }
 0x2a8   :  { %v3354_v28 = vrot.slane %v3339_v58, 4  ;;  %v3352_v13 = vrot.slane %v3335_v24, 4  ;;  %v11537_v18 = vrot.slane %v8649_v52, 4  ;;  %v3347_v48 = vperm.slane %v3341_v42, %v7614_v21 }
 0x2a9   :  { %v3358_v63 = vrot.slane %v3351_v37, 4  ;;  %v3273_v43 = vsel %vm410_vm0, %v3272_v3, %v8649_v52  ;;  %v3284_v52 = vrot.slane %v3271_v26, 4 }
 0x2aa   :  { %v3275_v53 = vsel %vm410_vm0, %v3267_v35, %v11537_v18  ;;  %v3355_v54 = vsel %vm410_vm0, 0.0, %v3354_v28  ;;  %v4174_v34 = vsel %vm410_vm0, %v3354_v28, %v3335_v24  ;;  %v3353_v58 = vsel %vm410_vm0, 0.0, %v3352_v13 }
 0x2ab   :  { %v4178_v59 = vperm.slane %v4174_v34, %v7557_v57  ;;  %v4179_v33 = vrot.slane %v3355_v54, 4  ;;  %v3356_v47 = vrot.slane %v3347_v48, 4  ;;  %v3359_v29 = vsel %vm410_vm0, 0.0, %v3358_v63 }
 0x2ac   :  { %v4185_v35 = vsel %vm410_vm0, %v3358_v63, %v3347_v48  ;;  %v3279_v42 = vperm.slane %v3273_v43, %v7614_v21  ;;  %v4190_v24 = vrot.slane %v3359_v29, 4  ;;  %v3283_v54 = vperm.slane %v3275_v53, %v7614_v21 }
 0x2ad   :  { %v4180_v18 = vsel %vm410_vm0, %v4179_v33, %v3353_v58  ;;  %v4189_v37 = vperm.slane %v4185_v35, %v7557_v57  ;;  %v4198_v28 = vrot.slane %v4178_v59, 4  ;;  %v3357_v13 = vsel %vm410_vm0, 0.0, %v3356_v47 }
 0x2ae   :  { %v4184_v34 = vperm.slane %v4180_v18, %v7557_v57  ;;  %v4191_v3 = vsel %vm410_vm0, %v4190_v24, %v3357_v13  ;;  %v11538_v48 = vrot.slane %v8607_v49, 4  ;;  %v3296_v43 = vrot.slane %v3279_v42, 4 }
 0x2af   :  { %v4210_v15 = vrot.slane %v4189_v37, 4  ;;  %v4195_v33 = vperm.slane %v4191_v3, %v7557_v57  ;;  %v3285_v47 = vsel %vm410_vm0, %v3284_v52, %v8607_v49  ;;  %v3298_v3 = vrot.slane %v3283_v54, 4 }
 0x2b0   :  { %v3287_v63 = vsel %vm410_vm0, %v3271_v26, %v11538_v48  ;;  %v4196_v58 = vrot.slane %v4184_v34, 4  ;;  %v4199_v29 = vsel %vm410_vm0, %v4184_v34, %v4198_v28  ;;  %v3291_v53 = vperm.slane %v3285_v47, %v7614_v21 }
 0x2b1   :  { %v4207_v35 = vperm.slane %v4199_v29, %v7614_v21  ;;  %v3295_v18 = vperm.slane %v3287_v63, %v7614_v21  ;;  %v3297_v24 = vsel %vm410_vm0, 0.0, %v3296_v43  ;;  %v4208_v26 = vrot.slane %v4195_v33, 4 }
 0x2b2   :  { %v4197_v13 = vsel %vm410_vm0, %v4196_v58, %v4178_v59  ;;  %v4211_v48 = vsel %vm410_vm0, %v4195_v33, %v4210_v15  ;;  %v3300_v49 = vrot.slane %v3291_v53, 4  ;;  %v3299_v29 = vsel %vm410_vm0, 0.0, %v3298_v3 }
 0x2b3   :  { %v4203_v12 = vperm.slane %v4197_v13, %v7614_v21  ;;  %v4219_v28 = vperm.slane %v4211_v48, %v7614_v21  ;;  %v4226_v34 = vrot.slane %v4207_v35, 4  ;;  %v4209_v52 = vsel %vm410_vm0, %v4208_v26, %v4189_v37 }
 0x2b4   :  { %v3302_v47 = vrot.slane %v3295_v18, 4  ;;  %v4120_v63 = vsel %vm410_vm0, %v3298_v3, %v3279_v42  ;;  %v4215_v43 = vperm.slane %v4209_v52, %v7614_v21  ;;  %v3301_v33 = vsel %vm410_vm0, 0.0, %v3300_v49 }
 0x2b5   :  { %v4222_v59 = vrot.slane %v4203_v12, 4  ;;  %v4224_v58 = vrot.slane %v4219_v28, 4  ;;  %v4227_v15 = vsel %vm410_vm0, %v4219_v28, %v4226_v34  ;;  %v4124_v48 = vperm.slane %v4120_v63, %v7557_v57 }
 0x2b6   :  { %v4397_v54 = vpack.c.bf16 %v4227_v15, %v4227_v15  ;;  %v3303_v13 = vsel %vm410_vm0, 0.0, %v3302_v47  ;;  %v4220_v5 = vrot.slane %v4215_v43, 4  ;;  %v4125_v26 = vrot.slane %v3299_v29, 4 }
 0x2b7   :  { %v4223_v37 = vsel %vm410_vm0, %v4215_v43, %v4222_v59  ;;  %v4225_v18 = vsel %vm410_vm0, %v4224_v58, %v4207_v35  ;;  %v4131_v28 = vsel %vm410_vm0, %v3302_v47, %v3291_v53  ;;  %v4136_v34 = vrot.slane %v3303_v13, 4  ;;  %v6977_v59 = vpop.permute.xlu0 %6976 }
 0x2b8   :  { %v4365_v42 = vpack.c.bf16 %v4223_v37, %v4223_v37  ;;  %v4381_v3 = vpack.c.bf16 %v4225_v18, %v4225_v18  ;;  %4461 = vst.msk [vmem:[%s11442_s8 + $0xf4] sm:$0xf] %vm2234_vm1, %v4397_v54  ;;  %v4221_v49 = vsel %vm410_vm0, %v4220_v5, %v4203_v12  ;;  %v4126_v52 = vsel %vm410_vm0, %v4125_v26, %v3297_v24 }
 0x2b9   :  { %v4135_v63 = vperm.slane %v4131_v28, %v7557_v57  ;;  %v4144_v43 = vrot.slane %v4124_v48, 4  ;;  %v5080_v35 = vsel %vm410_vm0, %v7033_v7, %v5079_v10  ;;  %v4349_v29 = vpack.c.bf16 %v4221_v49, %v4221_v49  ;;  %v11539_v7 = vld [vmem:[#allocation14_spill] sm:$0xff] }
 0x2ba   :  { %4429 = vst.msk [vmem:[%s11442_s8 + $0x74] sm:$0xf] %vm2234_vm1, %v4365_v42  ;;  %v4130_v5 = vperm.slane %v4126_v52, %v7557_v57  ;;  %v4137_v12 = vsel %vm410_vm0, %v4136_v34, %v3301_v33  ;;  %v5134_v53 = vsel %vm410_vm0, %v9396_v50, %v11533_v55  ;;  %v3418_v24 = vrot.slane %v11539_v7, 4 }
 0x2bb   :  { %4445 = vst.msk [vmem:[%s11442_s8 + $0xb4] sm:$0xf] %vm2234_vm1, %v4381_v3  ;;  %v4141_v1 = vperm.slane %v4137_v12, %v7557_v57  ;;  %v4156_v10 = vrot.slane %v4135_v63, 4  ;;  %v9503_v47 = vperm.slane %v9403_v0, %v7557_v57  ;;  %v6979_v58 = vunpack.i.h.bf16 %v6977_v59 }
 0x2bc   :  { %4413 = vst.msk [vmem:[%s11442_s8 + $0x34] sm:$0xf] %vm2234_vm1, %v4349_v29  ;;  %v4142_v55 = vrot.slane %v4130_v5, 4  ;;  %v4145_v50 = vsel %vm410_vm0, %v4130_v5, %v4144_v43  ;;  %v9511_v15 = vperm.slane %v5080_v35, %v7557_v57  ;;  %v9516_v0 = vperm.slane %v5134_v53, %v7557_v57 }
 0x2bd   :  { %v4153_v54 = vperm.slane %v4145_v50, %v7614_v21  ;;  %v4154_v33 = vrot.slane %v4141_v1, 4  ;;  %v4157_v13 = vsel %vm410_vm0, %v4141_v1, %v4156_v10  ;;  %v9521_v37 = vsel %vm410_vm0, %v9423_v60, %v11532_v51 }
 0x2be   :  { %v4143_v18 = vsel %vm410_vm0, %v4142_v55, %v4124_v48  ;;  %v4165_v26 = vperm.slane %v4157_v13, %v7614_v21  ;;  %v5033_v34 = vrot.slane %v6979_v58, 4  ;;  %v5036_v43 = vsel %vm410_vm0, %v6979_v58, %v8831_v27 }
 0x2bf   :  { %v4149_v42 = vperm.slane %v4143_v18, %v7614_v21  ;;  %v4155_v3 = vsel %vm410_vm0, %v4154_v33, %v4135_v63  ;;  %v4172_v28 = vrot.slane %v4153_v54, 4  ;;  %v6978_v35 = vunpack.i.l.bf16 %v6977_v59 }
 0x2c0   :  { %v4161_v49 = vperm.slane %v4155_v3, %v7614_v21  ;;  %v4170_v52 = vrot.slane %v4165_v26, 4  ;;  %v5034_v60 = vsel %vm410_vm0, %v5033_v34, %v6969_v23  ;;  %v5044_v48 = vperm.slane %v5036_v43, %v7557_v57  ;;  %v9546_v23 = vpop.permute.xlu1 %6991 }
 0x2c1   :  { %v4168_v29 = vrot.slane %v4149_v42, 4  ;;  %v4173_v51 = vsel %vm410_vm0, %v4165_v26, %v4172_v28  ;;  %v5040_v53 = vperm.slane %v5034_v60, %v7557_v57  ;;  %v4980_v3 = vsel %vm410_vm0, %v6978_v35, %v8853_v38 }
 0x2c2   :  { %v4166_v5 = vrot.slane %v4161_v49, 4  ;;  %v4171_v63 = vsel %vm410_vm0, %v4170_v52, %v4153_v54  ;;  %v4396_v12 = vpack.c.bf16 %v4173_v51, %v4173_v51  ;;  %v5057_v27 = vrot.slane %v5044_v48, 4 }
 0x2c3   :  { %v4169_v1 = vsel %vm410_vm0, %v4161_v49, %v4168_v29  ;;  %v4380_v10 = vpack.c.bf16 %v4171_v63, %v4171_v63  ;;  %v5060_v59 = vsel %vm410_vm0, %v5044_v48, %v5059_v45  ;;  %v5045_v58 = vrot.slane %v5040_v53, 4 }
 0x2c4   :  { %v4167_v55 = vsel %vm410_vm0, %v4166_v5, %v4149_v42  ;;  %v4364_v50 = vpack.c.bf16 %v4169_v1, %v4169_v1  ;;  %4460 = vst.msk [vmem:[%s11442_s8 + $0xf0] sm:$0xf] %vm2234_vm1, %v4396_v12  ;;  %v5048_v54 = vsel %vm410_vm0, %v5040_v53, %v5047_v8  ;;  %v5058_v13 = vsel %vm410_vm0, %v5057_v27, %v9344_v62 }
 0x2c5   :  { %v4348_v33 = vpack.c.bf16 %v4167_v55, %v4167_v55  ;;  %4444 = vst.msk [vmem:[%s11442_s8 + $0xb0] sm:$0xf] %vm2234_vm1, %v4380_v10  ;;  %v5056_v45 = vperm.slane %v5048_v54, %v7614_v21  ;;  %v5068_v18 = vperm.slane %v5060_v59, %v7614_v21  ;;  %v5046_v8 = vsel %vm410_vm0, %v5045_v58, %v9354_v31 }
 0x2c6   :  { %4428 = vst.msk [vmem:[%s11442_s8 + $0x70] sm:$0xf] %vm2234_vm1, %v4364_v50  ;;  %v5064_v26 = vperm.slane %v5058_v13, %v7614_v21  ;;  %v4977_v42 = vrot.slane %v6978_v35, 4  ;;  %v6994_v62 = vunpack.i.h.bf16 %v9546_v23  ;;  %v5052_v28 = vperm.slane %v5046_v8, %v7614_v21 }
 0x2c7   :  { %4412 = vst.msk [vmem:[%s11442_s8 + $0x30] sm:$0xf] %vm2234_vm1, %v4348_v33  ;;  %v5071_v34 = vrot.slane %v5056_v45, 4  ;;  %v5075_v49 = vrot.slane %v5068_v18, 4  ;;  %v6993_v52 = vunpack.i.l.bf16 %v9546_v23  ;;  %v4988_v38 = vperm.slane %v4980_v3, %v7557_v57 }
 0x2c8   :  { %v5073_v31 = vrot.slane %v5064_v26, 4  ;;  %v4978_v43 = vsel %vm410_vm0, %v4977_v42, %v6968_v25  ;;  %v5069_v35 = vrot.slane %v5052_v28, 4 }
 0x2c9   :  { %v5072_v29 = vsel %vm410_vm0, 0.0, %v5071_v34  ;;  %v5076_v51 = vsel %vm410_vm0, 0.0, %v5075_v49  ;;  %v5907_v60 = vsel %vm410_vm0, %v5071_v34, %v5052_v28  ;;  %v5918_v12 = vsel %vm410_vm0, %v5075_v49, %v5064_v26 }
 0x2ca   :  { %v5074_v48 = vsel %vm410_vm0, 0.0, %v5073_v31  ;;  %v5911_v5 = vperm.slane %v5907_v60, %v7557_v57  ;;  %v5912_v63 = vrot.slane %v5072_v29, 4  ;;  %v5070_v20 = vsel %vm410_vm0, 0.0, %v5069_v35 }
 0x2cb   :  { %v5922_v25 = vperm.slane %v5918_v12, %v7557_v57  ;;  %v5923_v53 = vrot.slane %v5076_v51, 4  ;;  %v4984_v1 = vperm.slane %v4978_v43, %v7557_v57  ;;  %v5001_v59 = vrot.slane %v4988_v38, 4 }
 0x2cc   :  { %v5913_v10 = vsel %vm410_vm0, %v5912_v63, %v5070_v20  ;;  %v5931_v27 = vrot.slane %v5911_v5, 4  ;;  %v5004_v55 = vsel %vm410_vm0, %v4988_v38, %v5003_v19 }
 0x2cd   :  { %v5917_v50 = vperm.slane %v5913_v10, %v7557_v57  ;;  %v5924_v58 = vsel %vm410_vm0, %v5923_v53, %v5074_v48  ;;  %v5943_v54 = vrot.slane %v5922_v25, 4  ;;  %v4989_v33 = vrot.slane %v4984_v1, 4 }
 0x2ce   :  { %v5928_v45 = vperm.slane %v5924_v58, %v7557_v57  ;;  %v4992_v13 = vsel %vm410_vm0, %v4984_v1, %v4991_v46  ;;  %v5002_v18 = vsel %vm410_vm0, %v5001_v59, %v9364_v41  ;;  %v5012_v8 = vperm.slane %v5004_v55, %v7614_v21 }
 0x2cf   :  { %v5929_v26 = vrot.slane %v5917_v50, 4  ;;  %v5932_v19 = vsel %vm410_vm0, %v5917_v50, %v5931_v27  ;;  %v4990_v42 = vsel %vm410_vm0, %v4989_v33, %v9357_v2  ;;  %v5000_v3 = vperm.slane %v4992_v13, %v7614_v21 }
 0x2d0   :  { %v5940_v28 = vperm.slane %v5932_v19, %v7614_v21  ;;  %v5941_v34 = vrot.slane %v5928_v45, 4  ;;  %v5944_v49 = vsel %vm410_vm0, %v5928_v45, %v5943_v54  ;;  %v4996_v46 = vperm.slane %v4990_v42, %v7614_v21 }
 0x2d1   :  { %v5930_v31 = vsel %vm410_vm0, %v5929_v26, %v5911_v5  ;;  %v5952_v41 = vperm.slane %v5944_v49, %v7614_v21  ;;  %v5008_v43 = vperm.slane %v5002_v18, %v7614_v21  ;;  %v5015_v38 = vrot.slane %v5000_v3, 4  ;;  %v6982_v3 = vpop.permute.xlu0 %6981 }
 0x2d2   :  { %v5936_v35 = vperm.slane %v5930_v31, %v7614_v21  ;;  %v5942_v2 = vsel %vm410_vm0, %v5941_v34, %v5922_v25  ;;  %v5959_v29 = vrot.slane %v5940_v28, 4  ;;  %v5013_v51 = vrot.slane %v4996_v46, 4  ;;  %v9644_v31 = vpop.permute.xlu1 %6996 }
 0x2d3   :  { %v5948_v60 = vperm.slane %v5942_v2, %v7614_v21  ;;  %v5957_v48 = vrot.slane %v5952_v41, 4  ;;  %v5016_v63 = vsel %vm410_vm0, 0.0, %v5015_v38  ;;  %v5017_v12 = vrot.slane %v5008_v43, 4 }
 0x2d4   :  { %v5955_v20 = vrot.slane %v5936_v35, 4  ;;  %v5960_v5 = vsel %vm410_vm0, %v5952_v41, %v5959_v29  ;;  %v5014_v53 = vsel %vm410_vm0, 0.0, %v5013_v51  ;;  %v5019_v1 = vrot.slane %v5012_v8, 4 }
 0x2d5   :  { %v5953_v10 = vrot.slane %v5948_v60, 4  ;;  %v5958_v27 = vsel %vm410_vm0, %v5957_v48, %v5940_v28  ;;  %v6554_v59 = vpack.c.bf16 %v5960_v5, %v5960_v5  ;;  %v5018_v25 = vsel %vm410_vm0, 0.0, %v5017_v12 }
 0x2d6   :  { %v5956_v55 = vsel %vm410_vm0, %v5948_v60, %v5955_v20  ;;  %v6538_v50 = vpack.c.bf16 %v5958_v27, %v5958_v27  ;;  %v5020_v58 = vsel %vm410_vm0, 0.0, %v5019_v1  ;;  %v5853_v54 = vsel %vm410_vm0, %v5015_v38, %v4996_v46 }
 0x2d7   :  { %v5954_v33 = vsel %vm410_vm0, %v5953_v10, %v5936_v35  ;;  %v6522_v45 = vpack.c.bf16 %v5956_v55, %v5956_v55  ;;  %6618 = vst.msk [vmem:[%s11443_s9 + $0xd4] sm:$0xf] %vm2234_vm1, %v6554_v59  ;;  %v5857_v13 = vperm.slane %v5853_v54, %v7557_v57  ;;  %v5858_v18 = vrot.slane %v5016_v63, 4 }
 0x2d8   :  { %v5171_v8 = vrot.slane %v9503_v47, 4  ;;  %v6506_v26 = vpack.c.bf16 %v5954_v33, %v5954_v33  ;;  %6602 = vst.msk [vmem:[%s11443_s9 + $0x94] sm:$0xf] %vm2234_vm1, %v6538_v50  ;;  %v5864_v19 = vsel %vm410_vm0, %v5019_v1, %v5008_v43  ;;  %v5869_v42 = vrot.slane %v5020_v58, 4 }
 0x2d9   :  { %v9636_v28 = vperm.slane %v9521_v37, %v7557_v57  ;;  %6586 = vst.msk [vmem:[%s11443_s9 + $0x54] sm:$0xf] %vm2234_vm1, %v6522_v45  ;;  %v5859_v34 = vsel %vm410_vm0, %v5858_v18, %v5014_v53  ;;  %v5868_v49 = vperm.slane %v5864_v19, %v7557_v57  ;;  %v5877_v46 = vrot.slane %v5857_v13, 4 }
 0x2da   :  { %v2980_v41 = vrot.slane %v6994_v62, 4  ;;  %v2924_v43 = vrot.slane %v6993_v52, 4  ;;  %6570 = vst.msk [vmem:[%s11443_s9 + $0x14] sm:$0xf] %vm2234_vm1, %v6506_v26  ;;  %v5863_v37 = vperm.slane %v5859_v34, %v7557_v57  ;;  %v5870_v38 = vsel %vm410_vm0, %v5869_v42, %v5018_v25 }
 0x2db   :  { %v5874_v35 = vperm.slane %v5870_v38, %v7557_v57  ;;  %v5889_v2 = vrot.slane %v5868_v49, 4  ;;  %v6984_v29 = vunpack.i.h.bf16 %v6982_v3  ;;  %v6983_v51 = vunpack.i.l.bf16 %v6982_v3 }
 0x2dc   :  { %v5875_v60 = vrot.slane %v5863_v37, 4  ;;  %v5878_v48 = vsel %vm410_vm0, %v5863_v37, %v5877_v46  ;;  %v6999_v63 = vunpack.i.h.bf16 %v9644_v31  ;;  %v6998_v12 = vunpack.i.l.bf16 %v9644_v31 }
 0x2dd   :  { %v5886_v20 = vperm.slane %v5878_v48, %v7614_v21  ;;  %v5887_v5 = vrot.slane %v5874_v35, 4  ;;  %v5890_v53 = vsel %vm410_vm0, %v5874_v35, %v5889_v2  ;;  %v2981_v1 = vsel %vm410_vm0, %v2980_v41, %v6984_v29 }
 0x2de   :  { %v5876_v10 = vsel %vm410_vm0, %v5875_v60, %v5857_v13  ;;  %v5898_v27 = vperm.slane %v5890_v53, %v7614_v21  ;;  %v2982_v59 = vrot.slane %v6984_v29, 4  ;;  %v2987_v25 = vperm.slane %v2981_v1, %v7557_v57 }
 0x2df   :  { %v5882_v55 = vperm.slane %v5876_v10, %v7614_v21  ;;  %v5888_v50 = vsel %vm410_vm0, %v5887_v5, %v5868_v49  ;;  %v5905_v58 = vrot.slane %v5886_v20, 4  ;;  %v2925_v54 = vsel %vm410_vm0, %v2924_v43, %v6983_v51 }
 0x2e0   :  { %v5894_v33 = vperm.slane %v5888_v50, %v7614_v21  ;;  %v5903_v45 = vrot.slane %v5898_v27, 4  ;;  %v2983_v18 = vsel %vm410_vm0, %v6994_v62, %v2982_v59  ;;  %v2992_v13 = vrot.slane %v2987_v25, 4 }
 0x2e1   :  { %v5901_v26 = vrot.slane %v5882_v55, 4  ;;  %v5906_v19 = vsel %vm410_vm0, %v5898_v27, %v5905_v58  ;;  %v2991_v42 = vperm.slane %v2983_v18, %v7557_v57  ;;  %v11540_v3 = vrot.slane %v8882_v39, 4 }
 0x2e2   :  { %v5899_v49 = vrot.slane %v5894_v33, 4  ;;  %v5904_v46 = vsel %vm410_vm0, %v5903_v45, %v5886_v20  ;;  %v6553_v41 = vpack.c.bf16 %v5906_v19, %v5906_v19  ;;  %v2993_v43 = vsel %vm410_vm0, %v2992_v13, %v8882_v39 }
 0x2e3   :  { %v2995_v34 = vsel %vm410_vm0, %v2987_v25, %v11540_v3  ;;  %v5902_v37 = vsel %vm410_vm0, %v5894_v33, %v5901_v26  ;;  %v6537_v62 = vpack.c.bf16 %v5904_v46, %v5904_v46  ;;  %v2999_v38 = vperm.slane %v2993_v43, %v7614_v21 }
 0x2e4   :  { %v3003_v35 = vperm.slane %v2995_v34, %v7614_v21  ;;  %v5900_v2 = vsel %vm410_vm0, %v5899_v49, %v5882_v55  ;;  %v6521_v29 = vpack.c.bf16 %v5902_v37, %v5902_v37  ;;  %6617 = vst.msk [vmem:[%s11443_s9 + $0xd0] sm:$0xf] %vm2234_vm1, %v6553_v41  ;;  %v3004_v60 = vrot.slane %v2991_v42, 4 }
 0x2e5   :  { %v11541_v48 = vrot.slane %v8878_v6, 4  ;;  %v6505_v20 = vpack.c.bf16 %v5900_v2, %v5900_v2  ;;  %6601 = vst.msk [vmem:[%s11443_s9 + $0x90] sm:$0xf] %vm2234_vm1, %v6537_v62  ;;  %v3016_v53 = vrot.slane %v2999_v38, 4  ;;  %v9703_v10 = vrot.slane %v6999_v63, 4 }
 0x2e6   :  { %v3018_v1 = vrot.slane %v3003_v35, 4  ;;  %6585 = vst.msk [vmem:[%s11443_s9 + $0x50] sm:$0xf] %vm2234_vm1, %v6521_v29  ;;  %v3005_v27 = vsel %vm410_vm0, %v3004_v60, %v8878_v6  ;;  %v2926_v59 = vrot.slane %v6983_v51, 4  ;;  %v2931_v25 = vperm.slane %v2925_v54, %v7557_v57 }
 0x2e7   :  { %v3007_v39 = vsel %vm410_vm0, %v2991_v42, %v11541_v48  ;;  %6569 = vst.msk [vmem:[%s11443_s9 + $0x10] sm:$0xf] %vm2234_vm1, %v6505_v20  ;;  %v3011_v55 = vperm.slane %v3005_v27, %v7614_v21  ;;  %v3017_v50 = vsel %vm410_vm0, 0.0, %v3016_v53  ;;  %v11542_v62 = vrot.slane %v9006_v32, 4 }
 0x2e8   :  { %v3015_v5 = vperm.slane %v3007_v39, %v7614_v21  ;;  %v3019_v58 = vsel %vm410_vm0, 0.0, %v3018_v1  ;;  %v3850_v45 = vsel %vm410_vm0, %v3018_v1, %v2999_v38  ;;  %v2927_v6 = vsel %vm410_vm0, %v6993_v52, %v2926_v59 }
 0x2e9   :  { %v3855_v18 = vrot.slane %v3019_v58, 4  ;;  %v2936_v51 = vrot.slane %v2931_v25, 4  ;;  %v3020_v54 = vrot.slane %v3011_v55, 4  ;;  %v3854_v26 = vperm.slane %v3850_v45, %v7557_v57 }
 0x2ea   :  { %v3022_v33 = vrot.slane %v3015_v5, 4  ;;  %v2935_v49 = vperm.slane %v2927_v6, %v7557_v57  ;;  %v2939_v38 = vsel %vm410_vm0, %v2931_v25, %v11542_v62  ;;  %v11543_v5 = vrot.slane %v9010_v44, 4 }
 0x2eb   :  { %v3856_v42 = vsel %vm410_vm0, %v3855_v18, %v3017_v50  ;;  %v3021_v46 = vsel %vm410_vm0, 0.0, %v3020_v54  ;;  %v3874_v52 = vrot.slane %v3854_v26, 4  ;;  %v2937_v41 = vsel %vm410_vm0, %v2936_v51, %v9006_v32 }
 0x2ec   :  { %v3023_v13 = vsel %vm410_vm0, 0.0, %v3022_v33  ;;  %v3861_v19 = vsel %vm410_vm0, %v3022_v33, %v3011_v55  ;;  %v3860_v23 = vperm.slane %v3856_v42, %v7557_v57  ;;  %v2943_v35 = vperm.slane %v2937_v41, %v7614_v21  ;;  %v7007_v41 = vpop.permute.xlu1 %7006 }
 0x2ed   :  { %v3865_v3 = vperm.slane %v3861_v19, %v7557_v57  ;;  %v3866_v34 = vrot.slane %v3023_v13, 4  ;;  %v2947_v48 = vperm.slane %v2939_v38, %v7614_v21  ;;  %v2948_v20 = vrot.slane %v2935_v49, 4 }
 0x2ee   :  { %v3872_v29 = vrot.slane %v3860_v23, 4  ;;  %v3875_v60 = vsel %vm410_vm0, %v3860_v23, %v3874_v52  ;;  %v2951_v53 = vsel %vm410_vm0, %v2935_v49, %v11543_v5  ;;  %v2960_v1 = vrot.slane %v2943_v35, 4 }
 0x2ef   :  { %v3867_v43 = vsel %vm410_vm0, %v3866_v34, %v3021_v46  ;;  %v3886_v37 = vrot.slane %v3865_v3, 4  ;;  %v3883_v39 = vperm.slane %v3875_v60, %v7614_v21  ;;  %v2959_v25 = vperm.slane %v2951_v53, %v7614_v21 }
 0x2f0   :  { %v3871_v2 = vperm.slane %v3867_v43, %v7557_v57  ;;  %v3873_v32 = vsel %vm410_vm0, %v3872_v29, %v3854_v26  ;;  %v2949_v33 = vsel %vm410_vm0, %v2948_v20, %v9010_v44  ;;  %v2961_v6 = vsel %vm410_vm0, 0.0, %v2960_v1 }
 0x2f1   :  { %v3879_v55 = vperm.slane %v3873_v32, %v7614_v21  ;;  %v3902_v58 = vrot.slane %v3883_v39, 4  ;;  %v2955_v18 = vperm.slane %v2949_v33, %v7614_v21  ;;  %v2962_v51 = vrot.slane %v2947_v48, 4 }
 0x2f2   :  { %v3884_v27 = vrot.slane %v3871_v2, 4  ;;  %v3887_v59 = vsel %vm410_vm0, %v3871_v2, %v3886_v37  ;;  %v2966_v46 = vrot.slane %v2959_v25, 4  ;;  %v7009_v5 = vunpack.i.h.bf16 %v7007_v41 }
 0x2f3   :  { %v3895_v50 = vperm.slane %v3887_v59, %v7614_v21  ;;  %v3898_v13 = vrot.slane %v3879_v55, 4  ;;  %v2963_v34 = vsel %vm410_vm0, 0.0, %v2962_v51  ;;  %v2964_v49 = vrot.slane %v2955_v18, 4 }
 0x2f4   :  { %v3885_v45 = vsel %vm410_vm0, %v3884_v27, %v3865_v3  ;;  %v3796_v52 = vsel %vm410_vm0, %v2962_v51, %v2943_v35  ;;  %v2967_v38 = vsel %vm410_vm0, 0.0, %v2966_v46  ;;  %v3801_v60 = vrot.slane %v2963_v34, 4 }
 0x2f5   :  { %v3891_v54 = vperm.slane %v3885_v45, %v7614_v21  ;;  %v3900_v26 = vrot.slane %v3895_v50, 4  ;;  %v3903_v19 = vsel %vm410_vm0, %v3895_v50, %v3902_v58  ;;  %v2965_v62 = vsel %vm410_vm0, 0.0, %v2964_v49 }
 0x2f6   :  { %v4391_v42 = vpack.c.bf16 %v3903_v19, %v3903_v19  ;;  %v3800_v29 = vperm.slane %v3796_v52, %v7557_v57  ;;  %v3807_v48 = vsel %vm410_vm0, %v2966_v46, %v2955_v18  ;;  %v3812_v20 = vrot.slane %v2967_v38, 4 }
 0x2f7   :  { %v3896_v23 = vrot.slane %v3891_v54, 4  ;;  %v3899_v44 = vsel %vm410_vm0, %v3891_v54, %v3898_v13  ;;  %v3901_v3 = vsel %vm410_vm0, %v3900_v26, %v3883_v39  ;;  %v3811_v39 = vperm.slane %v3807_v48, %v7557_v57 }
 0x2f8   :  { %v4359_v43 = vpack.c.bf16 %v3899_v44, %v3899_v44  ;;  %v4375_v37 = vpack.c.bf16 %v3901_v3, %v3901_v3  ;;  %4455 = vst.msk [vmem:[%s11442_s8 + $0xdc] sm:$0xf] %vm2234_vm1, %v4391_v42  ;;  %v760_v53 = vrot.slane %v6998_v12, 4  ;;  %v3802_v1 = vsel %vm410_vm0, %v3801_v60, %v2961_v6 }
 0x2f9   :  { %v3897_v2 = vsel %vm410_vm0, %v3896_v23, %v3879_v55  ;;  %v3820_v32 = vrot.slane %v3800_v29, 4  ;;  %v7008_v27 = vunpack.i.l.bf16 %v7007_v41  ;;  %v3806_v59 = vperm.slane %v3802_v1, %v7557_v57 }
 0x2fa   :  { %v4343_v35 = vpack.c.bf16 %v3897_v2, %v3897_v2  ;;  %4423 = vst.msk [vmem:[%s11442_s8 + $0x5c] sm:$0xf] %vm2234_vm1, %v4359_v43  ;;  %v3813_v25 = vsel %vm410_vm0, %v3812_v20, %v2965_v62  ;;  %v3832_v55 = vrot.slane %v3811_v39, 4  ;;  %v814_v50 = vrot.slane %v7009_v5, 4 }
 0x2fb   :  { %4439 = vst.msk [vmem:[%s11442_s8 + $0x9c] sm:$0xf] %vm2234_vm1, %v4375_v37  ;;  %v3817_v58 = vperm.slane %v3813_v25, %v7557_v57  ;;  %v758_v33 = vrot.slane %v7008_v27, 4  ;;  %v761_v45 = vsel %vm410_vm0, %v7008_v27, %v760_v53  ;;  %v817_v18 = vsel %vm410_vm0, %v7009_v5, %v9703_v10 }
 0x2fc   :  { %4407 = vst.msk [vmem:[%s11442_s8 + $0x1c] sm:$0xf] %vm2234_vm1, %v4343_v35  ;;  %v3818_v6 = vrot.slane %v3806_v59, 4  ;;  %v3821_v51 = vsel %vm410_vm0, %v3806_v59, %v3820_v32  ;;  %v769_v54 = vperm.slane %v761_v45, %v7557_v57  ;;  %v815_v13 = vsel %vm410_vm0, %v814_v50, %v6999_v63 }
 0x2fd   :  { %v3829_v26 = vperm.slane %v3821_v51, %v7614_v21  ;;  %v3830_v19 = vrot.slane %v3817_v58, 4  ;;  %v3833_v42 = vsel %vm410_vm0, %v3817_v58, %v3832_v55  ;;  %v759_v34 = vsel %vm410_vm0, %v758_v33, %v6998_v12  ;;  %v9831_v33 = vpop.permute.xlu2 %7051 }
 0x2fe   :  { %v3819_v10 = vsel %vm410_vm0, %v3818_v6, %v3800_v29  ;;  %v3841_v49 = vperm.slane %v3833_v42, %v7614_v21  ;;  %v765_v46 = vperm.slane %v759_v34, %v7557_v57  ;;  %v782_v23 = vrot.slane %v769_v54, 4 }
 0x2ff   :  { %v3825_v44 = vperm.slane %v3819_v10, %v7614_v21  ;;  %v3831_v63 = vsel %vm410_vm0, %v3830_v19, %v3811_v39  ;;  %v3848_v3 = vrot.slane %v3829_v26, 4  ;;  %v11544_v52 = vrot.slane %v9293_v14, 4 }
 0x300   :  { %v3837_v31 = vperm.slane %v3831_v63, %v7614_v21  ;;  %v3846_v43 = vrot.slane %v3841_v49, 4  ;;  %v770_v12 = vrot.slane %v765_v46, 4  ;;  %v11545_v37 = vrot.slane %v9303_v11, 4 }
 0x301   :  { %v785_v41 = vsel %vm410_vm0, %v769_v54, %v11544_v52  ;;  %v3844_v38 = vrot.slane %v3825_v44, 4  ;;  %v3849_v2 = vsel %vm410_vm0, %v3841_v49, %v3848_v3  ;;  %v783_v60 = vsel %vm410_vm0, %v782_v23, %v9293_v14 }
 0x302   :  { %v773_v62 = vsel %vm410_vm0, %v765_v46, %v11545_v37  ;;  %v3842_v48 = vrot.slane %v3837_v31, 4  ;;  %v3847_v35 = vsel %vm410_vm0, %v3846_v43, %v3829_v26  ;;  %v4390_v39 = vpack.c.bf16 %v3849_v2, %v3849_v2 }
 0x303   :  { %v781_v29 = vperm.slane %v773_v62, %v7614_v21  ;;  %v771_v20 = vsel %vm410_vm0, %v770_v12, %v9303_v11  ;;  %v3845_v5 = vsel %vm410_vm0, %v3837_v31, %v3844_v38  ;;  %v4374_v53 = vpack.c.bf16 %v3847_v35, %v3847_v35 }
 0x304   :  { %v777_v1 = vperm.slane %v771_v20, %v7614_v21  ;;  %v789_v32 = vperm.slane %v783_v60, %v7614_v21  ;;  %v3843_v27 = vsel %vm410_vm0, %v3842_v48, %v3825_v44  ;;  %v4358_v59 = vpack.c.bf16 %v3845_v5, %v3845_v5  ;;  %4454 = vst.msk [vmem:[%s11442_s8 + $0xd8] sm:$0xf] %vm2234_vm1, %v4390_v39 }
 0x305   :  { %v793_v14 = vperm.slane %v785_v41, %v7614_v21  ;;  %v796_v25 = vrot.slane %v781_v29, 4  ;;  %v4342_v55 = vpack.c.bf16 %v3843_v27, %v3843_v27  ;;  %4438 = vst.msk [vmem:[%s11442_s8 + $0x98] sm:$0xf] %vm2234_vm1, %v4374_v53  ;;  %v821_v58 = vperm.slane %v815_v13, %v7557_v57 }
 0x306   :  { %v794_v11 = vrot.slane %v777_v1, 4  ;;  %v798_v50 = vrot.slane %v789_v32, 4  ;;  %4422 = vst.msk [vmem:[%s11442_s8 + $0x58] sm:$0xf] %vm2234_vm1, %v4358_v59  ;;  %v825_v51 = vperm.slane %v817_v18, %v7557_v57  ;;  %v11546_v42 = vrot.slane %v9086_v16, 4 }
 0x307   :  { %v797_v45 = vsel %vm410_vm0, 0.0, %v796_v25  ;;  %v800_v6 = vrot.slane %v793_v14, 4  ;;  %v1630_v54 = vsel %vm410_vm0, %v796_v25, %v777_v1  ;;  %4406 = vst.msk [vmem:[%s11442_s8 + $0x18] sm:$0xf] %vm2234_vm1, %v4342_v55  ;;  %v826_v19 = vrot.slane %v821_v58, 4  ;;  %v9875_v55 = vpop.permute.xlu2 %7056 }
 0x308   :  { %v795_v13 = vsel %vm410_vm0, 0.0, %v794_v11  ;;  %v799_v26 = vsel %vm410_vm0, 0.0, %v798_v50  ;;  %v829_v34 = vsel %vm410_vm0, %v821_v58, %v11546_v42  ;;  %v838_v49 = vrot.slane %v825_v51, 4 }
 0x309   :  { %v801_v10 = vsel %vm410_vm0, 0.0, %v800_v6  ;;  %v837_v18 = vperm.slane %v829_v34, %v7614_v21  ;;  %v11547_v46 = vrot.slane %v9157_v22, 4  ;;  %v827_v44 = vsel %vm410_vm0, %v826_v19, %v9086_v16 }
 0x30a   :  { %v1634_v3 = vperm.slane %v1630_v54, %v7557_v57  ;;  %v1635_v52 = vrot.slane %v797_v45, 4  ;;  %v833_v41 = vperm.slane %v827_v44, %v7614_v21  ;;  %v839_v31 = vsel %vm410_vm0, %v838_v49, %v9157_v22 }
 0x30b   :  { %v841_v23 = vsel %vm410_vm0, %v825_v51, %v11547_v46  ;;  %v852_v43 = vrot.slane %v837_v18, 4  ;;  %v1641_v12 = vsel %vm410_vm0, %v800_v6, %v789_v32  ;;  %v845_v37 = vperm.slane %v839_v31, %v7614_v21 }
 0x30c   :  { %v849_v63 = vperm.slane %v841_v23, %v7614_v21  ;;  %v1636_v38 = vsel %vm410_vm0, %v1635_v52, %v795_v13  ;;  %v1645_v16 = vperm.slane %v1641_v12, %v7557_v57  ;;  %v850_v2 = vrot.slane %v833_v41, 4 }
 0x30d   :  { %v853_v29 = vsel %vm410_vm0, 0.0, %v852_v43  ;;  %v1640_v60 = vperm.slane %v1636_v38, %v7557_v57  ;;  %v1646_v48 = vrot.slane %v801_v10, 4  ;;  %v854_v35 = vrot.slane %v845_v37, 4 }
 0x30e   :  { %v856_v62 = vrot.slane %v849_v63, 4  ;;  %v1654_v22 = vrot.slane %v1634_v3, 4  ;;  %v1666_v20 = vrot.slane %v1645_v16, 4  ;;  %v851_v5 = vsel %vm410_vm0, 0.0, %v850_v2 }
 0x30f   :  { %v1647_v53 = vsel %vm410_vm0, %v1646_v48, %v799_v26  ;;  %v1652_v1 = vrot.slane %v1640_v60, 4  ;;  %v1684_v32 = vsel %vm410_vm0, %v852_v43, %v833_v41  ;;  %v855_v27 = vsel %vm410_vm0, 0.0, %v854_v35 }
 0x310   :  { %v857_v39 = vsel %vm410_vm0, 0.0, %v856_v62  ;;  %v1651_v59 = vperm.slane %v1647_v53, %v7557_v57  ;;  %v1655_v14 = vsel %vm410_vm0, %v1640_v60, %v1654_v22  ;;  %v1688_v25 = vperm.slane %v1684_v32, %v7557_v57 }
 0x311   :  { %v1653_v11 = vsel %vm410_vm0, %v1652_v1, %v1634_v3  ;;  %v1663_v50 = vperm.slane %v1655_v14, %v7614_v21  ;;  %v1689_v58 = vrot.slane %v853_v29, 4  ;;  %v1695_v45 = vsel %vm410_vm0, %v856_v62, %v845_v37 }
 0x312   :  { %v1659_v6 = vperm.slane %v1653_v11, %v7614_v21  ;;  %v1664_v51 = vrot.slane %v1651_v59, 4  ;;  %v1667_v54 = vsel %vm410_vm0, %v1651_v59, %v1666_v20  ;;  %v1699_v13 = vperm.slane %v1695_v45, %v7557_v57 }
 0x313   :  { %v1675_v26 = vperm.slane %v1667_v54, %v7614_v21  ;;  %v1682_v19 = vrot.slane %v1663_v50, 4  ;;  %v1690_v42 = vsel %vm410_vm0, %v1689_v58, %v851_v5  ;;  %v1700_v34 = vrot.slane %v857_v39, 4 }
 0x314   :  { %v1665_v10 = vsel %vm410_vm0, %v1664_v51, %v1645_v16  ;;  %v1678_v18 = vrot.slane %v1659_v6, 4  ;;  %v1694_v49 = vperm.slane %v1690_v42, %v7557_v57  ;;  %v1708_v46 = vrot.slane %v1688_v25, 4 }
 0x315   :  { %v1671_v23 = vperm.slane %v1665_v10, %v7614_v21  ;;  %v1680_v44 = vrot.slane %v1675_v26, 4  ;;  %v1683_v63 = vsel %vm410_vm0, %v1675_v26, %v1682_v19  ;;  %v1701_v3 = vsel %vm410_vm0, %v1700_v34, %v855_v27  ;;  %v7017_v26 = vpop.permute.xlu0 %7016 }
 0x316   :  { %v1705_v52 = vperm.slane %v1701_v3, %v7557_v57  ;;  %v1706_v41 = vrot.slane %v1694_v49, 4  ;;  %v1709_v31 = vsel %vm410_vm0, %v1694_v49, %v1708_v46  ;;  %v1720_v43 = vrot.slane %v1699_v13, 4 }
 0x317   :  { %v1676_v12 = vrot.slane %v1671_v23, 4  ;;  %v1679_v37 = vsel %vm410_vm0, %v1671_v23, %v1678_v18  ;;  %v1681_v62 = vsel %vm410_vm0, %v1680_v44, %v1663_v50  ;;  %v1717_v38 = vperm.slane %v1709_v31, %v7614_v21  ;;  %v7012_v18 = vpop.permute.xlu1 %7011 }
 0x318   :  { %v1707_v16 = vsel %vm410_vm0, %v1706_v41, %v1688_v25  ;;  %v1718_v2 = vrot.slane %v1705_v52, 4  ;;  %v1721_v29 = vsel %vm410_vm0, %v1705_v52, %v1720_v43  ;;  %v2192_v60 = vpack.c.bf16 %v1679_v37, %v1679_v37  ;;  %v9907_v25 = vpop.permute.xlu2 %7066 }
 0x319   :  { %v1677_v48 = vsel %vm410_vm0, %v1676_v12, %v1659_v6  ;;  %v1713_v35 = vperm.slane %v1707_v16, %v7614_v21  ;;  %v1729_v39 = vperm.slane %v1721_v29, %v7614_v21  ;;  %v1736_v22 = vrot.slane %v1717_v38, 4 }
 0x31a   :  { %v1719_v20 = vsel %vm410_vm0, %v1718_v2, %v1699_v13  ;;  %v2176_v5 = vpack.c.bf16 %v1677_v48, %v1677_v48  ;;  %v2208_v53 = vpack.c.bf16 %v1681_v62, %v1681_v62  ;;  %v2224_v1 = vpack.c.bf16 %v1683_v63, %v1683_v63  ;;  %2257 = vst.msk [vmem:[%s11441_s7 + $0x58] sm:$0xf] %vm2234_vm1, %v2192_v60 }
 0x31b   :  { %v1725_v32 = vperm.slane %v1719_v20, %v7614_v21  ;;  %v1732_v27 = vrot.slane %v1713_v35, 4  ;;  %v1734_v59 = vrot.slane %v1729_v39, 4  ;;  %v1737_v14 = vsel %vm410_vm0, %v1729_v39, %v1736_v22 }
 0x31c   :  { %v7054_v11 = vunpack.i.h.bf16 %v9831_v33  ;;  %v7053_v50 = vunpack.i.l.bf16 %v9831_v33  ;;  %v7059_v58 = vunpack.i.h.bf16 %v9875_v55  ;;  %v2225_v45 = vpack.c.bf16 %v1737_v14, %v1737_v14  ;;  %2241 = vst.msk [vmem:[%s11441_s7 + $0x18] sm:$0xf] %vm2234_vm1, %v2176_v5 }
 0x31d   :  { %v7058_v6 = vunpack.i.l.bf16 %v9875_v55  ;;  %v1730_v51 = vrot.slane %v1725_v32, 4  ;;  %v1733_v54 = vsel %vm410_vm0, %v1725_v32, %v1732_v27  ;;  %v1735_v13 = vsel %vm410_vm0, %v1734_v59, %v1717_v38  ;;  %2273 = vst.msk [vmem:[%s11441_s7 + $0x98] sm:$0xf] %vm2234_vm1, %v2208_v53 }
 0x31e   :  { %v5115_v19 = vrot.slane %v9511_v15, 4  ;;  %v2193_v42 = vpack.c.bf16 %v1733_v54, %v1733_v54  ;;  %v2209_v34 = vpack.c.bf16 %v1735_v13, %v1735_v13  ;;  %2289 = vst.msk [vmem:[%s11441_s7 + $0xd8] sm:$0xf] %vm2234_vm1, %v2224_v1  ;;  %v7069_v10 = vunpack.i.h.bf16 %v9907_v25 }
 0x31f   :  { %v5159_v49 = vrot.slane %v9516_v0, 4  ;;  %v5103_v46 = vrot.slane %v9636_v28, 4  ;;  %v1731_v23 = vsel %vm410_vm0, %v1730_v51, %v1713_v35  ;;  %2290 = vst.msk [vmem:[%s11441_s7 + $0xdc] sm:$0xf] %vm2234_vm1, %v2225_v45  ;;  %v7068_v44 = vunpack.i.l.bf16 %v9907_v25 }
 0x320   :  { %v9939_v63 = vrot.slane %v7054_v11, 4  ;;  %v9943_v3 = vrot.slane %v7053_v50, 4  ;;  %v2177_v52 = vpack.c.bf16 %v1731_v23, %v1731_v23  ;;  %2258 = vst.msk [vmem:[%s11441_s7 + $0x5c] sm:$0xf] %vm2234_vm1, %v2193_v42  ;;  %v7019_v41 = vunpack.i.h.bf16 %v7017_v26  ;;  %v10000_v23 = vpop.permute.xlu2 %7086 }
 0x321   :  { %v928_v31 = vrot.slane %v7059_v58, 4  ;;  %v9953_v43 = vrot.slane %v7058_v6, 4  ;;  %2274 = vst.msk [vmem:[%s11441_s7 + $0x9c] sm:$0xf] %vm2234_vm1, %v2209_v34  ;;  %v7018_v12 = vunpack.i.l.bf16 %v7017_v26  ;;  %v7014_v37 = vunpack.i.h.bf16 %v7012_v18 }
 0x322   :  { %2242 = vst.msk [vmem:[%s11441_s7 + $0x1c] sm:$0xf] %vm2234_vm1, %v2177_v52  ;;  %v9963_v62 = vrot.slane %v7069_v10, 4  ;;  %v3416_v38 = vrot.slane %v7019_v41, 4  ;;  %v3419_v16 = vsel %vm410_vm0, %v7019_v41, %v3418_v24  ;;  %v7013_v2 = vunpack.i.l.bf16 %v7012_v18 }
 0x323   :  { %v9970_v29 = vrot.slane %v7068_v44, 4  ;;  %v9973_v60 = vsel %vm410_vm0, %v7069_v10, %v928_v31  ;;  %v3360_v48 = vrot.slane %v7018_v12, 4  ;;  %v11548_v35 = vrot.slane %v11535_v17, 4 }
 0x324   :  { %v3417_v22 = vsel %vm410_vm0, %v3416_v38, %v11539_v7  ;;  %v3430_v5 = vrot.slane %v7014_v37, 4  ;;  %v3373_v24 = vsel %vm410_vm0, %v9381_v36, %v7013_v2  ;;  %v3427_v1 = vperm.slane %v3419_v16, %v7557_v57 }
 0x325   :  { %v3363_v39 = vsel %vm410_vm0, %v7018_v12, %v11548_v35  ;;  %v3423_v53 = vperm.slane %v3417_v22, %v7557_v57  ;;  %v3361_v32 = vsel %vm410_vm0, %v3360_v48, %v11535_v17  ;;  %v3374_v27 = vrot.slane %v7013_v2, 4 }
 0x326   :  { %v3371_v20 = vperm.slane %v3363_v39, %v7557_v57  ;;  %v3367_v59 = vperm.slane %v3361_v32, %v7557_v57  ;;  %v3379_v45 = vperm.slane %v3373_v24, %v7557_v57  ;;  %v3429_v7 = vsel %vm410_vm0, %v9377_v61, %v7014_v37 }
 0x327   :  { %v3442_v51 = vrot.slane %v3423_v53, 4  ;;  %v11549_v54 = vunpack.i.l.bf16 %v9283_v4  ;;  %v11550_v13 = vunpack.i.h.bf16 %v9283_v4  ;;  %v3435_v17 = vperm.slane %v3429_v7, %v7557_v57 }
 0x328   :  { %v3398_v14 = vrot.slane %v3371_v20, 4  ;;  %v3386_v42 = vrot.slane %v3367_v59, 4  ;;  %v3384_v10 = vrot.slane %v3379_v45, 4  ;;  %v3454_v61 = vrot.slane %v3427_v1, 4 }
 0x329   :  { %v3375_v36 = vsel %vm410_vm0, %v11549_v54, %v3374_v27  ;;  %v3431_v26 = vsel %vm410_vm0, %v11550_v13, %v3430_v5  ;;  %v3440_v52 = vrot.slane %v3435_v17, 4  ;;  %v3443_v41 = vsel %vm410_vm0, %v3435_v17, %v3442_v51 }
 0x32a   :  { %v3383_v34 = vperm.slane %v3375_v36, %v7557_v57  ;;  %v3439_v18 = vperm.slane %v3431_v26, %v7557_v57  ;;  %v7089_v31 = vunpack.i.h.bf16 %v10000_v23  ;;  %v3385_v4 = vsel %vm410_vm0, %v3384_v10, %v3367_v59 }
 0x32b   :  { %v3387_v12 = vsel %vm410_vm0, %v3379_v45, %v3386_v42  ;;  %v3391_v16 = vperm.slane %v3385_v4, %v7614_v21  ;;  %v3441_v35 = vsel %vm410_vm0, %v3440_v52, %v3423_v53  ;;  %v3451_v5 = vperm.slane %v3443_v41, %v7614_v21 }
 0x32c   :  { %v3396_v37 = vrot.slane %v3383_v34, 4  ;;  %v3399_v38 = vsel %vm410_vm0, %v3383_v34, %v3398_v14  ;;  %v3395_v2 = vperm.slane %v3387_v12, %v7614_v21  ;;  %v3447_v22 = vperm.slane %v3441_v35, %v7614_v21 }
 0x32d   :  { %v3407_v48 = vperm.slane %v3399_v38, %v7614_v21  ;;  %v3452_v24 = vrot.slane %v3439_v18, 4  ;;  %v3408_v27 = vrot.slane %v3391_v16, 4  ;;  %v3455_v7 = vsel %vm410_vm0, %v3439_v18, %v3454_v61 }
 0x32e   :  { %v3397_v39 = vsel %vm410_vm0, %v3396_v37, %v3371_v20  ;;  %v3410_v59 = vrot.slane %v3395_v2, 4  ;;  %v3464_v51 = vrot.slane %v3447_v22, 4  ;;  %v3466_v54 = vrot.slane %v3451_v5, 4 }
 0x32f   :  { %v3403_v32 = vperm.slane %v3397_v39, %v7614_v21  ;;  %v3414_v14 = vrot.slane %v3407_v48, 4  ;;  %v3453_v45 = vsel %vm410_vm0, %v3452_v24, %v3427_v1  ;;  %v3409_v53 = vsel %vm410_vm0, 0.0, %v3408_v27 }
 0x330   :  { %v3411_v20 = vsel %vm410_vm0, 0.0, %v3410_v59  ;;  %v3459_v26 = vperm.slane %v3453_v45, %v7614_v21  ;;  %v3463_v17 = vperm.slane %v3455_v7, %v7614_v21  ;;  %v3465_v42 = vsel %vm410_vm0, 0.0, %v3464_v51 }
 0x331   :  { %v3412_v36 = vrot.slane %v3403_v32, 4  ;;  %v3415_v13 = vsel %vm410_vm0, 0.0, %v3414_v14  ;;  %v3467_v34 = vsel %vm410_vm0, 0.0, %v3466_v54  ;;  %v4228_v10 = vsel %vm410_vm0, %v3410_v59, %v3391_v16 }
 0x332   :  { %v4233_v18 = vrot.slane %v3411_v20, 4  ;;  %v4239_v61 = vsel %vm410_vm0, %v3414_v14, %v3403_v32  ;;  %v3468_v52 = vrot.slane %v3459_v26, 4  ;;  %v3470_v41 = vrot.slane %v3463_v17, 4 }
 0x333   :  { %v3413_v1 = vsel %vm410_vm0, 0.0, %v3412_v36  ;;  %v4232_v4 = vperm.slane %v4228_v10, %v7557_v57  ;;  %v4243_v12 = vperm.slane %v4239_v61, %v7557_v57  ;;  %v4244_v38 = vrot.slane %v3415_v13, 4 }
 0x334   :  { %v4234_v37 = vsel %vm410_vm0, %v4233_v18, %v3409_v53  ;;  %v4282_v2 = vsel %vm410_vm0, %v3466_v54, %v3447_v22  ;;  %v4287_v48 = vrot.slane %v3467_v34, 4  ;;  %v3469_v35 = vsel %vm410_vm0, 0.0, %v3468_v52 }
 0x335   :  { %v3471_v39 = vsel %vm410_vm0, 0.0, %v3470_v41  ;;  %v4238_v16 = vperm.slane %v4234_v37, %v7557_v57  ;;  %v4252_v5 = vrot.slane %v4232_v4, 4  ;;  %v4245_v24 = vsel %vm410_vm0, %v4244_v38, %v3413_v1 }
 0x336   :  { %v4264_v32 = vrot.slane %v4243_v12, 4  ;;  %v4286_v27 = vperm.slane %v4282_v2, %v7557_v57  ;;  %v4288_v59 = vsel %vm410_vm0, %v4287_v48, %v3465_v42  ;;  %v4249_v14 = vperm.slane %v4245_v24, %v7557_v57 }
 0x337   :  { %v4250_v45 = vrot.slane %v4238_v16, 4  ;;  %v4253_v22 = vsel %vm410_vm0, %v4238_v16, %v4252_v5  ;;  %v4292_v7 = vperm.slane %v4288_v59, %v7557_v57  ;;  %v4293_v54 = vsel %vm410_vm0, %v3470_v41, %v3459_v26 }
 0x338   :  { %v4261_v51 = vperm.slane %v4253_v22, %v7614_v21  ;;  %v4298_v53 = vrot.slane %v3471_v39, 4  ;;  %v4306_v20 = vrot.slane %v4286_v27, 4  ;;  %v4262_v13 = vrot.slane %v4249_v14, 4 }
 0x339   :  { %v4251_v36 = vsel %vm410_vm0, %v4250_v45, %v4232_v4  ;;  %v4265_v17 = vsel %vm410_vm0, %v4249_v14, %v4264_v32  ;;  %v4297_v42 = vperm.slane %v4293_v54, %v7557_v57  ;;  %v4304_v52 = vrot.slane %v4292_v7, 4 }
 0x33a   :  { %v4257_v34 = vperm.slane %v4251_v36, %v7614_v21  ;;  %v4273_v1 = vperm.slane %v4265_v17, %v7614_v21  ;;  %v4280_v10 = vrot.slane %v4261_v51, 4  ;;  %v4299_v18 = vsel %vm410_vm0, %v4298_v53, %v3469_v35 }
 0x33b   :  { %v4263_v61 = vsel %vm410_vm0, %v4262_v13, %v4243_v12  ;;  %v4303_v26 = vperm.slane %v4299_v18, %v7557_v57  ;;  %v4307_v41 = vsel %vm410_vm0, %v4292_v7, %v4306_v20  ;;  %v4305_v48 = vsel %vm410_vm0, %v4304_v52, %v4286_v27 }
 0x33c   :  { %v4269_v4 = vperm.slane %v4263_v61, %v7614_v21  ;;  %v4276_v37 = vrot.slane %v4257_v34, 4  ;;  %v4278_v38 = vrot.slane %v4273_v1, 4  ;;  %v4281_v2 = vsel %vm410_vm0, %v4273_v1, %v4280_v10  ;;  %v7027_v10 = vpop.permute.xlu0 %7026  ;;  %v7037_v61 = vpop.permute.xlu1 %7036 }
 0x33d   :  { %v4315_v39 = vperm.slane %v4307_v41, %v7614_v21  ;;  %v4316_v16 = vrot.slane %v4303_v26, 4  ;;  %v4318_v5 = vrot.slane %v4297_v42, 4  ;;  %v4311_v32 = vperm.slane %v4305_v48, %v7614_v21 }
 0x33e   :  { %v4274_v35 = vrot.slane %v4269_v4, 4  ;;  %v4277_v12 = vsel %vm410_vm0, %v4269_v4, %v4276_v37  ;;  %v4279_v24 = vsel %vm410_vm0, %v4278_v38, %v4261_v51  ;;  %v873_v51 = vsel %vm410_vm0, %v7068_v44, %v9953_v43 }
 0x33f   :  { %v4317_v59 = vsel %vm410_vm0, %v4316_v16, %v4297_v42  ;;  %v4319_v14 = vsel %vm410_vm0, %v4303_v26, %v4318_v5  ;;  %v4334_v45 = vrot.slane %v4315_v39, 4  ;;  %v4366_v22 = vpack.c.bf16 %v4277_v12, %v4277_v12 }
 0x340   :  { %v4275_v7 = vsel %vm410_vm0, %v4274_v35, %v4257_v34  ;;  %v4323_v27 = vperm.slane %v4317_v59, %v7614_v21  ;;  %v4327_v54 = vperm.slane %v4319_v14, %v7614_v21  ;;  %v4330_v53 = vrot.slane %v4311_v32, 4 }
 0x341   :  { %v4350_v20 = vpack.c.bf16 %v4275_v7, %v4275_v7  ;;  %v4382_v36 = vpack.c.bf16 %v4279_v24, %v4279_v24  ;;  %v4398_v13 = vpack.c.bf16 %v4281_v2, %v4281_v2  ;;  %4430 = vst.msk [vmem:[%s11442_s8 + $0x78] sm:$0xf] %vm2234_vm1, %v4366_v22  ;;  %v871_v25 = vsel %vm410_vm0, %v9970_v29, %v7058_v6  ;;  %v11551_v2 = vld [vmem:[#allocation23_spill] sm:$0xff] }
 0x342   :  { %v4328_v17 = vrot.slane %v4323_v27, 4  ;;  %v4331_v42 = vsel %vm410_vm0, %v4323_v27, %v4330_v53  ;;  %v4332_v34 = vrot.slane %v4327_v54, 4  ;;  %v4335_v1 = vsel %vm410_vm0, %v4327_v54, %v4334_v45 }
 0x343   :  { %v927_v44 = vsel %vm410_vm0, %v9963_v62, %v7059_v58  ;;  %v10083_v43 = vperm.slane %v9973_v60, %v7557_v57  ;;  %v4367_v18 = vpack.c.bf16 %v4331_v42, %v4331_v42  ;;  %4414 = vst.msk [vmem:[%s11442_s8 + $0x38] sm:$0xf] %vm2234_vm1, %v4350_v20  ;;  %v10090_v26 = vperm.slane %v873_v51, %v7557_v57 }
 0x344   :  { %v4329_v6 = vsel %vm410_vm0, %v4328_v17, %v4311_v32  ;;  %v4333_v55 = vsel %vm410_vm0, %v4332_v34, %v4315_v39  ;;  %4446 = vst.msk [vmem:[%s11442_s8 + $0xb8] sm:$0xf] %vm2234_vm1, %v4382_v36  ;;  %v5469_v58 = vrot.slane %v7089_v31, 4  ;;  %v4399_v60 = vpack.c.bf16 %v4335_v1, %v4335_v1  ;;  %v11552_v39 = vld [vmem:[#allocation24_spill] sm:$0xff] }
 0x345   :  { %v4351_v62 = vpack.c.bf16 %v4329_v6, %v4329_v6  ;;  %v4383_v29 = vpack.c.bf16 %v4333_v55, %v4333_v55  ;;  %4431 = vst.msk [vmem:[%s11442_s8 + $0x7c] sm:$0xf] %vm2234_vm1, %v4367_v18  ;;  %v7029_v52 = vunpack.i.h.bf16 %v7027_v10  ;;  %v10105_v41 = vperm.slane %v871_v25, %v7557_v57 }
 0x346   :  { %v10108_v4 = vperm.slane %v927_v44, %v7557_v57  ;;  %4462 = vst.msk [vmem:[%s11442_s8 + $0xf8] sm:$0xf] %vm2234_vm1, %v4398_v13  ;;  %v7028_v37 = vunpack.i.l.bf16 %v7027_v10  ;;  %v7039_v38 = vunpack.i.h.bf16 %v7037_v61  ;;  %v5415_v48 = vrot.slane %v11551_v2, 4 }
 0x347   :  { %4415 = vst.msk [vmem:[%s11442_s8 + $0x3c] sm:$0xf] %vm2234_vm1, %v4351_v62  ;;  %v5471_v16 = vrot.slane %v11552_v39, 4  ;;  %v5147_v5 = vrot.slane %v7029_v52, 4  ;;  %v7038_v35 = vunpack.i.l.bf16 %v7037_v61  ;;  %v894_v12 = vrot.slane %v10090_v26, 4 }
 0x348   :  { %v950_v24 = vrot.slane %v10083_v43, 4  ;;  %4447 = vst.msk [vmem:[%s11442_s8 + $0xbc] sm:$0xf] %vm2234_vm1, %v4383_v29  ;;  %v5091_v32 = vrot.slane %v7028_v37, 4  ;;  %v5145_v59 = vrot.slane %v7039_v38, 4  ;;  %v5470_v14 = vsel %vm410_vm0, %v5469_v58, %v11552_v39 }
 0x349   :  { %4463 = vst.msk [vmem:[%s11442_s8 + $0xfc] sm:$0xf] %vm2234_vm1, %v4399_v60  ;;  %v5472_v45 = vsel %vm410_vm0, %v7089_v31, %v5471_v16  ;;  %v5089_v22 = vrot.slane %v7038_v35, 4  ;;  %v5148_v7 = vsel %vm410_vm0, %v7039_v38, %v5147_v5  ;;  %v882_v27 = vrot.slane %v10105_v41, 4 }
 0x34a   :  { %v938_v54 = vrot.slane %v10108_v4, 4  ;;  %v5092_v53 = vsel %vm410_vm0, %v7038_v35, %v5091_v32  ;;  %v5146_v51 = vsel %vm410_vm0, %v5145_v59, %v7029_v52  ;;  %v5156_v17 = vperm.slane %v5148_v7, %v7557_v57 }
 0x34b   :  { %v5090_v20 = vsel %vm410_vm0, %v5089_v22, %v7028_v37  ;;  %v5100_v36 = vperm.slane %v5092_v53, %v7557_v57  ;;  %v5152_v13 = vperm.slane %v5146_v51, %v7557_v57  ;;  %v10145_v31 = vperm.slane %v5470_v14, %v7557_v57 }
 0x34c   :  { %v10148_v42 = vperm.slane %v5472_v45, %v7557_v57  ;;  %v7088_v34 = vunpack.i.l.bf16 %v10000_v23  ;;  %v5096_v1 = vperm.slane %v5090_v20, %v7557_v57  ;;  %v5169_v60 = vrot.slane %v5156_v17, 4 }
 0x34d   :  { %v5113_v10 = vrot.slane %v5100_v36, 4  ;;  %v5116_v25 = vsel %vm410_vm0, %v5100_v36, %v5115_v19  ;;  %v5157_v44 = vrot.slane %v5152_v13, 4  ;;  %v5160_v18 = vsel %vm410_vm0, %v5152_v13, %v5159_v49 }
 0x34e   :  { %v5101_v61 = vrot.slane %v5096_v1, 4  ;;  %v5104_v6 = vsel %vm410_vm0, %v5096_v1, %v5103_v46  ;;  %v5124_v55 = vperm.slane %v5116_v25, %v7614_v21  ;;  %v5168_v58 = vperm.slane %v5160_v18, %v7614_v21 }
 0x34f   :  { %v5112_v62 = vperm.slane %v5104_v6, %v7614_v21  ;;  %v5114_v29 = vsel %vm410_vm0, %v5113_v10, %v9511_v15  ;;  %v5158_v19 = vsel %vm410_vm0, %v5157_v44, %v9516_v0  ;;  %v5170_v16 = vsel %vm410_vm0, %v5169_v60, %v9503_v47 }
 0x350   :  { %v5102_v49 = vsel %vm410_vm0, %v5101_v61, %v9636_v28  ;;  %v5120_v52 = vperm.slane %v5114_v29, %v7614_v21  ;;  %v5131_v37 = vrot.slane %v5124_v55, 4  ;;  %v5164_v46 = vperm.slane %v5158_v19, %v7614_v21 }
 0x351   :  { %v5108_v38 = vperm.slane %v5102_v49, %v7614_v21  ;;  %v5127_v39 = vrot.slane %v5112_v62, 4  ;;  %v5172_v15 = vsel %vm410_vm0, %v5156_v17, %v5171_v8  ;;  %v5176_v28 = vperm.slane %v5170_v16, %v7614_v21 }
 0x352   :  { %v5129_v0 = vrot.slane %v5120_v52, 4  ;;  %v5132_v5 = vsel %vm410_vm0, 0.0, %v5131_v37  ;;  %v5180_v35 = vperm.slane %v5172_v15, %v7614_v21  ;;  %v5181_v14 = vrot.slane %v5164_v46, 4 }
 0x353   :  { %v5125_v32 = vrot.slane %v5108_v38, 4  ;;  %v5128_v59 = vsel %vm410_vm0, 0.0, %v5127_v39  ;;  %v5183_v45 = vrot.slane %v5168_v58, 4  ;;  %v5185_v7 = vrot.slane %v5176_v28, 4 }
 0x354   :  { %v5130_v22 = vsel %vm410_vm0, 0.0, %v5129_v0  ;;  %v5187_v53 = vrot.slane %v5180_v35, 4  ;;  %v5961_v47 = vsel %vm410_vm0, %v5127_v39, %v5108_v38  ;;  %v5182_v51 = vsel %vm410_vm0, 0.0, %v5181_v14 }
 0x355   :  { %v5126_v8 = vsel %vm410_vm0, 0.0, %v5125_v32  ;;  %v5184_v20 = vsel %vm410_vm0, 0.0, %v5183_v45  ;;  %v5965_v36 = vperm.slane %v5961_v47, %v7557_v57  ;;  %v5186_v13 = vsel %vm410_vm0, 0.0, %v5185_v7 }
 0x356   :  { %v5188_v17 = vsel %vm410_vm0, 0.0, %v5187_v53  ;;  %v5966_v1 = vrot.slane %v5128_v59, 4  ;;  %v5972_v10 = vsel %vm410_vm0, %v5131_v37, %v5120_v52  ;;  %v5977_v44 = vrot.slane %v5132_v5, 4 }
 0x357   :  { %v5976_v25 = vperm.slane %v5972_v10, %v7557_v57  ;;  %v5985_v18 = vrot.slane %v5965_v36, 4  ;;  %v6015_v61 = vsel %vm410_vm0, %v5183_v45, %v5164_v46  ;;  %v6020_v58 = vrot.slane %v5184_v20, 4 }
 0x358   :  { %v5967_v6 = vsel %vm410_vm0, %v5966_v1, %v5126_v8  ;;  %v6019_v55 = vperm.slane %v6015_v61, %v7557_v57  ;;  %v6026_v62 = vsel %vm410_vm0, %v5187_v53, %v5176_v28  ;;  %v5978_v19 = vsel %vm410_vm0, %v5977_v44, %v5130_v22 }
 0x359   :  { %v5971_v29 = vperm.slane %v5967_v6, %v7557_v57  ;;  %v5997_v60 = vrot.slane %v5976_v25, 4  ;;  %v6030_v49 = vperm.slane %v6026_v62, %v7557_v57  ;;  %v5982_v52 = vperm.slane %v5978_v19, %v7557_v57 }
 0x35a   :  { %v6021_v37 = vsel %vm410_vm0, %v6020_v58, %v5182_v51  ;;  %v6031_v38 = vrot.slane %v5188_v17, 4  ;;  %v6039_v46 = vrot.slane %v6019_v55, 4  ;;  %v5413_v7 = vrot.slane %v7088_v34, 4 }
 0x35b   :  { %v5983_v39 = vrot.slane %v5971_v29, 4  ;;  %v5986_v16 = vsel %vm410_vm0, %v5971_v29, %v5985_v18  ;;  %v6025_v15 = vperm.slane %v6021_v37, %v7557_v57  ;;  %v6051_v0 = vrot.slane %v6030_v49, 4 }
 0x35c   :  { %v5994_v5 = vperm.slane %v5986_v16, %v7614_v21  ;;  %v5995_v28 = vrot.slane %v5982_v52, 4  ;;  %v5998_v35 = vsel %vm410_vm0, %v5982_v52, %v5997_v60  ;;  %v6032_v32 = vsel %vm410_vm0, %v6031_v38, %v5186_v13  ;;  %v7047_v38 = vpop.permute.xlu0 %7046 }
 0x35d   :  { %v5984_v59 = vsel %vm410_vm0, %v5983_v39, %v5965_v36  ;;  %v6006_v14 = vperm.slane %v5998_v35, %v7614_v21  ;;  %v6036_v45 = vperm.slane %v6032_v32, %v7557_v57  ;;  %v6037_v22 = vrot.slane %v6025_v15, 4 }
 0x35e   :  { %v5990_v53 = vperm.slane %v5984_v59, %v7614_v21  ;;  %v5996_v47 = vsel %vm410_vm0, %v5995_v28, %v5976_v25  ;;  %v6040_v8 = vsel %vm410_vm0, %v6025_v15, %v6039_v46  ;;  %v6013_v1 = vrot.slane %v5994_v5, 4  ;;  %v11553_v28 = vld [vmem:[#allocation17_spill] sm:$0xff] }
 0x35f   :  { %v6002_v51 = vperm.slane %v5996_v47, %v7614_v21  ;;  %v6011_v20 = vrot.slane %v6006_v14, 4  ;;  %v6038_v13 = vsel %vm410_vm0, %v6037_v22, %v6019_v55  ;;  %v6048_v36 = vperm.slane %v6040_v8, %v7614_v21 }
 0x360   :  { %v6009_v17 = vrot.slane %v5990_v53, 4  ;;  %v6044_v10 = vperm.slane %v6038_v13, %v7614_v21  ;;  %v6049_v44 = vrot.slane %v6036_v45, 4  ;;  %v6052_v6 = vsel %vm410_vm0, %v6036_v45, %v6051_v0 }
 0x361   :  { %v6007_v18 = vrot.slane %v6002_v51, 4  ;;  %v6012_v61 = vsel %vm410_vm0, %v6011_v20, %v5994_v5  ;;  %v6067_v25 = vrot.slane %v6048_v36, 4  ;;  %v6060_v29 = vperm.slane %v6052_v6, %v7614_v21 }
 0x362   :  { %v6010_v58 = vsel %vm410_vm0, %v6002_v51, %v6009_v17  ;;  %v6050_v62 = vsel %vm410_vm0, %v6049_v44, %v6030_v49  ;;  %v6063_v55 = vrot.slane %v6044_v10, 4  ;;  %v6539_v37 = vpack.c.bf16 %v6012_v61, %v6012_v61 }
 0x363   :  { %v6008_v19 = vsel %vm410_vm0, %v6007_v18, %v5990_v53  ;;  %v6056_v60 = vperm.slane %v6050_v62, %v7614_v21  ;;  %v6523_v52 = vpack.c.bf16 %v6010_v58, %v6010_v58  ;;  %v5416_v46 = vsel %vm410_vm0, %v7088_v34, %v5415_v48  ;;  %v11554_v48 = vld [vmem:[#allocation19_spill] sm:$0xff] }
 0x364   :  { %v6014_v39 = vsel %vm410_vm0, %v6006_v14, %v6013_v1  ;;  %v6065_v16 = vrot.slane %v6060_v29, 4  ;;  %v6507_v49 = vpack.c.bf16 %v6008_v19, %v6008_v19  ;;  %v6068_v5 = vsel %vm410_vm0, %v6060_v29, %v6067_v25  ;;  %v7042_v14 = vpop.permute.xlu1 %7041  ;;  %6603 = vst.msk [vmem:[%s11443_s9 + $0x98] sm:$0xf] %vm2234_vm1, %v6539_v37 }
 0x365   :  { %v6061_v15 = vrot.slane %v6056_v60, 4  ;;  %v6064_v0 = vsel %vm410_vm0, %v6056_v60, %v6063_v55  ;;  %6587 = vst.msk [vmem:[%s11443_s9 + $0x58] sm:$0xf] %vm2234_vm1, %v6523_v52  ;;  %v3026_v35 = vrot.slane %v11553_v28, 4  ;;  %v3082_v34 = vrot.slane %v11554_v48, 4 }
 0x366   :  { %v6066_v23 = vsel %vm410_vm0, %v6065_v16, %v6048_v36  ;;  %v6524_v32 = vpack.c.bf16 %v6064_v0, %v6064_v0  ;;  %6571 = vst.msk [vmem:[%s11443_s9 + $0x18] sm:$0xf] %vm2234_vm1, %v6507_v49  ;;  %v7049_v59 = vunpack.i.h.bf16 %v7047_v38  ;;  %v6555_v53 = vpack.c.bf16 %v6014_v39, %v6014_v39 }
 0x367   :  { %v6062_v45 = vsel %vm410_vm0, %v6061_v15, %v6044_v10  ;;  %v6540_v22 = vpack.c.bf16 %v6066_v23, %v6066_v23  ;;  %v7048_v47 = vunpack.i.l.bf16 %v7047_v38  ;;  %v6556_v51 = vpack.c.bf16 %v6068_v5, %v6068_v5 }
 0x368   :  { %v6508_v8 = vpack.c.bf16 %v6062_v45, %v6062_v45  ;;  %6588 = vst.msk [vmem:[%s11443_s9 + $0x5c] sm:$0xf] %vm2234_vm1, %v6524_v32  ;;  %v3080_v20 = vrot.slane %v7049_v59, 4  ;;  %v3083_v13 = vsel %vm410_vm0, %v7049_v59, %v3082_v34  ;;  %v5414_v36 = vsel %vm410_vm0, %v5413_v7, %v11551_v2 }
 0x369   :  { %6604 = vst.msk [vmem:[%s11443_s9 + $0x9c] sm:$0xf] %vm2234_vm1, %v6540_v22  ;;  %v3024_v17 = vrot.slane %v7048_v47, 4  ;;  %v3027_v1 = vsel %vm410_vm0, %v7048_v47, %v3026_v35  ;;  %v7044_v10 = vunpack.i.h.bf16 %v7042_v14  ;;  %v10262_v44 = vperm.slane %v5416_v46, %v7557_v57 }
 0x36a   :  { %6572 = vst.msk [vmem:[%s11443_s9 + $0x1c] sm:$0xf] %vm2234_vm1, %v6508_v8  ;;  %v3081_v2 = vsel %vm410_vm0, %v3080_v20, %v11554_v48  ;;  %v3091_v7 = vperm.slane %v3083_v13, %v7557_v57  ;;  %v7043_v18 = vunpack.i.l.bf16 %v7042_v14  ;;  %v3035_v25 = vperm.slane %v3027_v1, %v7557_v57 }
 0x36b   :  { %6619 = vst.msk [vmem:[%s11443_s9 + $0xd8] sm:$0xf] %vm2234_vm1, %v6555_v53  ;;  %v3087_v61 = vperm.slane %v3081_v2, %v7557_v57  ;;  %v3025_v6 = vsel %vm410_vm0, %v3024_v17, %v11553_v28  ;;  %v3094_v58 = vrot.slane %v7044_v10, 4  ;;  %v10280_v62 = vperm.slane %v5414_v36, %v7557_v57 }
 0x36c   :  { %6620 = vst.msk [vmem:[%s11443_s9 + $0xdc] sm:$0xf] %vm2234_vm1, %v6556_v51  ;;  %v3031_v29 = vperm.slane %v3025_v6, %v7557_v57  ;;  %v3037_v55 = vsel %vm410_vm0, %v9943_v3, %v7043_v18  ;;  %v3038_v19 = vrot.slane %v7043_v18, 4  ;;  %v3093_v37 = vsel %vm410_vm0, %v9939_v63, %v7044_v10 }
 0x36d   :  { %v3106_v60 = vrot.slane %v3087_v61, 4  ;;  %v3043_v52 = vperm.slane %v3037_v55, %v7557_v57  ;;  %v3095_v38 = vsel %vm410_vm0, %v7054_v11, %v3094_v58  ;;  %v3099_v16 = vperm.slane %v3093_v37, %v7557_v57 }
 0x36e   :  { %v3050_v46 = vrot.slane %v3031_v29, 4  ;;  %v3039_v39 = vsel %vm410_vm0, %v7053_v50, %v3038_v19  ;;  %v3103_v3 = vperm.slane %v3095_v38, %v7557_v57  ;;  %v3118_v49 = vrot.slane %v3091_v7, 4 }
 0x36f   :  { %v3062_v15 = vrot.slane %v3035_v25, 4  ;;  %v3047_v0 = vperm.slane %v3039_v39, %v7557_v57  ;;  %v3048_v5 = vrot.slane %v3043_v52, 4  ;;  %v3104_v28 = vrot.slane %v3099_v16, 4 }
 0x370   :  { %v3051_v63 = vsel %vm410_vm0, %v3043_v52, %v3050_v46  ;;  %v3107_v35 = vsel %vm410_vm0, %v3099_v16, %v3106_v60  ;;  %v3116_v11 = vrot.slane %v3103_v3, 4  ;;  %v3119_v13 = vsel %vm410_vm0, %v3103_v3, %v3118_v49 }
 0x371   :  { %v3049_v23 = vsel %vm410_vm0, %v3048_v5, %v3031_v29  ;;  %v3059_v33 = vperm.slane %v3051_v63, %v7614_v21  ;;  %v3060_v50 = vrot.slane %v3047_v0, 4  ;;  %v3063_v32 = vsel %vm410_vm0, %v3047_v0, %v3062_v15 }
 0x372   :  { %v3055_v48 = vperm.slane %v3049_v23, %v7614_v21  ;;  %v3071_v34 = vperm.slane %v3063_v32, %v7614_v21  ;;  %v3105_v59 = vsel %vm410_vm0, %v3104_v28, %v3087_v61  ;;  %v3115_v14 = vperm.slane %v3107_v35, %v7614_v21 }
 0x373   :  { %v3061_v45 = vsel %vm410_vm0, %v3060_v50, %v3035_v25  ;;  %v3074_v22 = vrot.slane %v3059_v33, 4  ;;  %v3111_v53 = vperm.slane %v3105_v59, %v7614_v21  ;;  %v3117_v47 = vsel %vm410_vm0, %v3116_v11, %v3091_v7 }
 0x374   :  { %v3067_v8 = vperm.slane %v3061_v45, %v7614_v21  ;;  %v3072_v51 = vrot.slane %v3055_v48, 4  ;;  %v3078_v20 = vrot.slane %v3071_v34, 4  ;;  %v3123_v17 = vperm.slane %v3117_v47, %v7614_v21 }
 0x375   :  { %v3075_v36 = vsel %vm410_vm0, 0.0, %v3074_v22  ;;  %v3127_v1 = vperm.slane %v3119_v13, %v7614_v21  ;;  %v3128_v10 = vrot.slane %v3111_v53, 4  ;;  %v3130_v6 = vrot.slane %v3115_v14, 4 }
 0x376   :  { %v3073_v2 = vsel %vm410_vm0, 0.0, %v3072_v51  ;;  %v3076_v18 = vrot.slane %v3067_v8, 4  ;;  %v3079_v61 = vsel %vm410_vm0, 0.0, %v3078_v20  ;;  %v3132_v25 = vrot.slane %v3123_v17, 4 }
 0x377   :  { %v3129_v7 = vsel %vm410_vm0, 0.0, %v3128_v10  ;;  %v3134_v58 = vrot.slane %v3127_v1, 4  ;;  %v3904_v29 = vsel %vm410_vm0, %v3074_v22, %v3055_v48  ;;  %v3131_v19 = vsel %vm410_vm0, 0.0, %v3130_v6 }
 0x378   :  { %v3077_v55 = vsel %vm410_vm0, 0.0, %v3076_v18  ;;  %v3908_v60 = vperm.slane %v3904_v29, %v7557_v57  ;;  %v3909_v52 = vrot.slane %v3075_v36, 4  ;;  %v3133_v37 = vsel %vm410_vm0, 0.0, %v3132_v25 }
 0x379   :  { %v3135_v38 = vsel %vm410_vm0, 0.0, %v3134_v58  ;;  %v3915_v46 = vsel %vm410_vm0, %v3078_v20, %v3067_v8  ;;  %v3920_v39 = vrot.slane %v3079_v61, 4  ;;  %v3958_v15 = vsel %vm410_vm0, %v3130_v6, %v3111_v53 }
 0x37a   :  { %v3910_v16 = vsel %vm410_vm0, %v3909_v52, %v3073_v2  ;;  %v3919_v3 = vperm.slane %v3915_v46, %v7557_v57  ;;  %v3928_v49 = vrot.slane %v3908_v60, 4  ;;  %v3962_v63 = vperm.slane %v3958_v15, %v7557_v57 }
 0x37b   :  { %v3914_v0 = vperm.slane %v3910_v16, %v7557_v57  ;;  %v3921_v5 = vsel %vm410_vm0, %v3920_v39, %v3077_v55  ;;  %v3963_v28 = vrot.slane %v3131_v19, 4  ;;  %v3969_v23 = vsel %vm410_vm0, %v3134_v58, %v3123_v17 }
 0x37c   :  { %v3925_v35 = vperm.slane %v3921_v5, %v7557_v57  ;;  %v3940_v11 = vrot.slane %v3919_v3, 4  ;;  %v3974_v33 = vrot.slane %v3135_v38, 4  ;;  %v3973_v34 = vperm.slane %v3969_v23, %v7557_v57 }
 0x37d   :  { %v3926_v50 = vrot.slane %v3914_v0, 4  ;;  %v3929_v32 = vsel %vm410_vm0, %v3914_v0, %v3928_v49  ;;  %v3964_v48 = vsel %vm410_vm0, %v3963_v28, %v3129_v7  ;;  %v3982_v51 = vrot.slane %v3962_v63, 4  ;;  %v7062_v49 = vpop.permute.xlu0 %7061 }
 0x37e   :  { %v3937_v59 = vperm.slane %v3929_v32, %v7614_v21  ;;  %v3938_v14 = vrot.slane %v3925_v35, 4  ;;  %v3941_v45 = vsel %vm410_vm0, %v3925_v35, %v3940_v11  ;;  %v3968_v22 = vperm.slane %v3964_v48, %v7557_v57  ;;  %v11555_v11 = vld [vmem:[#allocation18_spill] sm:$0xff] }
 0x37f   :  { %v3927_v53 = vsel %vm410_vm0, %v3926_v50, %v3908_v60  ;;  %v3949_v47 = vperm.slane %v3941_v45, %v7614_v21  ;;  %v3975_v8 = vsel %vm410_vm0, %v3974_v33, %v3133_v37  ;;  %v3994_v19 = vrot.slane %v3973_v34, 4  ;;  %v11556_v33 = vld [vmem:[#allocation20_spill] sm:$0xff] }
 0x380   :  { %v3933_v20 = vperm.slane %v3927_v53, %v7614_v21  ;;  %v3939_v13 = vsel %vm410_vm0, %v3938_v14, %v3919_v3  ;;  %v3956_v36 = vrot.slane %v3937_v59, 4  ;;  %v3979_v17 = vperm.slane %v3975_v8, %v7557_v57  ;;  %v10373_v14 = vpop.permute.xlu2 %7091 }
 0x381   :  { %v3945_v1 = vperm.slane %v3939_v13, %v7614_v21  ;;  %v3954_v10 = vrot.slane %v3949_v47, 4  ;;  %v3980_v2 = vrot.slane %v3968_v22, 4  ;;  %v3983_v18 = vsel %vm410_vm0, %v3968_v22, %v3982_v51 }
 0x382   :  { %v3952_v61 = vrot.slane %v3933_v20, 4  ;;  %v3957_v6 = vsel %vm410_vm0, %v3949_v47, %v3956_v36  ;;  %v3991_v7 = vperm.slane %v3983_v18, %v7614_v21  ;;  %v3992_v25 = vrot.slane %v3979_v17, 4 }
 0x383   :  { %v3950_v58 = vrot.slane %v3945_v1, 4  ;;  %v3955_v29 = vsel %vm410_vm0, %v3954_v10, %v3937_v59  ;;  %v3981_v55 = vsel %vm410_vm0, %v3980_v2, %v3962_v63  ;;  %v3995_v39 = vsel %vm410_vm0, %v3979_v17, %v3994_v19 }
 0x384   :  { %v3953_v60 = vsel %vm410_vm0, %v3945_v1, %v3952_v61  ;;  %v3987_v52 = vperm.slane %v3981_v55, %v7614_v21  ;;  %v3993_v37 = vsel %vm410_vm0, %v3992_v25, %v3973_v34  ;;  %v4010_v38 = vrot.slane %v3991_v7, 4 }
 0x385   :  { %v3951_v46 = vsel %vm410_vm0, %v3950_v58, %v3933_v20  ;;  %v3999_v16 = vperm.slane %v3993_v37, %v7614_v21  ;;  %v4360_v3 = vpack.c.bf16 %v3953_v60, %v3953_v60  ;;  %v4003_v15 = vperm.slane %v3995_v39, %v7614_v21 }
 0x386   :  { %v4006_v0 = vrot.slane %v3987_v52, 4  ;;  %v4344_v5 = vpack.c.bf16 %v3951_v46, %v3951_v46  ;;  %v4376_v63 = vpack.c.bf16 %v3955_v29, %v3955_v29  ;;  %v4392_v35 = vpack.c.bf16 %v3957_v6, %v3957_v6 }
 0x387   :  { %v4004_v28 = vrot.slane %v3999_v16, 4  ;;  %4424 = vst.msk [vmem:[%s11442_s8 + $0x60] sm:$0xf] %vm2234_vm1, %v4360_v3  ;;  %v860_v23 = vrot.slane %v11555_v11, 4  ;;  %v916_v50 = vrot.slane %v11556_v33, 4  ;;  %v4008_v48 = vrot.slane %v4003_v15, 4 }
 0x388   :  { %v4007_v32 = vsel %vm410_vm0, %v3999_v16, %v4006_v0  ;;  %v4011_v34 = vsel %vm410_vm0, %v4003_v15, %v4010_v38  ;;  %4408 = vst.msk [vmem:[%s11442_s8 + $0x20] sm:$0xf] %vm2234_vm1, %v4344_v5  ;;  %v7064_v59 = vunpack.i.h.bf16 %v7062_v49  ;;  %v7063_v47 = vunpack.i.l.bf16 %v7062_v49 }
 0x389   :  { %v4005_v45 = vsel %vm410_vm0, %v4004_v28, %v3987_v52  ;;  %v4361_v22 = vpack.c.bf16 %v4007_v32, %v4007_v32  ;;  %v4393_v53 = vpack.c.bf16 %v4011_v34, %v4011_v34  ;;  %4440 = vst.msk [vmem:[%s11442_s8 + $0xa0] sm:$0xf] %vm2234_vm1, %v4376_v63  ;;  %v4009_v8 = vsel %vm410_vm0, %v4008_v48, %v3991_v7 }
 0x38a   :  { %v4345_v51 = vpack.c.bf16 %v4005_v45, %v4005_v45  ;;  %4456 = vst.msk [vmem:[%s11442_s8 + $0xe0] sm:$0xf] %vm2234_vm1, %v4392_v35  ;;  %v914_v20 = vrot.slane %v7064_v59, 4  ;;  %v917_v13 = vsel %vm410_vm0, %v7064_v59, %v916_v50  ;;  %v4377_v36 = vpack.c.bf16 %v4009_v8, %v4009_v8 }
 0x38b   :  { %4425 = vst.msk [vmem:[%s11442_s8 + $0x64] sm:$0xf] %vm2234_vm1, %v4361_v22  ;;  %v925_v17 = vperm.slane %v917_v13, %v7557_v57  ;;  %v858_v1 = vrot.slane %v7063_v47, 4  ;;  %v861_v10 = vsel %vm410_vm0, %v7063_v47, %v860_v23  ;;  %v7094_v2 = vunpack.i.h.bf16 %v10373_v14 }
 0x38c   :  { %v7093_v18 = vunpack.i.l.bf16 %v10373_v14  ;;  %4409 = vst.msk [vmem:[%s11442_s8 + $0x24] sm:$0xf] %vm2234_vm1, %v4345_v51  ;;  %v915_v61 = vsel %vm410_vm0, %v914_v20, %v11556_v33  ;;  %v869_v6 = vperm.slane %v861_v10, %v7557_v57 }
 0x38d   :  { %4441 = vst.msk [vmem:[%s11442_s8 + $0xa4] sm:$0xf] %vm2234_vm1, %v4377_v36  ;;  %v921_v7 = vperm.slane %v915_v61, %v7557_v57  ;;  %v951_v25 = vsel %vm410_vm0, %v950_v24, %v925_v17  ;;  %v952_v58 = vrot.slane %v925_v17, 4  ;;  %v859_v29 = vsel %vm410_vm0, %v858_v1, %v11555_v11 }
 0x38e   :  { %4457 = vst.msk [vmem:[%s11442_s8 + $0xe4] sm:$0xf] %vm2234_vm1, %v4393_v53  ;;  %v957_v55 = vperm.slane %v951_v25, %v7614_v21  ;;  %v865_v19 = vperm.slane %v859_v29, %v7557_v57  ;;  %v895_v60 = vsel %vm410_vm0, %v894_v12, %v869_v6  ;;  %v896_v52 = vrot.slane %v869_v6, 4 }
 0x38f   :  { %v939_v24 = vsel %vm410_vm0, %v938_v54, %v921_v7  ;;  %v940_v37 = vrot.slane %v921_v7, 4  ;;  %v953_v38 = vsel %vm410_vm0, %v10083_v43, %v952_v58  ;;  %v901_v46 = vperm.slane %v895_v60, %v7614_v21 }
 0x390   :  { %v945_v39 = vperm.slane %v939_v24, %v7614_v21  ;;  %v961_v16 = vperm.slane %v953_v38, %v7614_v21  ;;  %v966_v3 = vrot.slane %v957_v55, 4  ;;  %v883_v12 = vsel %vm410_vm0, %v882_v27, %v865_v19 }
 0x391   :  { %v941_v49 = vsel %vm410_vm0, %v10108_v4, %v940_v37  ;;  %v884_v15 = vrot.slane %v865_v19, 4  ;;  %v889_v54 = vperm.slane %v883_v12, %v7614_v21  ;;  %v897_v43 = vsel %vm410_vm0, %v10090_v26, %v896_v52  ;;  %v10460_v19 = vpop.permute.xlu2 %7096 }
 0x392   :  { %v949_v0 = vperm.slane %v941_v49, %v7614_v21  ;;  %v962_v5 = vrot.slane %v945_v39, 4  ;;  %v967_v63 = vsel %vm410_vm0, 0.0, %v966_v3  ;;  %v968_v28 = vrot.slane %v961_v16, 4 }
 0x393   :  { %v885_v35 = vsel %vm410_vm0, %v10105_v41, %v884_v15  ;;  %v905_v27 = vperm.slane %v897_v43, %v7614_v21  ;;  %v906_v11 = vrot.slane %v889_v54, 4  ;;  %v910_v23 = vrot.slane %v901_v46, 4 }
 0x394   :  { %v963_v4 = vsel %vm410_vm0, 0.0, %v962_v5  ;;  %v964_v33 = vrot.slane %v949_v0, 4  ;;  %v969_v50 = vsel %vm410_vm0, 0.0, %v968_v28  ;;  %v1803_v26 = vsel %vm410_vm0, %v968_v28, %v957_v55 }
 0x395   :  { %v1807_v32 = vperm.slane %v1803_v26, %v7557_v57  ;;  %v1808_v48 = vrot.slane %v969_v50, 4  ;;  %v893_v34 = vperm.slane %v885_v35, %v7614_v21  ;;  %v907_v59 = vsel %vm410_vm0, 0.0, %v906_v11  ;;  %v7072_v50 = vpop.permute.xlu1 %7071 }
 0x396   :  { %v965_v41 = vsel %vm410_vm0, 0.0, %v964_v33  ;;  %v1792_v45 = vsel %vm410_vm0, %v964_v33, %v945_v39  ;;  %v911_v22 = vsel %vm410_vm0, 0.0, %v910_v23  ;;  %v912_v53 = vrot.slane %v905_v27, 4 }
 0x397   :  { %v1796_v47 = vperm.slane %v1792_v45, %v7557_v57  ;;  %v1797_v8 = vrot.slane %v965_v41, 4  ;;  %v1809_v51 = vsel %vm410_vm0, %v1808_v48, %v967_v63  ;;  %v1828_v20 = vrot.slane %v1807_v32, 4 }
 0x398   :  { %v1813_v13 = vperm.slane %v1809_v51, %v7557_v57  ;;  %v908_v36 = vrot.slane %v893_v34, 4  ;;  %v913_v17 = vsel %vm410_vm0, 0.0, %v912_v53  ;;  %v1749_v1 = vsel %vm410_vm0, %v912_v53, %v901_v46 }
 0x399   :  { %v1798_v10 = vsel %vm410_vm0, %v1797_v8, %v963_v4  ;;  %v1816_v61 = vrot.slane %v1796_v47, 4  ;;  %v1753_v6 = vperm.slane %v1749_v1, %v7557_v57  ;;  %v1754_v7 = vrot.slane %v913_v17, 4  ;;  %v10493_v1 = vpop.permute.xlu0 %7076 }
 0x39a   :  { %v1802_v25 = vperm.slane %v1798_v10, %v7557_v57  ;;  %v1826_v58 = vrot.slane %v1813_v13, 4  ;;  %v1829_v29 = vsel %vm410_vm0, %v1813_v13, %v1828_v20  ;;  %v909_v55 = vsel %vm410_vm0, 0.0, %v908_v36 }
 0x39b   :  { %v1837_v60 = vperm.slane %v1829_v29, %v7614_v21  ;;  %v1738_v52 = vsel %vm410_vm0, %v908_v36, %v889_v54  ;;  %v1743_v24 = vrot.slane %v909_v55, 4  ;;  %v1755_v37 = vsel %vm410_vm0, %v1754_v7, %v911_v22 }
 0x39c   :  { %v1814_v38 = vrot.slane %v1802_v25, 4  ;;  %v1817_v46 = vsel %vm410_vm0, %v1802_v25, %v1816_v61  ;;  %v1827_v39 = vsel %vm410_vm0, %v1826_v58, %v1807_v32  ;;  %v1742_v16 = vperm.slane %v1738_v52, %v7557_v57  ;;  %v10502_v25 = vpop.permute.xlu2 %7111 }
 0x39d   :  { %v1825_v3 = vperm.slane %v1817_v46, %v7614_v21  ;;  %v1833_v12 = vperm.slane %v1827_v39, %v7614_v21  ;;  %v1842_v49 = vrot.slane %v1837_v60, 4  ;;  %v1744_v15 = vsel %vm410_vm0, %v1743_v24, %v907_v59 }
 0x39e   :  { %v1815_v43 = vsel %vm410_vm0, %v1814_v38, %v1796_v47  ;;  %v1748_v54 = vperm.slane %v1744_v15, %v7557_v57  ;;  %v1759_v0 = vperm.slane %v1755_v37, %v7557_v57  ;;  %v1762_v5 = vrot.slane %v1742_v16, 4 }
 0x39f   :  { %v1821_v63 = vperm.slane %v1815_v43, %v7614_v21  ;;  %v1838_v28 = vrot.slane %v1833_v12, 4  ;;  %v1843_v35 = vsel %vm410_vm0, %v1842_v49, %v1825_v3  ;;  %v1844_v27 = vrot.slane %v1825_v3, 4 }
 0x3a0   :  { %v2211_v11 = vpack.c.bf16 %v1843_v35, %v1843_v35  ;;  %v1760_v23 = vrot.slane %v1748_v54, 4  ;;  %v1763_v4 = vsel %vm410_vm0, %v1748_v54, %v1762_v5  ;;  %v1772_v33 = vrot.slane %v1759_v0, 4 }
 0x3a1   :  { %v1839_v26 = vsel %vm410_vm0, %v1838_v28, %v1821_v63  ;;  %v1840_v32 = vrot.slane %v1821_v63, 4  ;;  %v1845_v48 = vsel %vm410_vm0, %v1837_v60, %v1844_v27  ;;  %v1771_v34 = vperm.slane %v1763_v4, %v7614_v21  ;;  %v7102_v63 = vpop.permute.xlu1 %7101 }
 0x3a2   :  { %v2179_v59 = vpack.c.bf16 %v1839_v26, %v1839_v26  ;;  %v2227_v41 = vpack.c.bf16 %v1845_v48, %v1845_v48  ;;  %2276 = vst.msk [vmem:[%s11441_s7 + $0xa4] sm:$0xf] %vm2234_vm1, %v2211_v11  ;;  %v1761_v45 = vsel %vm410_vm0, %v1760_v23, %v1742_v16  ;;  %v1773_v22 = vsel %vm410_vm0, %v1772_v33, %v1753_v6 }
 0x3a3   :  { %v1841_v53 = vsel %vm410_vm0, %v1833_v12, %v1840_v32  ;;  %v1767_v47 = vperm.slane %v1761_v45, %v7614_v21  ;;  %v1774_v8 = vrot.slane %v1753_v6, 4  ;;  %v1779_v51 = vperm.slane %v1773_v22, %v7614_v21  ;;  %v7082_v22 = vpop.permute.xlu0 %7081 }
 0x3a4   :  { %v2195_v20 = vpack.c.bf16 %v1841_v53, %v1841_v53  ;;  %2244 = vst.msk [vmem:[%s11441_s7 + $0x24] sm:$0xf] %vm2234_vm1, %v2179_v59  ;;  %v1790_v13 = vrot.slane %v1771_v34, 4  ;;  %v7074_v36 = vunpack.i.h.bf16 %v7072_v50  ;;  %v7073_v17 = vunpack.i.l.bf16 %v7072_v50  ;;  %v11557_v50 = vld [vmem:[#allocation25_spill] sm:$0xff] }
 0x3a5   :  { %v5201_v10 = vrot.slane %v7093_v18, 4  ;;  %2292 = vst.msk [vmem:[%s11441_s7 + $0xe4] sm:$0xf] %vm2234_vm1, %v2227_v41  ;;  %v1775_v61 = vsel %vm410_vm0, %v1759_v0, %v1774_v8  ;;  %v1784_v6 = vrot.slane %v1779_v51, 4  ;;  %v1786_v7 = vrot.slane %v1767_v47, 4  ;;  %v11558_v41 = vld [vmem:[#allocation26_spill] sm:$0xff] }
 0x3a6   :  { %v5257_v58 = vrot.slane %v7094_v2, 4  ;;  %2260 = vst.msk [vmem:[%s11441_s7 + $0x64] sm:$0xf] %vm2234_vm1, %v2195_v20  ;;  %v1783_v29 = vperm.slane %v1775_v61, %v7614_v21  ;;  %v5259_v55 = vrot.slane %v7074_v36, 4  ;;  %v5203_v60 = vrot.slane %v7073_v17, 4  ;;  %v11559_v20 = vld [vmem:[#allocation21_spill] sm:$0xff] }
 0x3a7   :  { %v7099_v52 = vunpack.i.h.bf16 %v10460_v19  ;;  %v1785_v24 = vsel %vm410_vm0, %v1784_v6, %v1767_v47  ;;  %v1787_v37 = vsel %vm410_vm0, %v1779_v51, %v1786_v7  ;;  %v5202_v38 = vsel %vm410_vm0, %v5201_v10, %v7073_v17  ;;  %v10572_v51 = vpop.permute.xlu2 %7126  ;;  %v11560_v7 = vld [vmem:[#allocation22_spill] sm:$0xff] }
 0x3a8   :  { %v1788_v46 = vrot.slane %v1783_v29, 4  ;;  %v1791_v39 = vsel %vm410_vm0, %v1783_v29, %v1790_v13  ;;  %v2178_v16 = vpack.c.bf16 %v1785_v24, %v1785_v24  ;;  %v2194_v3 = vpack.c.bf16 %v1787_v37, %v1787_v37 }
 0x3a9   :  { %v2226_v12 = vpack.c.bf16 %v1791_v39, %v1791_v39  ;;  %v5204_v49 = vsel %vm410_vm0, %v7093_v18, %v5203_v60  ;;  %v5258_v15 = vsel %vm410_vm0, %v5257_v58, %v7074_v36  ;;  %v5260_v43 = vsel %vm410_vm0, %v7094_v2, %v5259_v55 }
 0x3aa   :  { %v5495_v54 = vrot.slane %v10145_v31, 4  ;;  %v7098_v0 = vunpack.i.l.bf16 %v10460_v19  ;;  %v1789_v5 = vsel %vm410_vm0, %v1788_v46, %v1771_v34  ;;  %2243 = vst.msk [vmem:[%s11441_s7 + $0x20] sm:$0xf] %vm2234_vm1, %v2178_v16  ;;  %v10535_v14 = vperm.slane %v5202_v38, %v7557_v57 }
 0x3ab   :  { %v2210_v28 = vpack.c.bf16 %v1789_v5, %v1789_v5  ;;  %2259 = vst.msk [vmem:[%s11441_s7 + $0x60] sm:$0xf] %vm2234_vm1, %v2194_v3  ;;  %v10538_v2 = vperm.slane %v5204_v49, %v7557_v57  ;;  %v7114_v18 = vunpack.i.h.bf16 %v10502_v25  ;;  %v5507_v35 = vrot.slane %v10148_v42, 4 }
 0x3ac   :  { %v5451_v27 = vrot.slane %v10262_v44, 4  ;;  %2291 = vst.msk [vmem:[%s11441_s7 + $0xe0] sm:$0xf] %vm2234_vm1, %v2226_v12  ;;  %v5264_v11 = vperm.slane %v5258_v15, %v7557_v57  ;;  %v5268_v23 = vperm.slane %v5260_v43, %v7557_v57  ;;  %v5439_v4 = vrot.slane %v10280_v62, 4 }
 0x3ad   :  { %v10552_v33 = vrot.slane %v7099_v52, 4  ;;  %2275 = vst.msk [vmem:[%s11441_s7 + $0xa0] sm:$0xf] %vm2234_vm1, %v2210_v28  ;;  %v3138_v26 = vrot.slane %v11557_v50, 4  ;;  %v7104_v32 = vunpack.i.h.bf16 %v7102_v63  ;;  %v10561_v48 = vrot.slane %v7098_v0, 4 }
 0x3ae   :  { %v7113_v34 = vunpack.i.l.bf16 %v10502_v25  ;;  %v7079_v59 = vunpack.i.h.bf16 %v10493_v1  ;;  %v3194_v45 = vrot.slane %v11558_v41, 4  ;;  %v5213_v53 = vrot.slane %v10535_v14, 4 }
 0x3af   :  { %v5225_v47 = vrot.slane %v10538_v2, 4  ;;  %v10570_v8 = vrot.slane %v7114_v18, 4  ;;  %v5191_v13 = vrot.slane %v11559_v20, 4  ;;  %v5269_v36 = vrot.slane %v5264_v11, 4 }
 0x3b0   :  { %v5281_v17 = vrot.slane %v5268_v23, 4  ;;  %v7078_v10 = vunpack.i.l.bf16 %v10493_v1  ;;  %v7103_v61 = vunpack.i.l.bf16 %v7102_v63  ;;  %v3192_v6 = vrot.slane %v7104_v32, 4 }
 0x3b1   :  { %v5247_v58 = vrot.slane %v11560_v7, 4  ;;  %v7084_v29 = vunpack.i.h.bf16 %v7082_v22  ;;  %v7083_v55 = vunpack.i.l.bf16 %v7082_v22  ;;  %v10579_v60 = vrot.slane %v7113_v34, 4 }
 0x3b2   :  { %v10583_v24 = vrot.slane %v7079_v59, 4  ;;  %v7129_v37 = vunpack.i.h.bf16 %v10572_v51  ;;  %v11484_v38 = vunpack.i.l.bf16 %v10572_v51  ;;  %v10590_v12 = vsel %vm410_vm0, %v7104_v32, %v3194_v45 }
 0x3b3   :  { %v5245_v46 = vrot.slane %v7084_v29, 4  ;;  %v5248_v39 = vsel %vm410_vm0, %v7084_v29, %v5247_v58  ;;  %v5189_v16 = vrot.slane %v7083_v55, 4  ;;  %v5192_v3 = vsel %vm410_vm0, %v7083_v55, %v5191_v13  ;;  %v10610_v29 = vpop.permute.xlu1 %7116 }
 0x3b4   :  { %v10592_v49 = vrot.slane %v7103_v61, 4  ;;  %v5256_v15 = vperm.slane %v5248_v39, %v7557_v57  ;;  %v5200_v43 = vperm.slane %v5192_v3, %v7557_v57  ;;  %v10598_v5 = vsel %vm410_vm0, %v3192_v6, %v11558_v41 }
 0x3b5   :  { %v10601_v63 = vsel %vm410_vm0, %v7103_v61, %v3138_v26  ;;  %v5246_v28 = vsel %vm410_vm0, %v5245_v46, %v11560_v7  ;;  %v5190_v32 = vsel %vm410_vm0, %v5189_v16, %v11559_v20  ;;  %v7119_v6 = vunpack.i.h.bf16 %v10610_v29 }
 0x3b6   :  { %v5252_v45 = vperm.slane %v5246_v28, %v7557_v57  ;;  %v5282_v22 = vsel %vm410_vm0, %v5281_v17, %v5256_v15  ;;  %v5283_v13 = vrot.slane %v5256_v15, 4  ;;  %v5196_v58 = vperm.slane %v5190_v32, %v7557_v57 }
 0x3b7   :  { %v5288_v41 = vperm.slane %v5282_v22, %v7614_v21  ;;  %v5226_v26 = vsel %vm410_vm0, %v5225_v47, %v5200_v43  ;;  %v5227_v61 = vrot.slane %v5200_v43, 4 }
 0x3b8   :  { %v5270_v7 = vsel %vm410_vm0, %v5269_v36, %v5252_v45  ;;  %v5271_v55 = vrot.slane %v5252_v45, 4  ;;  %v5284_v20 = vsel %vm410_vm0, %v5268_v23, %v5283_v13  ;;  %v5214_v46 = vsel %vm410_vm0, %v5213_v53, %v5196_v58 }
 0x3b9   :  { %v5276_v17 = vperm.slane %v5270_v7, %v7614_v21  ;;  %v5292_v39 = vperm.slane %v5284_v20, %v7614_v21  ;;  %v5297_v16 = vrot.slane %v5288_v41, 4  ;;  %v5215_v3 = vrot.slane %v5196_v58, 4 }
 0x3ba   :  { %v5272_v15 = vsel %vm410_vm0, %v5264_v11, %v5271_v55  ;;  %v5220_v47 = vperm.slane %v5214_v46, %v7614_v21  ;;  %v5228_v43 = vsel %vm410_vm0, %v10538_v2, %v5227_v61  ;;  %v5232_v36 = vperm.slane %v5226_v26, %v7614_v21 }
 0x3bb   :  { %v5280_v28 = vperm.slane %v5272_v15, %v7614_v21  ;;  %v5293_v23 = vrot.slane %v5276_v17, 4  ;;  %v5298_v53 = vsel %vm410_vm0, 0.0, %v5297_v16  ;;  %v5299_v32 = vrot.slane %v5292_v39, 4 }
 0x3bc   :  { %v5216_v45 = vsel %vm410_vm0, %v10535_v14, %v5215_v3  ;;  %v5236_v22 = vperm.slane %v5228_v43, %v7614_v21  ;;  %v5237_v13 = vrot.slane %v5220_v47, 4  ;;  %v5241_v11 = vrot.slane %v5232_v36, 4 }
 0x3bd   :  { %v5294_v58 = vsel %vm410_vm0, 0.0, %v5293_v23  ;;  %v5295_v7 = vrot.slane %v5280_v28, 4  ;;  %v5300_v2 = vsel %vm410_vm0, 0.0, %v5299_v32  ;;  %v6134_v26 = vsel %vm410_vm0, %v5299_v32, %v5288_v41 }
 0x3be   :  { %v6138_v61 = vperm.slane %v6134_v26, %v7557_v57  ;;  %v6139_v55 = vrot.slane %v5300_v2, 4  ;;  %v5224_v20 = vperm.slane %v5216_v45, %v7614_v21  ;;  %v5238_v46 = vsel %vm410_vm0, 0.0, %v5237_v13 }
 0x3bf   :  { %v5296_v14 = vsel %vm410_vm0, 0.0, %v5295_v7  ;;  %v6123_v39 = vsel %vm410_vm0, %v5295_v7, %v5276_v17  ;;  %v5242_v16 = vsel %vm410_vm0, 0.0, %v5241_v11  ;;  %v5243_v3 = vrot.slane %v5236_v22, 4 }
 0x3c0   :  { %v6127_v15 = vperm.slane %v6123_v39, %v7557_v57  ;;  %v6128_v43 = vrot.slane %v5296_v14, 4  ;;  %v6140_v28 = vsel %vm410_vm0, %v6139_v55, %v5298_v53  ;;  %v6159_v41 = vrot.slane %v6138_v61, 4 }
 0x3c1   :  { %v6144_v23 = vperm.slane %v6140_v28, %v7557_v57  ;;  %v5239_v32 = vrot.slane %v5224_v20, 4  ;;  %v5244_v45 = vsel %vm410_vm0, 0.0, %v5243_v3  ;;  %v6080_v13 = vsel %vm410_vm0, %v5243_v3, %v5232_v36 }
 0x3c2   :  { %v6129_v2 = vsel %vm410_vm0, %v6128_v43, %v5294_v58  ;;  %v6147_v26 = vrot.slane %v6127_v15, 4  ;;  %v6084_v17 = vperm.slane %v6080_v13, %v7557_v57  ;;  %v6085_v11 = vrot.slane %v5244_v45, 4 }
 0x3c3   :  { %v6133_v22 = vperm.slane %v6129_v2, %v7557_v57  ;;  %v6157_v7 = vrot.slane %v6144_v23, 4  ;;  %v6160_v14 = vsel %vm410_vm0, %v6144_v23, %v6159_v41  ;;  %v5240_v53 = vsel %vm410_vm0, 0.0, %v5239_v32 }
 0x3c4   :  { %v6168_v55 = vperm.slane %v6160_v14, %v7614_v21  ;;  %v6069_v20 = vsel %vm410_vm0, %v5239_v32, %v5220_v47  ;;  %v6074_v39 = vrot.slane %v5240_v53, 4  ;;  %v6086_v36 = vsel %vm410_vm0, %v6085_v11, %v5242_v16 }
 0x3c5   :  { %v6145_v3 = vrot.slane %v6133_v22, 4  ;;  %v6148_v58 = vsel %vm410_vm0, %v6133_v22, %v6147_v26  ;;  %v6158_v43 = vsel %vm410_vm0, %v6157_v7, %v6138_v61  ;;  %v6073_v28 = vperm.slane %v6069_v20, %v7557_v57 }
 0x3c6   :  { %v6156_v45 = vperm.slane %v6148_v58, %v7614_v21  ;;  %v6164_v41 = vperm.slane %v6158_v43, %v7614_v21  ;;  %v6173_v23 = vrot.slane %v6168_v55, 4  ;;  %v6075_v13 = vsel %vm410_vm0, %v6074_v39, %v5238_v46 }
 0x3c7   :  { %v6146_v2 = vsel %vm410_vm0, %v6145_v3, %v6127_v15  ;;  %v6079_v47 = vperm.slane %v6075_v13, %v7557_v57  ;;  %v6090_v16 = vperm.slane %v6086_v36, %v7557_v57  ;;  %v6093_v32 = vrot.slane %v6073_v28, 4 }
 0x3c8   :  { %v6152_v26 = vperm.slane %v6146_v2, %v7614_v21  ;;  %v6169_v11 = vrot.slane %v6164_v41, 4  ;;  %v6174_v61 = vsel %vm410_vm0, %v6173_v23, %v6156_v45  ;;  %v6175_v22 = vrot.slane %v6156_v45, 4 }
 0x3c9   :  { %v6542_v7 = vpack.c.bf16 %v6174_v61, %v6174_v61  ;;  %v6091_v14 = vrot.slane %v6079_v47, 4  ;;  %v6094_v53 = vsel %vm410_vm0, %v6079_v47, %v6093_v32  ;;  %v6103_v20 = vrot.slane %v6090_v16, 4 }
 0x3ca   :  { %v6170_v46 = vsel %vm410_vm0, %v6169_v11, %v6152_v26  ;;  %v6171_v39 = vrot.slane %v6152_v26, 4  ;;  %v6176_v15 = vsel %vm410_vm0, %v6168_v55, %v6175_v22  ;;  %v6102_v3 = vperm.slane %v6094_v53, %v7614_v21  ;;  %v11561_v11 = vld [vmem:[#allocation28_spill] sm:$0xff] }
 0x3cb   :  { %v6510_v36 = vpack.c.bf16 %v6170_v46, %v6170_v46  ;;  %v6558_v58 = vpack.c.bf16 %v6176_v15, %v6176_v15  ;;  %6606 = vst.msk [vmem:[%s11443_s9 + $0xa4] sm:$0xf] %vm2234_vm1, %v6542_v7  ;;  %v6092_v43 = vsel %vm410_vm0, %v6091_v14, %v6073_v28  ;;  %v6104_v45 = vsel %vm410_vm0, %v6103_v20, %v6084_v17  ;;  %v7107_v15 = vpop.permute.xlu0 %7106 }
 0x3cc   :  { %v6172_v23 = vsel %vm410_vm0, %v6164_v41, %v6171_v39  ;;  %v6098_v13 = vperm.slane %v6092_v43, %v7614_v21  ;;  %v6105_v2 = vrot.slane %v6084_v17, 4  ;;  %v6110_v55 = vperm.slane %v6104_v45, %v7614_v21 }
 0x3cd   :  { %v10678_v47 = vperm.slane %v10590_v12, %v7557_v57  ;;  %v3137_v32 = vsel %vm410_vm0, %v10592_v49, %v11557_v50  ;;  %v6526_v26 = vpack.c.bf16 %v6172_v23, %v6172_v23  ;;  %6574 = vst.msk [vmem:[%s11443_s9 + $0x24] sm:$0xf] %vm2234_vm1, %v6510_v36  ;;  %v6121_v28 = vrot.slane %v6102_v3, 4 }
 0x3ce   :  { %6622 = vst.msk [vmem:[%s11443_s9 + $0xe4] sm:$0xf] %vm2234_vm1, %v6558_v58  ;;  %v6106_v17 = vsel %vm410_vm0, %v6090_v16, %v6105_v2  ;;  %v6115_v12 = vrot.slane %v6110_v55, 4  ;;  %v6117_v41 = vrot.slane %v6098_v13, 4  ;;  %v1028_v61 = vrot.slane %v11561_v11, 4 }
 0x3cf   :  { %v10695_v50 = vperm.slane %v10598_v5, %v7557_v57  ;;  %v10699_v49 = vperm.slane %v10601_v63, %v7557_v57  ;;  %6590 = vst.msk [vmem:[%s11443_s9 + $0x64] sm:$0xf] %vm2234_vm1, %v6526_v26  ;;  %v6114_v22 = vperm.slane %v6106_v17, %v7614_v21  ;;  %v1026_v16 = vrot.slane %v7119_v6, 4 }
 0x3d0   :  { %v3143_v7 = vperm.slane %v3137_v32, %v7557_v57  ;;  %v6116_v14 = vsel %vm410_vm0, %v6115_v12, %v6098_v13  ;;  %v6118_v5 = vsel %vm410_vm0, %v6110_v55, %v6117_v41  ;;  %v1029_v63 = vsel %vm410_vm0, %v7119_v6, %v1028_v61 }
 0x3d1   :  { %v6119_v53 = vrot.slane %v6114_v22, 4  ;;  %v6122_v20 = vsel %vm410_vm0, %v6114_v22, %v6121_v28  ;;  %v6509_v46 = vpack.c.bf16 %v6116_v14, %v6116_v14  ;;  %v6525_v39 = vpack.c.bf16 %v6118_v5, %v6118_v5 }
 0x3d2   :  { %v10717_v36 = vrot.slane %v7078_v10, 4  ;;  %v10721_v58 = vrot.slane %v7129_v37, 4  ;;  %v10725_v43 = vrot.slane %v11484_v38, 4  ;;  %v6557_v45 = vpack.c.bf16 %v6122_v20, %v6122_v20 }
 0x3d3   :  { %v3230_v6 = vrot.slane %v10678_v47, 4  ;;  %v6120_v23 = vsel %vm410_vm0, %v6119_v53, %v6102_v3  ;;  %6573 = vst.msk [vmem:[%s11443_s9 + $0x20] sm:$0xf] %vm2234_vm1, %v6509_v46  ;;  %v1027_v13 = vsel %vm410_vm0, %v1026_v16, %v11561_v11  ;;  %v10736_v2 = vperm.slane %v1029_v63, %v7557_v57  ;;  %v10743_v3 = vpop.permute.xlu2 %7156  ;;  %v11562_v11 = vld [vmem:[#allocation27_spill] sm:$0xff] }
 0x3d4   :  { %v6541_v55 = vpack.c.bf16 %v6120_v23, %v6120_v23  ;;  %6589 = vst.msk [vmem:[%s11443_s9 + $0x60] sm:$0xf] %vm2234_vm1, %v6525_v39  ;;  %v7118_v32 = vunpack.i.l.bf16 %v10610_v29  ;;  %v7109_v26 = vunpack.i.h.bf16 %v7107_v15  ;;  %v7108_v28 = vunpack.i.l.bf16 %v7107_v15 }
 0x3d5   :  { %v3218_v17 = vrot.slane %v10695_v50, 4  ;;  %v3162_v12 = vrot.slane %v3143_v7, 4  ;;  %v3174_v41 = vrot.slane %v10699_v49, 4  ;;  %6621 = vst.msk [vmem:[%s11443_s9 + $0xe0] sm:$0xf] %vm2234_vm1, %v6557_v45  ;;  %v972_v61 = vrot.slane %v11562_v11, 4 }
 0x3d6   :  { %6605 = vst.msk [vmem:[%s11443_s9 + $0xa0] sm:$0xf] %vm2234_vm1, %v6541_v55  ;;  %v3204_v29 = vrot.slane %v7109_v26, 4  ;;  %v3207_v22 = vsel %vm410_vm0, %v7109_v26, %v10552_v33  ;;  %v3148_v16 = vrot.slane %v7108_v28, 4  ;;  %v3151_v14 = vsel %vm410_vm0, %v7108_v28, %v10561_v48 }
 0x3d7   :  { %v10761_v5 = vperm.slane %v1027_v13, %v7557_v57  ;;  %v7159_v63 = vunpack.i.h.bf16 %v10743_v3  ;;  %v3215_v53 = vperm.slane %v3207_v22, %v7557_v57  ;;  %v3159_v20 = vperm.slane %v3151_v14, %v7557_v57 }
 0x3d8   :  { %v1064_v46 = vrot.slane %v10736_v2, 4  ;;  %v10767_v39 = vrot.slane %v7118_v32, 4  ;;  %v3205_v33 = vsel %vm410_vm0, %v3204_v29, %v7099_v52  ;;  %v3149_v48 = vsel %vm410_vm0, %v3148_v16, %v7098_v0 }
 0x3d9   :  { %v3211_v15 = vperm.slane %v3205_v33, %v7557_v57  ;;  %v3228_v45 = vrot.slane %v3215_v53, 4  ;;  %v3231_v23 = vsel %vm410_vm0, %v3215_v53, %v3230_v6  ;;  %v3155_v13 = vperm.slane %v3149_v48, %v7557_v57 }
 0x3da   :  { %v10779_v55 = vsel %vm410_vm0, %v7118_v32, %v972_v61  ;;  %v3239_v26 = vperm.slane %v3231_v23, %v7614_v21  ;;  %v3172_v28 = vrot.slane %v3159_v20, 4  ;;  %v3175_v22 = vsel %vm410_vm0, %v3159_v20, %v3174_v41 }
 0x3db   :  { %v3216_v52 = vrot.slane %v3211_v15, 4  ;;  %v3219_v19 = vsel %vm410_vm0, %v3211_v15, %v3218_v17  ;;  %v3229_v0 = vsel %vm410_vm0, %v3228_v45, %v10678_v47  ;;  %v3160_v29 = vrot.slane %v3155_v13, 4 }
 0x3dc   :  { %v3227_v16 = vperm.slane %v3219_v19, %v7614_v21  ;;  %v3235_v6 = vperm.slane %v3229_v0, %v7614_v21  ;;  %v3246_v14 = vrot.slane %v3239_v26, 4  ;;  %v3163_v32 = vsel %vm410_vm0, %v3155_v13, %v3162_v12 }
 0x3dd   :  { %v3217_v61 = vsel %vm410_vm0, %v3216_v52, %v10695_v50  ;;  %v3161_v53 = vsel %vm410_vm0, %v3160_v29, %v3143_v7  ;;  %v3171_v41 = vperm.slane %v3163_v32, %v7614_v21  ;;  %v3173_v17 = vsel %vm410_vm0, %v3172_v28, %v10699_v49 }
 0x3de   :  { %v3223_v47 = vperm.slane %v3217_v61, %v7614_v21  ;;  %v3242_v20 = vrot.slane %v3227_v16, 4  ;;  %v3244_v33 = vrot.slane %v3235_v6, 4  ;;  %v3247_v48 = vsel %vm410_vm0, 0.0, %v3246_v14 }
 0x3df   :  { %v4077_v15 = vsel %vm410_vm0, %v3246_v14, %v3235_v6  ;;  %v4082_v45 = vrot.slane %v3247_v48, 4  ;;  %v3167_v12 = vperm.slane %v3161_v53, %v7614_v21  ;;  %v3179_v50 = vperm.slane %v3173_v17, %v7614_v21 }
 0x3e0   :  { %v3240_v23 = vrot.slane %v3223_v47, 4  ;;  %v3243_v7 = vsel %vm410_vm0, 0.0, %v3242_v20  ;;  %v3245_v13 = vsel %vm410_vm0, 0.0, %v3244_v33  ;;  %v4066_v49 = vsel %vm410_vm0, %v3242_v20, %v3223_v47 }
 0x3e1   :  { %v4070_v26 = vperm.slane %v4066_v49, %v7557_v57  ;;  %v4071_v28 = vrot.slane %v3243_v7, 4  ;;  %v4081_v52 = vperm.slane %v4077_v15, %v7557_v57  ;;  %v4083_v19 = vsel %vm410_vm0, %v4082_v45, %v3245_v13 }
 0x3e2   :  { %v3241_v0 = vsel %vm410_vm0, 0.0, %v3240_v23  ;;  %v4087_v29 = vperm.slane %v4083_v19, %v7557_v57  ;;  %v3183_v16 = vperm.slane %v3175_v22, %v7614_v21  ;;  %v3184_v6 = vrot.slane %v3167_v12, 4 }
 0x3e3   :  { %v4072_v14 = vsel %vm410_vm0, %v4071_v28, %v3241_v0  ;;  %v4090_v32 = vrot.slane %v4070_v26, 4  ;;  %v4102_v61 = vrot.slane %v4081_v52, 4  ;;  %v3186_v53 = vrot.slane %v3171_v41, 4 }
 0x3e4   :  { %v4076_v17 = vperm.slane %v4072_v14, %v7557_v57  ;;  %v4100_v47 = vrot.slane %v4087_v29, 4  ;;  %v3185_v20 = vsel %vm410_vm0, 0.0, %v3184_v6  ;;  %v3188_v33 = vrot.slane %v3179_v50, 4 }
 0x3e5   :  { %v4103_v48 = vsel %vm410_vm0, %v4087_v29, %v4102_v61  ;;  %v3187_v15 = vsel %vm410_vm0, 0.0, %v3186_v53  ;;  %v3190_v45 = vrot.slane %v3183_v16, 4  ;;  %v4012_v23 = vsel %vm410_vm0, %v3186_v53, %v3167_v12 }
 0x3e6   :  { %v4088_v22 = vrot.slane %v4076_v17, 4  ;;  %v4091_v7 = vsel %vm410_vm0, %v4076_v17, %v4090_v32  ;;  %v4101_v13 = vsel %vm410_vm0, %v4100_v47, %v4081_v52  ;;  %v4111_v41 = vperm.slane %v4103_v48, %v7614_v21 }
 0x3e7   :  { %v4099_v49 = vperm.slane %v4091_v7, %v7614_v21  ;;  %v4107_v28 = vperm.slane %v4101_v13, %v7614_v21  ;;  %v3189_v19 = vsel %vm410_vm0, 0.0, %v3188_v33  ;;  %v3191_v0 = vsel %vm410_vm0, 0.0, %v3190_v45 }
 0x3e8   :  { %v4089_v29 = vsel %vm410_vm0, %v4088_v22, %v4070_v26  ;;  %v4116_v16 = vrot.slane %v4111_v41, 4  ;;  %v4016_v12 = vperm.slane %v4012_v23, %v7557_v57  ;;  %v4017_v6 = vrot.slane %v3187_v15, 4 }
 0x3e9   :  { %v4095_v14 = vperm.slane %v4089_v29, %v7614_v21  ;;  %v4112_v32 = vrot.slane %v4107_v28, 4  ;;  %v4118_v52 = vrot.slane %v4099_v49, 4  ;;  %v4023_v61 = vsel %vm410_vm0, %v3190_v45, %v3179_v50 }
 0x3ea   :  { %v4117_v53 = vsel %vm410_vm0, %v4116_v16, %v4099_v49  ;;  %v4018_v17 = vsel %vm410_vm0, %v4017_v6, %v3185_v20  ;;  %v4027_v47 = vperm.slane %v4023_v61, %v7557_v57  ;;  %v4028_v33 = vrot.slane %v3191_v0, 4  ;;  %v7132_v6 = vpop.permute.xlu1 %7131 }
 0x3eb   :  { %v4113_v48 = vsel %vm410_vm0, %v4112_v32, %v4095_v14  ;;  %v4114_v26 = vrot.slane %v4095_v14, 4  ;;  %v4119_v22 = vsel %vm410_vm0, %v4111_v41, %v4118_v52  ;;  %v4379_v23 = vpack.c.bf16 %v4117_v53, %v4117_v53  ;;  %v7122_v53 = vpop.permute.xlu0 %7121 }
 0x3ec   :  { %v4347_v15 = vpack.c.bf16 %v4113_v48, %v4113_v48  ;;  %v4395_v7 = vpack.c.bf16 %v4119_v22, %v4119_v22  ;;  %v4022_v13 = vperm.slane %v4018_v17, %v7557_v57  ;;  %v4029_v29 = vsel %vm410_vm0, %v4028_v33, %v3189_v19 }
 0x3ed   :  { %v4115_v50 = vsel %vm410_vm0, %v4107_v28, %v4114_v26  ;;  %4443 = vst.msk [vmem:[%s11442_s8 + $0xac] sm:$0xf] %vm2234_vm1, %v4379_v23  ;;  %v4033_v20 = vperm.slane %v4029_v29, %v7557_v57  ;;  %v4036_v45 = vrot.slane %v4016_v12, 4  ;;  %v4048_v49 = vrot.slane %v4027_v47, 4 }
 0x3ee   :  { %v971_v41 = vsel %vm410_vm0, %v10767_v39, %v11562_v11  ;;  %v10844_v0 = vperm.slane %v10779_v55, %v7557_v57  ;;  %v4363_v19 = vpack.c.bf16 %v4115_v50, %v4115_v50  ;;  %4411 = vst.msk [vmem:[%s11442_s8 + $0x2c] sm:$0xf] %vm2234_vm1, %v4347_v15  ;;  %v4034_v28 = vrot.slane %v4022_v13, 4 }
 0x3ef   :  { %v7158_v16 = vunpack.i.l.bf16 %v10743_v3  ;;  %4459 = vst.msk [vmem:[%s11442_s8 + $0xec] sm:$0xf] %vm2234_vm1, %v4395_v7  ;;  %v4037_v11 = vsel %vm410_vm0, %v4022_v13, %v4036_v45  ;;  %v4046_v39 = vrot.slane %v4033_v20, 4  ;;  %v4049_v55 = vsel %vm410_vm0, %v4033_v20, %v4048_v49 }
 0x3f0   :  { %v1052_v14 = vrot.slane %v10761_v5, 4  ;;  %4427 = vst.msk [vmem:[%s11442_s8 + $0x6c] sm:$0xf] %vm2234_vm1, %v4363_v19  ;;  %v4035_v32 = vsel %vm410_vm0, %v4034_v28, %v4016_v12  ;;  %v4045_v52 = vperm.slane %v4037_v11, %v7614_v21  ;;  %v4057_v61 = vperm.slane %v4049_v55, %v7614_v21 }
 0x3f1   :  { %v10866_v17 = vperm.slane %v971_v41, %v7557_v57  ;;  %v5593_v33 = vrot.slane %v7159_v63, 4  ;;  %v4041_v48 = vperm.slane %v4035_v32, %v7614_v21  ;;  %v4047_v26 = vsel %vm410_vm0, %v4046_v39, %v4027_v47 }
 0x3f2   :  { %v4053_v22 = vperm.slane %v4047_v26, %v7614_v21  ;;  %v4062_v23 = vrot.slane %v4057_v61, 4  ;;  %v4064_v15 = vrot.slane %v4045_v52, 4  ;;  %v7133_v12 = vunpack.i.l.bf16 %v7132_v6 }
 0x3f3   :  { %v1008_v7 = vrot.slane %v10844_v0, 4  ;;  %v5537_v13 = vrot.slane %v7158_v16, 4  ;;  %v4060_v29 = vrot.slane %v4041_v48, 4  ;;  %v7124_v50 = vunpack.i.h.bf16 %v7122_v53 }
 0x3f4   :  { %v4058_v20 = vrot.slane %v4053_v22, 4  ;;  %v4063_v45 = vsel %vm410_vm0, %v4062_v23, %v4045_v52  ;;  %v4065_v49 = vsel %vm410_vm0, %v4057_v61, %v4064_v15  ;;  %v5303_v41 = vrot.slane %v8500_v56, 4 }
 0x3f5   :  { %v996_v19 = vrot.slane %v10866_v17, 4  ;;  %v4061_v47 = vsel %vm410_vm0, %v4053_v22, %v4060_v29  ;;  %v4378_v28 = vpack.c.bf16 %v4063_v45, %v4063_v45  ;;  %v7134_v11 = vunpack.i.h.bf16 %v7132_v6 }
 0x3f6   :  { %v4059_v39 = vsel %vm410_vm0, %v4058_v20, %v4041_v48  ;;  %v4362_v55 = vpack.c.bf16 %v4061_v47, %v4061_v47  ;;  %v4394_v32 = vpack.c.bf16 %v4065_v49, %v4065_v49  ;;  %v5538_v26 = vsel %vm410_vm0, %v5537_v13, %v7133_v12 }
 0x3f7   :  { %v4346_v38 = vpack.c.bf16 %v4059_v39, %v4059_v39  ;;  %4442 = vst.msk [vmem:[%s11442_s8 + $0xa8] sm:$0xf] %vm2234_vm1, %v4378_v28  ;;  %v5539_v52 = vrot.slane %v7133_v12, 4  ;;  %v1038_v61 = vrot.slane %v7124_v50, 4  ;;  %v1041_v23 = vsel %vm410_vm0, %v7124_v50, %v10570_v8 }
 0x3f8   :  { %4426 = vst.msk [vmem:[%s11442_s8 + $0x68] sm:$0xf] %vm2234_vm1, %v4362_v55  ;;  %v1049_v6 = vperm.slane %v1041_v23, %v7557_v57  ;;  %v7123_v48 = vunpack.i.l.bf16 %v7122_v53  ;;  %v5359_v22 = vrot.slane %v8693_v30, 4  ;;  %v5527_v15 = vrot.slane %v8464_v9, 4 }
 0x3f9   :  { %4410 = vst.msk [vmem:[%s11442_s8 + $0x28] sm:$0xf] %vm2234_vm1, %v4346_v38  ;;  %v5595_v12 = vrot.slane %v7134_v11, 4  ;;  %v10899_v8 = vperm.slane %v5538_v26, %v7557_v57  ;;  %v1039_v13 = vsel %vm410_vm0, %v1038_v61, %v7114_v18  ;;  %v5583_v29 = vrot.slane %v8503_v40, 4 }
 0x3fa   :  { %4458 = vst.msk [vmem:[%s11442_s8 + $0xe8] sm:$0xf] %vm2234_vm1, %v4394_v32  ;;  %v1045_v53 = vperm.slane %v1039_v13, %v7557_v57  ;;  %v1062_v50 = vrot.slane %v1049_v6, 4  ;;  %v1065_v38 = vsel %vm410_vm0, %v1049_v6, %v1064_v46  ;;  %v982_v20 = vrot.slane %v7123_v48, 4 }
 0x3fb   :  { %v5540_v45 = vsel %vm410_vm0, %v7158_v16, %v5539_v52  ;;  %v10915_v49 = vsel %vm410_vm0, %v5593_v33, %v7134_v11  ;;  %v1073_v18 = vperm.slane %v1065_v38, %v7614_v21  ;;  %v985_v47 = vsel %vm410_vm0, %v7123_v48, %v10579_v60 }
 0x3fc   :  { %v1050_v28 = vrot.slane %v1045_v53, 4  ;;  %v1053_v39 = vsel %vm410_vm0, %v1045_v53, %v1052_v14  ;;  %v1063_v55 = vsel %vm410_vm0, %v1062_v50, %v10736_v2  ;;  %v983_v46 = vsel %vm410_vm0, %v982_v20, %v7113_v34 }
 0x3fd   :  { %v1061_v16 = vperm.slane %v1053_v39, %v7614_v21  ;;  %v1069_v33 = vperm.slane %v1063_v55, %v7614_v21  ;;  %v1080_v11 = vrot.slane %v1073_v18, 4  ;;  %v989_v32 = vperm.slane %v983_v46, %v7557_v57 }
 0x3fe   :  { %v10930_v26 = vperm.slane %v5540_v45, %v7557_v57  ;;  %v10935_v60 = vsel %vm410_vm0, %v7159_v63, %v5595_v12  ;;  %v1051_v25 = vsel %vm410_vm0, %v1050_v28, %v10761_v5  ;;  %v993_v34 = vperm.slane %v985_v47, %v7557_v57 }
 0x3ff   :  { %v1057_v2 = vperm.slane %v1051_v25, %v7614_v21  ;;  %v1076_v14 = vrot.slane %v1061_v16, 4  ;;  %v1078_v52 = vrot.slane %v1069_v33, 4  ;;  %v1081_v61 = vsel %vm410_vm0, 0.0, %v1080_v11 }
 0x400   :  { %v1911_v23 = vsel %vm410_vm0, %v1080_v11, %v1069_v33  ;;  %v1916_v6 = vrot.slane %v1081_v61, 4  ;;  %v994_v48 = vrot.slane %v989_v32, 4  ;;  %v997_v3 = vsel %vm410_vm0, %v989_v32, %v996_v19 }
 0x401   :  { %v1074_v13 = vrot.slane %v1057_v2, 4  ;;  %v1077_v63 = vsel %vm410_vm0, 0.0, %v1076_v14  ;;  %v1079_v12 = vsel %vm410_vm0, 0.0, %v1078_v52  ;;  %v1900_v5 = vsel %vm410_vm0, %v1076_v14, %v1057_v2 }
 0x402   :  { %v1904_v53 = vperm.slane %v1900_v5, %v7557_v57  ;;  %v1905_v50 = vrot.slane %v1077_v63, 4  ;;  %v1915_v38 = vperm.slane %v1911_v23, %v7557_v57  ;;  %v1917_v20 = vsel %vm410_vm0, %v1916_v6, %v1079_v12 }
 0x403   :  { %v1075_v45 = vsel %vm410_vm0, 0.0, %v1074_v13  ;;  %v1921_v18 = vperm.slane %v1917_v20, %v7557_v57  ;;  %v995_v19 = vsel %vm410_vm0, %v994_v48, %v10866_v17  ;;  %v1005_v47 = vperm.slane %v997_v3, %v7614_v21 }
 0x404   :  { %v1906_v28 = vsel %vm410_vm0, %v1905_v50, %v1075_v45  ;;  %v1924_v39 = vrot.slane %v1904_v53, 4  ;;  %v1936_v55 = vrot.slane %v1915_v38, 4  ;;  %v1001_v46 = vperm.slane %v995_v19, %v7614_v21 }
 0x405   :  { %v1910_v16 = vperm.slane %v1906_v28, %v7557_v57  ;;  %v1934_v33 = vrot.slane %v1921_v18, 4  ;;  %v1006_v11 = vrot.slane %v993_v34, 4  ;;  %v1009_v32 = vsel %vm410_vm0, %v993_v34, %v1008_v7 }
 0x406   :  { %v1937_v25 = vsel %vm410_vm0, %v1921_v18, %v1936_v55  ;;  %v1017_v17 = vperm.slane %v1009_v32, %v7614_v21  ;;  %v1018_v2 = vrot.slane %v1001_v46, 4  ;;  %v1020_v14 = vrot.slane %v1005_v47, 4 }
 0x407   :  { %v1922_v52 = vrot.slane %v1910_v16, 4  ;;  %v1925_v61 = vsel %vm410_vm0, %v1910_v16, %v1924_v39  ;;  %v1935_v23 = vsel %vm410_vm0, %v1934_v33, %v1915_v38  ;;  %v1945_v6 = vperm.slane %v1937_v25, %v7614_v21  ;;  %v7137_v25 = vpop.permute.xlu1 %7136 }
 0x408   :  { %v1933_v48 = vperm.slane %v1925_v61, %v7614_v21  ;;  %v1941_v3 = vperm.slane %v1935_v23, %v7614_v21  ;;  %v1007_v7 = vsel %vm410_vm0, %v1006_v11, %v10844_v0  ;;  %v1019_v34 = vsel %vm410_vm0, 0.0, %v1018_v2 }
 0x409   :  { %v1923_v13 = vsel %vm410_vm0, %v1922_v52, %v1904_v53  ;;  %v1950_v63 = vrot.slane %v1945_v6, 4  ;;  %v1013_v12 = vperm.slane %v1007_v7, %v7614_v21  ;;  %v1021_v5 = vsel %vm410_vm0, 0.0, %v1020_v14 }
 0x40a   :  { %v1929_v50 = vperm.slane %v1923_v13, %v7614_v21  ;;  %v1946_v38 = vrot.slane %v1941_v3, 4  ;;  %v1952_v20 = vrot.slane %v1933_v48, 4  ;;  %v1024_v45 = vrot.slane %v1017_v17, 4  ;;  %v7142_v13 = vpop.permute.xlu0 %7141 }
 0x40b   :  { %v1951_v18 = vsel %vm410_vm0, %v1950_v63, %v1933_v48  ;;  %v1022_v19 = vrot.slane %v1013_v12, 4  ;;  %v1846_v47 = vsel %vm410_vm0, %v1020_v14, %v1001_v46  ;;  %v1851_v0 = vrot.slane %v1021_v5, 4 }
 0x40c   :  { %v1947_v28 = vsel %vm410_vm0, %v1946_v38, %v1929_v50  ;;  %v1948_v39 = vrot.slane %v1929_v50, 4  ;;  %v1953_v53 = vsel %vm410_vm0, %v1945_v6, %v1952_v20  ;;  %v2213_v55 = vpack.c.bf16 %v1951_v18, %v1951_v18 }
 0x40d   :  { %v2181_v16 = vpack.c.bf16 %v1947_v28, %v1947_v28  ;;  %v2229_v33 = vpack.c.bf16 %v1953_v53, %v1953_v53  ;;  %v1023_v11 = vsel %vm410_vm0, 0.0, %v1022_v19  ;;  %v1025_v32 = vsel %vm410_vm0, 0.0, %v1024_v45 }
 0x40e   :  { %v1949_v17 = vsel %vm410_vm0, %v1941_v3, %v1948_v39  ;;  %2278 = vst.msk [vmem:[%s11441_s7 + $0xac] sm:$0xf] %vm2234_vm1, %v2213_v55  ;;  %v1850_v46 = vperm.slane %v1846_v47, %v7557_v57  ;;  %v1852_v2 = vsel %vm410_vm0, %v1851_v0, %v1019_v34  ;;  %v1857_v14 = vsel %vm410_vm0, %v1024_v45, %v1013_v12 }
 0x40f   :  { %v2197_v52 = vpack.c.bf16 %v1949_v17, %v1949_v17  ;;  %2246 = vst.msk [vmem:[%s11441_s7 + $0x2c] sm:$0xf] %vm2234_vm1, %v2181_v16  ;;  %v1856_v61 = vperm.slane %v1852_v2, %v7557_v57  ;;  %v1861_v23 = vperm.slane %v1857_v14, %v7557_v57  ;;  %v1862_v6 = vrot.slane %v1025_v32, 4 }
 0x410   :  { %v5549_v48 = vrot.slane %v10899_v8, 4  ;;  %2294 = vst.msk [vmem:[%s11441_s7 + $0xec] sm:$0xf] %vm2234_vm1, %v2229_v33  ;;  %v1870_v3 = vrot.slane %v1850_v46, 4  ;;  %v7139_v7 = vunpack.i.h.bf16 %v7137_v25  ;;  %v7138_v34 = vunpack.i.l.bf16 %v7137_v25 }
 0x411   :  { %v11002_v63 = vperm.slane %v10915_v49, %v7557_v57  ;;  %2262 = vst.msk [vmem:[%s11441_s7 + $0x6c] sm:$0xf] %vm2234_vm1, %v2197_v52  ;;  %v1863_v12 = vsel %vm410_vm0, %v1862_v6, %v1023_v11  ;;  %v1868_v5 = vrot.slane %v1856_v61, 4  ;;  %v1882_v50 = vrot.slane %v1861_v23, 4 }
 0x412   :  { %v5604_v38 = vperm.slane %v10935_v60, %v7557_v57  ;;  %v1867_v20 = vperm.slane %v1863_v12, %v7557_v57  ;;  %v1871_v45 = vsel %vm410_vm0, %v1856_v61, %v1870_v3  ;;  %v5357_v18 = vrot.slane %v7139_v7, 4 }
 0x413   :  { %v1869_v49 = vsel %vm410_vm0, %v1868_v5, %v1850_v46  ;;  %v1879_v19 = vperm.slane %v1871_v45, %v7614_v21  ;;  %v5360_v47 = vsel %vm410_vm0, %v7139_v7, %v5359_v22  ;;  %v7144_v0 = vunpack.i.h.bf16 %v7142_v13 }
 0x414   :  { %v1875_v28 = vperm.slane %v1869_v49, %v7614_v21  ;;  %v1880_v39 = vrot.slane %v1867_v20, 4  ;;  %v1883_v53 = vsel %vm410_vm0, %v1867_v20, %v1882_v50  ;;  %v5301_v60 = vrot.slane %v7138_v34, 4 }
 0x415   :  { %v5561_v55 = vrot.slane %v10930_v26, 4  ;;  %v1891_v16 = vperm.slane %v1883_v53, %v7614_v21  ;;  %v1898_v33 = vrot.slane %v1879_v19, 4  ;;  %v5358_v11 = vsel %vm410_vm0, %v5357_v18, %v8693_v30 }
 0x416   :  { %v5605_v32 = vrot.slane %v11002_v63, 4  ;;  %v1881_v25 = vsel %vm410_vm0, %v1880_v39, %v1861_v23  ;;  %v1894_v22 = vrot.slane %v1875_v28, 4  ;;  %v11027_v17 = vperm.slane %v5360_v47, %v7557_v57 }
 0x417   :  { %v5617_v46 = vrot.slane %v5604_v38, 4  ;;  %v1887_v2 = vperm.slane %v1881_v25, %v7614_v21  ;;  %v1896_v14 = vrot.slane %v1891_v16, 4  ;;  %v1899_v52 = vsel %vm410_vm0, %v1891_v16, %v1898_v33 }
 0x418   :  { %v2228_v61 = vpack.c.bf16 %v1899_v52, %v1899_v52  ;;  %v11032_v6 = vperm.slane %v5358_v11, %v7557_v57  ;;  %v5302_v30 = vsel %vm410_vm0, %v5301_v60, %v8500_v56  ;;  %v5581_v3 = vrot.slane %v7144_v0, 4  ;;  %v11079_v11 = vpop.permute.xlu1 %7151 }
 0x419   :  { %v1892_v7 = vrot.slane %v1887_v2, 4  ;;  %v1895_v23 = vsel %vm410_vm0, %v1887_v2, %v1894_v22  ;;  %v1897_v12 = vsel %vm410_vm0, %v1896_v14, %v1879_v19  ;;  %v5584_v5 = vsel %vm410_vm0, %v7144_v0, %v5583_v29 }
 0x41a   :  { %v2196_v50 = vpack.c.bf16 %v1895_v23, %v1895_v23  ;;  %v2212_v20 = vpack.c.bf16 %v1897_v12, %v1897_v12  ;;  %2293 = vst.msk [vmem:[%s11441_s7 + $0xe8] sm:$0xf] %vm2234_vm1, %v2228_v61  ;;  %v5395_v45 = vrot.slane %v11027_v17, 4  ;;  %v11049_v18 = vsel %vm410_vm0, %v7138_v34, %v5303_v41 }
 0x41b   :  { %v1893_v49 = vsel %vm410_vm0, %v1892_v7, %v1875_v28  ;;  %v5582_v19 = vsel %vm410_vm0, %v5581_v3, %v8503_v40  ;;  %v5592_v29 = vperm.slane %v5584_v5, %v7557_v57  ;;  %v7143_v47 = vunpack.i.l.bf16 %v7142_v13 }
 0x41c   :  { %v2180_v0 = vpack.c.bf16 %v1893_v49, %v1893_v49  ;;  %2261 = vst.msk [vmem:[%s11441_s7 + $0x68] sm:$0xf] %vm2234_vm1, %v2196_v50  ;;  %v5383_v39 = vrot.slane %v11032_v6, 4  ;;  %v11061_v56 = vperm.slane %v5302_v30, %v7557_v57  ;;  %v5588_v41 = vperm.slane %v5582_v19, %v7557_v57 }
 0x41d   :  { %2277 = vst.msk [vmem:[%s11441_s7 + $0xa8] sm:$0xf] %vm2234_vm1, %v2212_v20  ;;  %v5618_v40 = vsel %vm410_vm0, %v5617_v46, %v5592_v29  ;;  %v5619_v34 = vrot.slane %v5592_v29, 4  ;;  %v5525_v13 = vrot.slane %v7143_v47, 4  ;;  %v5528_v28 = vsel %vm410_vm0, %v7143_v47, %v5527_v15 }
 0x41e   :  { %2245 = vst.msk [vmem:[%s11441_s7 + $0x28] sm:$0xf] %vm2234_vm1, %v2180_v0  ;;  %v5606_v53 = vsel %vm410_vm0, %v5605_v32, %v5588_v41  ;;  %v5607_v60 = vrot.slane %v5588_v41, 4  ;;  %v5624_v16 = vperm.slane %v5618_v40, %v7614_v21  ;;  %v5536_v33 = vperm.slane %v5528_v28, %v7557_v57 }
 0x41f   :  { %v5612_v25 = vperm.slane %v5606_v53, %v7614_v21  ;;  %v5620_v22 = vsel %vm410_vm0, %v5604_v38, %v5619_v34  ;;  %v5526_v15 = vsel %vm410_vm0, %v5525_v13, %v8464_v9  ;;  %v7154_v46 = vunpack.i.h.bf16 %v11079_v11 }
 0x420   :  { %v5608_v2 = vsel %vm410_vm0, %v11002_v63, %v5607_v60  ;;  %v5628_v32 = vperm.slane %v5620_v22, %v7614_v21  ;;  %v5633_v14 = vrot.slane %v5624_v16, 4  ;;  %v5532_v52 = vperm.slane %v5526_v15, %v7557_v57 }
 0x421   :  { %v5616_v61 = vperm.slane %v5608_v2, %v7614_v21  ;;  %v5629_v30 = vrot.slane %v5612_v25, 4  ;;  %v5562_v3 = vsel %vm410_vm0, %v5561_v55, %v5536_v33  ;;  %v5563_v7 = vrot.slane %v5536_v33, 4 }
 0x422   :  { %v5634_v38 = vsel %vm410_vm0, 0.0, %v5633_v14  ;;  %v5635_v23 = vrot.slane %v5628_v32, 4  ;;  %v5550_v9 = vsel %vm410_vm0, %v5549_v48, %v5532_v52  ;;  %v5551_v12 = vrot.slane %v5532_v52, 4 }
 0x423   :  { %v5630_v63 = vsel %vm410_vm0, 0.0, %v5629_v30  ;;  %v5631_v5 = vrot.slane %v5616_v61, 4  ;;  %v5556_v50 = vperm.slane %v5550_v9, %v7614_v21  ;;  %v5564_v20 = vsel %vm410_vm0, %v10930_v26, %v5563_v7 }
 0x424   :  { %v5636_v49 = vsel %vm410_vm0, 0.0, %v5635_v23  ;;  %v6458_v55 = vsel %vm410_vm0, %v5635_v23, %v5624_v16  ;;  %v5552_v19 = vsel %vm410_vm0, %v10899_v8, %v5551_v12  ;;  %v5568_v29 = vperm.slane %v5562_v3, %v7614_v21 }
 0x425   :  { %v5632_v48 = vsel %vm410_vm0, 0.0, %v5631_v5  ;;  %v6447_v47 = vsel %vm410_vm0, %v5631_v5, %v5612_v25  ;;  %v6462_v0 = vperm.slane %v6458_v55, %v7557_v57  ;;  %v6463_v41 = vrot.slane %v5636_v49, 4 }
 0x426   :  { %v6451_v40 = vperm.slane %v6447_v47, %v7557_v57  ;;  %v6452_v34 = vrot.slane %v5632_v48, 4  ;;  %v5560_v26 = vperm.slane %v5552_v19, %v7614_v21  ;;  %v5572_v13 = vperm.slane %v5564_v20, %v7614_v21 }
 0x427   :  { %v6464_v28 = vsel %vm410_vm0, %v6463_v41, %v5634_v38  ;;  %v6483_v53 = vrot.slane %v6462_v0, 4  ;;  %v5573_v8 = vrot.slane %v5556_v50, 4  ;;  %v5577_v60 = vrot.slane %v5568_v29, 4 }
 0x428   :  { %v6453_v16 = vsel %vm410_vm0, %v6452_v34, %v5630_v63  ;;  %v6468_v33 = vperm.slane %v6464_v28, %v7557_v57  ;;  %v6471_v25 = vrot.slane %v6451_v40, 4  ;;  %v5575_v22 = vrot.slane %v5560_v26, 4 }
 0x429   :  { %v6457_v15 = vperm.slane %v6453_v16, %v7557_v57  ;;  %v5574_v2 = vsel %vm410_vm0, 0.0, %v5573_v8  ;;  %v5578_v32 = vsel %vm410_vm0, 0.0, %v5577_v60  ;;  %v5579_v14 = vrot.slane %v5572_v13, 4 }
 0x42a   :  { %v6481_v52 = vrot.slane %v6468_v33, 4  ;;  %v6484_v61 = vsel %vm410_vm0, %v6468_v33, %v6483_v53  ;;  %v5576_v30 = vsel %vm410_vm0, 0.0, %v5575_v22  ;;  %v6393_v3 = vsel %vm410_vm0, %v5575_v22, %v5556_v50 }
 0x42b   :  { %v6469_v7 = vrot.slane %v6457_v15, 4  ;;  %v6472_v38 = vsel %vm410_vm0, %v6457_v15, %v6471_v25  ;;  %v6492_v23 = vperm.slane %v6484_v61, %v7614_v21  ;;  %v5580_v9 = vsel %vm410_vm0, 0.0, %v5579_v14 }
 0x42c   :  { %v6480_v12 = vperm.slane %v6472_v38, %v7614_v21  ;;  %v6482_v63 = vsel %vm410_vm0, %v6481_v52, %v6462_v0  ;;  %v6397_v5 = vperm.slane %v6393_v3, %v7557_v57  ;;  %v6398_v20 = vrot.slane %v5576_v30, 4 }
 0x42d   :  { %v6470_v49 = vsel %vm410_vm0, %v6469_v7, %v6451_v40  ;;  %v6488_v55 = vperm.slane %v6482_v63, %v7614_v21  ;;  %v6497_v19 = vrot.slane %v6492_v23, 4  ;;  %v6404_v50 = vsel %vm410_vm0, %v5579_v14, %v5568_v29 }
 0x42e   :  { %v6476_v48 = vperm.slane %v6470_v49, %v7614_v21  ;;  %v6499_v47 = vrot.slane %v6480_v12, 4  ;;  %v6399_v41 = vsel %vm410_vm0, %v6398_v20, %v5574_v2  ;;  %v6408_v34 = vperm.slane %v6404_v50, %v7557_v57 }
 0x42f   :  { %v6493_v26 = vrot.slane %v6488_v55, 4  ;;  %v6498_v0 = vsel %vm410_vm0, %v6497_v19, %v6480_v12  ;;  %v6403_v13 = vperm.slane %v6399_v41, %v7557_v57  ;;  %v6409_v28 = vrot.slane %v5580_v9, 4 }
 0x430   :  { %v6495_v53 = vrot.slane %v6476_v48, 4  ;;  %v6500_v40 = vsel %vm410_vm0, %v6492_v23, %v6499_v47  ;;  %v6548_v8 = vpack.c.bf16 %v6498_v0, %v6498_v0  ;;  %v6417_v60 = vrot.slane %v6397_v5, 4 }
 0x431   :  { %v6494_v29 = vsel %vm410_vm0, %v6493_v26, %v6476_v48  ;;  %v6564_v16 = vpack.c.bf16 %v6500_v40, %v6500_v40  ;;  %v6410_v33 = vsel %vm410_vm0, %v6409_v28, %v5578_v32  ;;  %v6415_v25 = vrot.slane %v6403_v13, 4 }
 0x432   :  { %v6496_v22 = vsel %vm410_vm0, %v6488_v55, %v6495_v53  ;;  %v6516_v15 = vpack.c.bf16 %v6494_v29, %v6494_v29  ;;  %6612 = vst.msk [vmem:[%s11443_s9 + $0xbc] sm:$0xf] %vm2234_vm1, %v6548_v8  ;;  %v6414_v2 = vperm.slane %v6410_v33, %v7557_v57  ;;  %v6418_v14 = vsel %vm410_vm0, %v6403_v13, %v6417_v60 }
 0x433   :  { %v6532_v52 = vpack.c.bf16 %v6496_v22, %v6496_v22  ;;  %6628 = vst.msk [vmem:[%s11443_s9 + $0xfc] sm:$0xf] %vm2234_vm1, %v6564_v16  ;;  %v6416_v32 = vsel %vm410_vm0, %v6415_v25, %v6397_v5  ;;  %v6426_v61 = vperm.slane %v6418_v14, %v7614_v21  ;;  %v6429_v30 = vrot.slane %v6408_v34, 4 }
 0x434   :  { %6580 = vst.msk [vmem:[%s11443_s9 + $0x3c] sm:$0xf] %vm2234_vm1, %v6516_v15  ;;  %v6422_v3 = vperm.slane %v6416_v32, %v7614_v21  ;;  %v6427_v7 = vrot.slane %v6414_v2, 4  ;;  %v5481_v38 = vrot.slane %v7154_v46, 4  ;;  %v7153_v23 = vunpack.i.l.bf16 %v11079_v11 }
 0x435   :  { %v11160_v9 = vperm.slane %v11049_v18, %v7557_v57  ;;  %6596 = vst.msk [vmem:[%s11443_s9 + $0x7c] sm:$0xf] %vm2234_vm1, %v6532_v52  ;;  %v6430_v12 = vsel %vm410_vm0, %v6414_v2, %v6429_v30  ;;  %v6445_v63 = vrot.slane %v6426_v61, 4  ;;  %v5484_v5 = vsel %vm410_vm0, %v7154_v46, %v10583_v24 }
 0x436   :  { %v6428_v20 = vsel %vm410_vm0, %v6427_v7, %v6408_v34  ;;  %v6438_v49 = vperm.slane %v6430_v12, %v7614_v21  ;;  %v6441_v55 = vrot.slane %v6422_v3, 4  ;;  %v5425_v18 = vrot.slane %v7153_v23, 4 }
 0x437   :  { %v6434_v19 = vperm.slane %v6428_v20, %v7614_v21  ;;  %v5428_v50 = vsel %vm410_vm0, %v7153_v23, %v10717_v36  ;;  %v5482_v48 = vsel %vm410_vm0, %v5481_v38, %v7079_v59  ;;  %v5492_v47 = vperm.slane %v5484_v5, %v7557_v57 }
 0x438   :  { %v6443_v11 = vrot.slane %v6438_v49, 4  ;;  %v6446_v24 = vsel %vm410_vm0, %v6438_v49, %v6445_v63  ;;  %v5426_v46 = vsel %vm410_vm0, %v5425_v18, %v7078_v10  ;;  %v5436_v41 = vperm.slane %v5428_v50, %v7557_v57 }
 0x439   :  { %v6439_v34 = vrot.slane %v6434_v19, 4  ;;  %v6442_v26 = vsel %vm410_vm0, %v6434_v19, %v6441_v55  ;;  %v6563_v0 = vpack.c.bf16 %v6446_v24, %v6446_v24  ;;  %v5432_v36 = vperm.slane %v5426_v46, %v7557_v57 }
 0x43a   :  { %v6444_v13 = vsel %vm410_vm0, %v6443_v11, %v6426_v61  ;;  %v6531_v59 = vpack.c.bf16 %v6442_v26, %v6442_v26  ;;  %v5449_v28 = vrot.slane %v5436_v41, 4  ;;  %v5452_v53 = vsel %vm410_vm0, %v5436_v41, %v5451_v27 }
 0x43b   :  { %v6440_v1 = vsel %vm410_vm0, %v6439_v34, %v6422_v3  ;;  %v6547_v40 = vpack.c.bf16 %v6444_v13, %v6444_v13  ;;  %6627 = vst.msk [vmem:[%s11443_s9 + $0xf8] sm:$0xf] %vm2234_vm1, %v6563_v0  ;;  %v5437_v10 = vrot.slane %v5432_v36, 4  ;;  %v5440_v8 = vsel %vm410_vm0, %v5432_v36, %v5439_v4 }
 0x43c   :  { %v6515_v60 = vpack.c.bf16 %v6440_v1, %v6440_v1  ;;  %6595 = vst.msk [vmem:[%s11443_s9 + $0x78] sm:$0xf] %vm2234_vm1, %v6531_v59  ;;  %v5448_v27 = vperm.slane %v5440_v8, %v7614_v21  ;;  %v5450_v29 = vsel %vm410_vm0, %v5449_v28, %v10262_v44  ;;  %v5460_v16 = vperm.slane %v5452_v53, %v7614_v21 }
 0x43d   :  { %6611 = vst.msk [vmem:[%s11443_s9 + $0xb8] sm:$0xf] %vm2234_vm1, %v6547_v40  ;;  %v5438_v4 = vsel %vm410_vm0, %v5437_v10, %v10280_v62  ;;  %v5456_v33 = vperm.slane %v5450_v29, %v7614_v21  ;;  %v5488_v25 = vperm.slane %v5482_v48, %v7557_v57  ;;  %v5505_v22 = vrot.slane %v5492_v47, 4 }
 0x43e   :  { %6579 = vst.msk [vmem:[%s11443_s9 + $0x38] sm:$0xf] %vm2234_vm1, %v6515_v60  ;;  %v5444_v44 = vperm.slane %v5438_v4, %v7614_v21  ;;  %v5463_v15 = vrot.slane %v5448_v27, 4  ;;  %v5467_v2 = vrot.slane %v5460_v16, 4  ;;  %v5508_v14 = vsel %vm410_vm0, %v5492_v47, %v5507_v35 }
 0x43f   :  { %v5465_v52 = vrot.slane %v5456_v33, 4  ;;  %v5493_v62 = vrot.slane %v5488_v25, 4  ;;  %v5496_v32 = vsel %vm410_vm0, %v5488_v25, %v5495_v54  ;;  %v5506_v61 = vsel %vm410_vm0, %v5505_v22, %v10148_v42 }
 0x440   :  { %v5461_v30 = vrot.slane %v5444_v44, 4  ;;  %v5464_v3 = vsel %vm410_vm0, 0.0, %v5463_v15  ;;  %v5468_v7 = vsel %vm410_vm0, 0.0, %v5467_v2  ;;  %v5504_v38 = vperm.slane %v5496_v32, %v7614_v21 }
 0x441   :  { %v5466_v23 = vsel %vm410_vm0, 0.0, %v5465_v52  ;;  %v5494_v35 = vsel %vm410_vm0, %v5493_v62, %v10145_v31  ;;  %v5512_v12 = vperm.slane %v5506_v61, %v7614_v21  ;;  %v5516_v63 = vperm.slane %v5508_v14, %v7614_v21 }
 0x442   :  { %v5462_v54 = vsel %vm410_vm0, 0.0, %v5461_v30  ;;  %v5500_v42 = vperm.slane %v5494_v35, %v7614_v21  ;;  %v5519_v5 = vrot.slane %v5504_v38, 4  ;;  %v6285_v20 = vsel %vm410_vm0, %v5463_v15, %v5444_v44 }
 0x443   :  { %v5521_v49 = vrot.slane %v5512_v12, 4  ;;  %v5523_v55 = vrot.slane %v5516_v63, 4  ;;  %v6289_v18 = vperm.slane %v6285_v20, %v7557_v57  ;;  %v6290_v19 = vrot.slane %v5464_v3, 4 }
 0x444   :  { %v5517_v50 = vrot.slane %v5500_v42, 4  ;;  %v5520_v48 = vsel %vm410_vm0, 0.0, %v5519_v5  ;;  %v6296_v31 = vsel %vm410_vm0, %v5467_v2, %v5456_v33  ;;  %v6301_v47 = vrot.slane %v5468_v7, 4 }
 0x445   :  { %v5522_v11 = vsel %vm410_vm0, 0.0, %v5521_v49  ;;  %v5524_v24 = vsel %vm410_vm0, 0.0, %v5523_v55  ;;  %v6291_v46 = vsel %vm410_vm0, %v6290_v19, %v5462_v54  ;;  %v6300_v41 = vperm.slane %v6296_v31, %v7557_v57  ;;  %v7147_v49 = vpop.permute.xlu0 %7146 }
 0x446   :  { %v5518_v34 = vsel %vm410_vm0, 0.0, %v5517_v50  ;;  %v6295_v26 = vperm.slane %v6291_v46, %v7557_v57  ;;  %v6302_v0 = vsel %vm410_vm0, %v6301_v47, %v5466_v23  ;;  %v6309_v36 = vrot.slane %v6289_v18, 4 }
 0x447   :  { %v6306_v13 = vperm.slane %v6302_v0, %v7557_v57  ;;  %v6321_v59 = vrot.slane %v6300_v41, 4  ;;  %v6339_v28 = vsel %vm410_vm0, %v5519_v5, %v5500_v42  ;;  %v6344_v53 = vrot.slane %v5520_v48, 4 }
 0x448   :  { %v6307_v1 = vrot.slane %v6295_v26, 4  ;;  %v6310_v40 = vsel %vm410_vm0, %v6295_v26, %v6309_v36  ;;  %v6343_v10 = vperm.slane %v6339_v28, %v7557_v57  ;;  %v6350_v8 = vsel %vm410_vm0, %v5523_v55, %v5512_v12 }
 0x449   :  { %v6318_v60 = vperm.slane %v6310_v40, %v7614_v21  ;;  %v6319_v27 = vrot.slane %v6306_v13, 4  ;;  %v6322_v29 = vsel %vm410_vm0, %v6306_v13, %v6321_v59  ;;  %v6345_v16 = vsel %vm410_vm0, %v6344_v53, %v5518_v34 }
 0x44a   :  { %v6308_v4 = vsel %vm410_vm0, %v6307_v1, %v6289_v18  ;;  %v6330_v33 = vperm.slane %v6322_v29, %v7614_v21  ;;  %v6349_v25 = vperm.slane %v6345_v16, %v7557_v57  ;;  %v6354_v22 = vperm.slane %v6350_v8, %v7557_v57 }
 0x44b   :  { %v6314_v44 = vperm.slane %v6308_v4, %v7614_v21  ;;  %v6320_v15 = vsel %vm410_vm0, %v6319_v27, %v6300_v41  ;;  %v6337_v2 = vrot.slane %v6318_v60, 4  ;;  %v6355_v14 = vrot.slane %v5524_v24, 4 }
 0x44c   :  { %v6326_v52 = vperm.slane %v6320_v15, %v7614_v21  ;;  %v6335_v62 = vrot.slane %v6330_v33, 4  ;;  %v6361_v32 = vrot.slane %v6349_v25, 4  ;;  %v6363_v61 = vrot.slane %v6343_v10, 4 }
 0x44d   :  { %v6333_v30 = vrot.slane %v6314_v44, 4  ;;  %v6338_v3 = vsel %vm410_vm0, %v6330_v33, %v6337_v2  ;;  %v6356_v7 = vsel %vm410_vm0, %v6355_v14, %v5522_v11  ;;  %v6375_v38 = vrot.slane %v6354_v22, 4 }
 0x44e   :  { %v6331_v23 = vrot.slane %v6326_v52, 4  ;;  %v6336_v35 = vsel %vm410_vm0, %v6335_v62, %v6318_v60  ;;  %v6360_v12 = vperm.slane %v6356_v7, %v7557_v57  ;;  %v6362_v63 = vsel %vm410_vm0, %v6361_v32, %v6343_v10 }
 0x44f   :  { %v6334_v54 = vsel %vm410_vm0, %v6326_v52, %v6333_v30  ;;  %v6364_v42 = vsel %vm410_vm0, %v6349_v25, %v6363_v61  ;;  %v6368_v5 = vperm.slane %v6362_v63, %v7614_v21  ;;  %v6545_v20 = vpack.c.bf16 %v6336_v35, %v6336_v35 }
 0x450   :  { %v6332_v55 = vsel %vm410_vm0, %v6331_v23, %v6314_v44  ;;  %v6372_v18 = vperm.slane %v6364_v42, %v7614_v21  ;;  %v6373_v19 = vrot.slane %v6360_v12, 4  ;;  %v6376_v50 = vsel %vm410_vm0, %v6360_v12, %v6375_v38 }
 0x451   :  { %v6384_v48 = vperm.slane %v6376_v50, %v7614_v21  ;;  %v6387_v31 = vrot.slane %v6368_v5, 4  ;;  %v6513_v47 = vpack.c.bf16 %v6332_v55, %v6332_v55  ;;  %v6529_v11 = vpack.c.bf16 %v6334_v54, %v6334_v54  ;;  %6609 = vst.msk [vmem:[%s11443_s9 + $0xb0] sm:$0xf] %vm2234_vm1, %v6545_v20 }
 0x452   :  { %v6374_v24 = vsel %vm410_vm0, %v6373_v19, %v6354_v22  ;;  %v6391_v46 = vrot.slane %v6372_v18, 4  ;;  %v6561_v41 = vpack.c.bf16 %v6338_v3, %v6338_v3  ;;  %v7149_v34 = vunpack.i.h.bf16 %v7147_v49 }
 0x453   :  { %v5327_v26 = vrot.slane %v11061_v56, 4  ;;  %v6380_v0 = vperm.slane %v6374_v24, %v7614_v21  ;;  %v6389_v36 = vrot.slane %v6384_v48, 4  ;;  %6577 = vst.msk [vmem:[%s11443_s9 + $0x30] sm:$0xf] %vm2234_vm1, %v6513_v47  ;;  %v7148_v13 = vunpack.i.l.bf16 %v7147_v49 }
 0x454   :  { %v5339_v59 = vrot.slane %v11160_v9, 4  ;;  %v6392_v28 = vsel %vm410_vm0, %v6384_v48, %v6391_v46  ;;  %6593 = vst.msk [vmem:[%s11443_s9 + $0x70] sm:$0xf] %vm2234_vm1, %v6529_v11  ;;  %v5369_v53 = vrot.slane %v7149_v34, 4  ;;  %v5372_v1 = vsel %vm410_vm0, %v7149_v34, %v10721_v58 }
 0x455   :  { %v6385_v40 = vrot.slane %v6380_v0, 4  ;;  %v6388_v10 = vsel %vm410_vm0, %v6380_v0, %v6387_v31  ;;  %v6390_v8 = vsel %vm410_vm0, %v6389_v36, %v6372_v18  ;;  %v6562_v60 = vpack.c.bf16 %v6392_v28, %v6392_v28  ;;  %6625 = vst.msk [vmem:[%s11443_s9 + $0xf0] sm:$0xf] %vm2234_vm1, %v6561_v41 }
 0x456   :  { %v6530_v27 = vpack.c.bf16 %v6388_v10, %v6388_v10  ;;  %v6546_v29 = vpack.c.bf16 %v6390_v8, %v6390_v8  ;;  %v5370_v16 = vsel %vm410_vm0, %v5369_v53, %v7129_v37  ;;  %v5380_v4 = vperm.slane %v5372_v1, %v7557_v57 }
 0x457   :  { %v6386_v58 = vsel %vm410_vm0, %v6385_v40, %v6368_v5  ;;  %6626 = vst.msk [vmem:[%s11443_s9 + $0xf4] sm:$0xf] %vm2234_vm1, %v6562_v60  ;;  %v5376_v33 = vperm.slane %v5370_v16, %v7557_v57  ;;  %v5313_v25 = vrot.slane %v7148_v13, 4  ;;  %v5316_v22 = vsel %vm410_vm0, %v7148_v13, %v10725_v43 }
 0x458   :  { %v6514_v44 = vpack.c.bf16 %v6386_v58, %v6386_v58  ;;  %6594 = vst.msk [vmem:[%s11443_s9 + $0x74] sm:$0xf] %vm2234_vm1, %v6530_v27  ;;  %v5393_v37 = vrot.slane %v5380_v4, 4  ;;  %v5396_v15 = vsel %vm410_vm0, %v5380_v4, %v5395_v45  ;;  %v5324_v2 = vperm.slane %v5316_v22, %v7557_v57 }
 0x459   :  { %6610 = vst.msk [vmem:[%s11443_s9 + $0xb4] sm:$0xf] %vm2234_vm1, %v6546_v29  ;;  %v5381_v14 = vrot.slane %v5376_v33, 4  ;;  %v5384_v43 = vsel %vm410_vm0, %v5376_v33, %v5383_v39  ;;  %v5404_v52 = vperm.slane %v5396_v15, %v7614_v21  ;;  %v11563_v62 = vunpack.i.l.bf16 %v10572_v51 }
 0x45a   :  { %6578 = vst.msk [vmem:[%s11443_s9 + $0x34] sm:$0xf] %vm2234_vm1, %v6514_v44  ;;  %v5392_v45 = vperm.slane %v5384_v43, %v7614_v21  ;;  %v5394_v61 = vsel %vm410_vm0, %v5393_v37, %v11027_v17  ;;  %v5337_v3 = vrot.slane %v5324_v2, 4  ;;  %v5340_v38 = vsel %vm410_vm0, %v5324_v2, %v5339_v59 }
 0x45b   :  { %v5314_v32 = vsel %vm410_vm0, %v5313_v25, %v11563_v62  ;;  %v5382_v39 = vsel %vm410_vm0, %v5381_v14, %v11032_v6  ;;  %v5400_v51 = vperm.slane %v5394_v61, %v7614_v21  ;;  %v5411_v7 = vrot.slane %v5404_v52, 4 }
 0x45c   :  { %v5320_v30 = vperm.slane %v5314_v32, %v7557_v57  ;;  %v5388_v23 = vperm.slane %v5382_v39, %v7614_v21  ;;  %v5407_v35 = vrot.slane %v5392_v45, 4  ;;  %v5338_v24 = vsel %vm410_vm0, %v5337_v3, %v11160_v9 }
 0x45d   :  { %v5409_v54 = vrot.slane %v5400_v51, 4  ;;  %v5412_v17 = vsel %vm410_vm0, 0.0, %v5411_v7  ;;  %v6242_v42 = vsel %vm410_vm0, %v5411_v7, %v5400_v51  ;;  %v5344_v13 = vperm.slane %v5338_v24, %v7614_v21 }
 0x45e   :  { %v5325_v12 = vrot.slane %v5320_v30, 4  ;;  %v5328_v63 = vsel %vm410_vm0, %v5320_v30, %v5327_v26  ;;  %v5405_v20 = vrot.slane %v5388_v23, 4  ;;  %v5408_v6 = vsel %vm410_vm0, 0.0, %v5407_v35 }
 0x45f   :  { %v5336_v5 = vperm.slane %v5328_v63, %v7614_v21  ;;  %v6231_v49 = vsel %vm410_vm0, %v5407_v35, %v5388_v23  ;;  %v6246_v55 = vperm.slane %v6242_v42, %v7557_v57  ;;  %v5410_v18 = vsel %vm410_vm0, 0.0, %v5409_v54 }
 0x460   :  { %v6235_v19 = vperm.slane %v6231_v49, %v7557_v57  ;;  %v6236_v50 = vrot.slane %v5408_v6, 4  ;;  %v6247_v48 = vrot.slane %v5412_v17, 4  ;;  %v5406_v31 = vsel %vm410_vm0, 0.0, %v5405_v20 }
 0x461   :  { %v6267_v47 = vrot.slane %v6246_v55, 4  ;;  %v5326_v11 = vsel %vm410_vm0, %v5325_v12, %v11061_v56  ;;  %v5348_v59 = vperm.slane %v5340_v38, %v7614_v21  ;;  %v5351_v56 = vrot.slane %v5336_v5, 4 }
 0x462   :  { %v6237_v46 = vsel %vm410_vm0, %v6236_v50, %v5406_v31  ;;  %v6248_v41 = vsel %vm410_vm0, %v6247_v48, %v5410_v18  ;;  %v6255_v34 = vrot.slane %v6235_v19, 4  ;;  %v5332_v26 = vperm.slane %v5326_v11, %v7614_v21 }
 0x463   :  { %v6241_v0 = vperm.slane %v6237_v46, %v7557_v57  ;;  %v6252_v36 = vperm.slane %v6248_v41, %v7557_v57  ;;  %v5352_v27 = vsel %vm410_vm0, 0.0, %v5351_v56  ;;  %v5353_v4 = vrot.slane %v5344_v13, 4 }
 0x464   :  { %v5349_v28 = vrot.slane %v5332_v26, 4  ;;  %v5355_v58 = vrot.slane %v5348_v59, 4  ;;  %v6177_v2 = vsel %vm410_vm0, %v5351_v56, %v5332_v26  ;;  %v6182_v14 = vrot.slane %v5352_v27, 4 }
 0x465   :  { %v6253_v53 = vrot.slane %v6241_v0, 4  ;;  %v6256_v9 = vsel %vm410_vm0, %v6241_v0, %v6255_v34  ;;  %v6265_v1 = vrot.slane %v6252_v36, 4  ;;  %v6268_v40 = vsel %vm410_vm0, %v6252_v36, %v6267_v47 }
 0x466   :  { %v6264_v10 = vperm.slane %v6256_v9, %v7614_v21  ;;  %v6276_v8 = vperm.slane %v6268_v40, %v7614_v21  ;;  %v5350_v60 = vsel %vm410_vm0, 0.0, %v5349_v28  ;;  %v5354_v37 = vsel %vm410_vm0, 0.0, %v5353_v4 }
 0x467   :  { %v6254_v29 = vsel %vm410_vm0, %v6253_v53, %v6235_v19  ;;  %v6266_v16 = vsel %vm410_vm0, %v6265_v1, %v6246_v55  ;;  %v5356_v15 = vsel %vm410_vm0, 0.0, %v5355_v58  ;;  %v6181_v30 = vperm.slane %v6177_v2, %v7557_v57 }
 0x468   :  { %v6260_v33 = vperm.slane %v6254_v29, %v7614_v21  ;;  %v6272_v25 = vperm.slane %v6266_v16, %v7614_v21  ;;  %v6281_v22 = vrot.slane %v6276_v8, 4  ;;  %v6283_v44 = vrot.slane %v6264_v10, 4 }
 0x469   :  { %v6183_v3 = vsel %vm410_vm0, %v6182_v14, %v5350_v60  ;;  %v6188_v38 = vsel %vm410_vm0, %v5355_v58, %v5344_v13  ;;  %v6193_v63 = vrot.slane %v5356_v15, 4  ;;  %v6201_v17 = vrot.slane %v6181_v30, 4 }
 0x46a   :  { %v6277_v43 = vrot.slane %v6272_v25, 4  ;;  %v6279_v52 = vrot.slane %v6260_v33, 4  ;;  %v6282_v62 = vsel %vm410_vm0, %v6281_v22, %v6264_v10  ;;  %v6284_v32 = vsel %vm410_vm0, %v6276_v8, %v6283_v44 }
 0x46b   :  { %v6544_v45 = vpack.c.bf16 %v6282_v62, %v6282_v62  ;;  %v6560_v61 = vpack.c.bf16 %v6284_v32, %v6284_v32  ;;  %v6187_v7 = vperm.slane %v6183_v3, %v7557_v57  ;;  %v6192_v12 = vperm.slane %v6188_v38, %v7557_v57 }
 0x46c   :  { %v6278_v39 = vsel %vm410_vm0, %v6277_v43, %v6260_v33  ;;  %v6280_v51 = vsel %vm410_vm0, %v6272_v25, %v6279_v52  ;;  %v6194_v42 = vsel %vm410_vm0, %v6193_v63, %v5354_v37 }
 0x46d   :  { %v6512_v23 = vpack.c.bf16 %v6278_v39, %v6278_v39  ;;  %v6528_v35 = vpack.c.bf16 %v6280_v51, %v6280_v51  ;;  %6608 = vst.msk [vmem:[%s11443_s9 + $0xac] sm:$0xf] %vm2234_vm1, %v6544_v45  ;;  %v6199_v54 = vrot.slane %v6187_v7, 4  ;;  %v6213_v5 = vrot.slane %v6192_v12, 4 }
 0x46e   :  { %6624 = vst.msk [vmem:[%s11443_s9 + $0xec] sm:$0xf] %vm2234_vm1, %v6560_v61  ;;  %v6198_v20 = vperm.slane %v6194_v42, %v7557_v57  ;;  %v6202_v49 = vsel %vm410_vm0, %v6187_v7, %v6201_v17 }
 0x46f   :  { %6576 = vst.msk [vmem:[%s11443_s9 + $0x2c] sm:$0xf] %vm2234_vm1, %v6512_v23  ;;  %v6200_v6 = vsel %vm410_vm0, %v6199_v54, %v6181_v30  ;;  %v6210_v18 = vperm.slane %v6202_v49, %v7614_v21 }
 0x470   :  { %6592 = vst.msk [vmem:[%s11443_s9 + $0x6c] sm:$0xf] %vm2234_vm1, %v6528_v35  ;;  %v6206_v55 = vperm.slane %v6200_v6, %v7614_v21  ;;  %v6211_v19 = vrot.slane %v6198_v20, 4  ;;  %v6214_v50 = vsel %vm410_vm0, %v6198_v20, %v6213_v5 }
 0x471   :  { %v6222_v48 = vperm.slane %v6214_v50, %v7614_v21  ;;  %v6229_v47 = vrot.slane %v6210_v18, 4 }
 0x472   :  { %v6225_v31 = vrot.slane %v6206_v55, 4  ;;  %v6212_v11 = vsel %vm410_vm0, %v6211_v19, %v6192_v12 }
 0x473   :  { %v6218_v24 = vperm.slane %v6212_v11, %v7614_v21  ;;  %v6227_v57 = vrot.slane %v6222_v48, 4  ;;  %v6230_v46 = vsel %vm410_vm0, %v6222_v48, %v6229_v47 }
 0x474   :  { %v6559_v41 = vpack.c.bf16 %v6230_v46, %v6230_v46 }
 0x475   :  { %v6223_v34 = vrot.slane %v6218_v24, 4  ;;  %v6226_v26 = vsel %vm410_vm0, %v6218_v24, %v6225_v31  ;;  %v6228_v0 = vsel %vm410_vm0, %v6227_v57, %v6210_v18 }
 0x476   :  { %v6527_v36 = vpack.c.bf16 %v6226_v26, %v6226_v26  ;;  %v6543_v13 = vpack.c.bf16 %v6228_v0, %v6228_v0  ;;  %6623 = vst.msk [vmem:[%s11443_s9 + $0xe8] sm:$0xf] %vm2234_vm1, %v6559_v41 }
 0x477   :  { %v6224_v59 = vsel %vm410_vm0, %v6223_v34, %v6206_v55 }
 0x478   :  { %v6511_v28 = vpack.c.bf16 %v6224_v59, %v6224_v59  ;;  %6591 = vst.msk [vmem:[%s11443_s9 + $0x68] sm:$0xf] %vm2234_vm1, %v6527_v36 }
 0x479   :  { %6607 = vst.msk [vmem:[%s11443_s9 + $0xa8] sm:$0xf] %vm2234_vm1, %v6543_v13 }
 0x47a   :  { %6575 = vst.msk [vmem:[%s11443_s9 + $0x28] sm:$0xf] %vm2234_vm1, %v6511_v28 }
 0x47b   :  { %6641 = vsyncpa [#allocation3], 1 }
 0x47c   :  { %6642 = vsyncpa [#allocation5], 1 }
 0x47d   :  { %6643 = vsyncpa [#allocation8], 1 }

</bundles_post_ra>
